<compile_context>
chip_gen: v6e
topology: v6e:2x2x1
jax: 0.10.0
libtpu: 0.0.40
codegen_flags: <defaults>
</compile_context>

<pallas_src>
import functools

import jax
import jax.numpy as jnp
from jax import lax
from jax.experimental import pallas as pl
from jax.experimental.pallas import tpu as pltpu


# ----------------------------------------------------------------------------
# Generic helpers
# ----------------------------------------------------------------------------
def _vmem_budget_bytes():
    """Generation-aware VMEM budget (v7x: 64 MiB phys -> ~48 MiB; v5e/v6e -> 96 MiB)."""
    phys = 64 * 1024 * 1024  # conservative fallback (v7x per-TC VMEM)
    try:
        info = pltpu.get_tpu_info()
        phys = int(getattr(info, "vmem_capacity_bytes", phys))
    except Exception:
        pass
    return min((phys * 3) // 4, 96 * 1024 * 1024)


def _pick_tile_h(H, row_bytes, budget_bytes, prefer_multiple_tiles=False):
    """Largest H-tile (multiple of 8 dividing H, or H) fitting the VMEM budget."""
    cands = sorted({h for h in range(8, H, 8) if H % h == 0} | {H})
    feasible = [h for h in cands if h * row_bytes <= budget_bytes] or [cands[0]]
    th = max(feasible)
    if prefer_multiple_tiles and th == H:          # keep both v7x cores busy
        smaller = [h for h in feasible if h < H]
        if smaller:
            th = max(smaller)
    return th


def _halo_rows(x, tile_h):
    """Rows just above/below every H-tile (reflect at image edges).

    Reads only ~2*num_tiles rows per image (strided slices), no full padded copy.
    x: (..., H, W) -> (..., num_tiles, 2, W)
    """
    H = x.shape[-2]
    top = jnp.concatenate(
        [x[..., 1:2, :], x[..., tile_h - 1:H - tile_h:tile_h, :]], axis=-2)
    bot = jnp.concatenate(
        [x[..., tile_h:H:tile_h, :], x[..., H - 2:H - 1, :]], axis=-2)
    return jnp.stack([top, bot], axis=-2)


def _lower_median(x_flat):
    """Exact lower median per row (torch.median semantics) via 32-step bit bisection.

    Avoids the O(N log N) XLA sort: 32 sequential O(N) counting passes over a
    monotone uint32 key of the float bits.
    """
    B, N = x_flat.shape
    k = (N - 1) // 2                                  # 0-indexed target rank
    bits = lax.bitcast_convert_type(x_flat.astype(jnp.float32), jnp.uint32)
    neg = (bits >> jnp.uint32(31)) == jnp.uint32(1)
    key = jnp.where(neg, ~bits, bits | jnp.uint32(0x80000000))

    def body(i, res):
        bit = jnp.left_shift(jnp.uint32(1), jnp.uint32(31) - i.astype(jnp.uint32))
        cand = res | bit
        cnt = jnp.sum((key < cand[:, None]).astype(jnp.int32), axis=1)
        return jnp.where(cnt <= k, cand, res)

    res = lax.fori_loop(0, 32, body, jnp.zeros((B,), jnp.uint32))
    was_neg = (res & jnp.uint32(0x80000000)) == jnp.uint32(0)
    out_bits = jnp.where(was_neg, ~res, res & jnp.uint32(0x7FFFFFFF))
    return lax.bitcast_convert_type(out_bits, jnp.float32)


# ----------------------------------------------------------------------------
# SSL (min-reconstruction automasked) kernel
# ----------------------------------------------------------------------------
def _ssl_kernel(*refs, tile_h, width, n_warped, n_support, alpha, c1, c2,
                compute_dtype):
    """One (batch, H-tile) step: SSIM+L1 vs target for all frames, min, sum.

    refs = [tgt, tgt_halo, frame_0, halo_0, ..., frame_{F-1}, halo_{F-1},
            (noise if n_support>0), out]
    """
    n_frames = n_warped + n_support
    tgt_ref, tgt_halo_ref = refs[0], refs[1]
    frame_refs = refs[2:2 + 2 * n_frames]
    noise_ref = refs[2 + 2 * n_frames] if n_support > 0 else None
    out_ref = refs[-1]

    f32 = jnp.float32
    cdt = compute_dtype

    # Edge masks, built once per invocation and reused by every pool below.
    row_ids = lax.broadcasted_iota(jnp.int32, (1, tile_h, width), 1)
    col_ids = lax.broadcasted_iota(jnp.int32, (1, tile_h, width), 2)
    is_top = row_ids == 0
    is_bot = row_ids == tile_h - 1
    is_left = col_ids == 0
    is_right = col_ids == width - 1

    def pool3x3(q, q_top, q_bot):
        # Separable 3x3 mean: row pass uses the tile halos; column pass uses
        # reflect at the image edges.  pltpu.roll runs on the (otherwise idle)
        # XLU slot instead of 9 shifted slices on the VALU.
        u = pltpu.roll(q, 1, axis=1)                 # u[i] = q[i-1]
        d = pltpu.roll(q, tile_h - 1, axis=1)        # d[i] = q[i+1]
        u = jnp.where(is_top, q_top, u)
        d = jnp.where(is_bot, q_bot, d)
        r = u + q + d
        lraw = pltpu.roll(r, 1, axis=2)              # lraw[j] = r[j-1]
        rraw = pltpu.roll(r, width - 1, axis=2)      # rraw[j] = r[j+1]
        lfix = jnp.where(is_left, rraw, lraw)        # reflect: r[-1] -> r[1]
        rfix = jnp.where(is_right, lraw, rraw)       # reflect: r[W]  -> r[W-2]
        return (lfix + r + rfix) * (1.0 / 9.0)

    # Target statistics: computed once per tile, shared by every frame.
    y = tgt_ref[...].astype(cdt)                     # (C, TH, W)
    yh = tgt_halo_ref[...].astype(cdt)               # (C, 2, W)
    yt = yh[:, 0:1, :]
    yb = yh[:, 1:2, :]
    mu_y = pool3x3(y, yt, yb)
    sigma_y = pool3x3(y * y, yt * yt, yb * yb) - mu_y * mu_y
    muy2_c1 = (mu_y * mu_y).astype(f32) + c1         # folded constants (per tile)
    sy_c2 = sigma_y.astype(f32) + c2
    two_mu_y = (2.0 * mu_y).astype(f32)

    min_acc = None
    for fi in range(n_frames):
        x = frame_refs[2 * fi][...].astype(cdt)
        xh = frame_refs[2 * fi + 1][...].astype(cdt)
        xt = xh[:, 0:1, :]
        xb = xh[:, 1:2, :]

        mu_x = pool3x3(x, xt, xb)
        sigma_x = pool3x3(x * x, xt * xt, xb * xb) - mu_x * mu_x
        sigma_xy = pool3x3(x * y, xt * yt, xb * yb) - mu_x * mu_y

        mu_x32 = mu_x.astype(f32)
        ssim_n = (two_mu_y * mu_x32 + c1) * (2.0 * sigma_xy.astype(f32) + c2)
        ssim_d = (mu_x32 * mu_x32 + muy2_c1) * (sigma_x.astype(f32) + sy_c2)
        inv_d = pl.reciprocal(ssim_d, approx=True)   # EUP slot
        inv_d = inv_d * (2.0 - ssim_d * inv_d)       # one NR step -> ~f32 exact
        ssim_out = jnp.clip((1.0 - ssim_n * inv_d) * 0.5, 0.0, 1.0)
        ssim_out = jnp.mean(ssim_out, axis=0)        # (TH, W) channel mean
        l1_out = jnp.mean(jnp.abs(y - x).astype(f32), axis=0)
        photo = alpha * ssim_out + (1.0 - alpha) * l1_out

        if fi >= n_warped:                           # automask noise: support only
            photo = photo + 1e-5 * noise_ref[fi - n_warped]

        min_acc = photo if min_acc is None else jnp.minimum(min_acc, photo)

    out_ref[...] = jnp.full((1, 1), jnp.sum(min_acc), dtype=out_ref.dtype)


def ssl_loss_pallas(target, warped_list, support_list, noise, alpha=0.85,
                    tile_h=None, compute_dtype=jnp.float32):
    B, C, H, W = target.shape
    n_warped = len(warped_list)
    n_support = len(support_list)
    n_frames = n_warped + n_support
    assert n_frames >= 1

    cdt = jnp.dtype(compute_dtype)
    in_dt = cdt if cdt == jnp.bfloat16 else jnp.float32  # bf16 opt-in halves DMA bytes
    ebytes = jnp.dtype(in_dt).itemsize

    target = target.astype(in_dt)
    frames = [f.astype(in_dt) for f in list(warped_list) + list(support_list)]

    budget = _vmem_budget_bytes()
    if tile_h is None:
        # per-row-of-tile VMEM estimate: double-buffered input tiles + ~14 live
        # f32 compute planes per channel (pool intermediates, SSIM terms).
        row_bytes = W * (2 * ((1 + n_frames) * C + n_support) * ebytes + 14 * C * 4)
        tile_h = _pick_tile_h(H, row_bytes, int(budget * 0.8),
                              prefer_multiple_tiles=(B == 1))
    assert H % tile_h == 0 and (tile_h % 8 == 0 or tile_h == H)
    num_t = H // tile_h

    kernel = functools.partial(
        _ssl_kernel, tile_h=tile_h, width=W, n_warped=n_warped,
        n_support=n_support, alpha=alpha, c1=0.01 ** 2, c2=0.03 ** 2,
        compute_dtype=cdt)

    frame_spec = pl.BlockSpec((None, C, tile_h, W), lambda b, t: (b, 0, t, 0))
    halo_spec = pl.BlockSpec((None, C, None, 2, W), lambda b, t: (b, 0, t, 0, 0))

    operands = [target, _halo_rows(target, tile_h)]
    in_specs = [frame_spec, halo_spec]
    for f in frames:
        operands += [f, _halo_rows(f, tile_h)]
        in_specs += [frame_spec, halo_spec]
    if n_support > 0:
        operands.append(noise.astype(jnp.float32))   # (n_support, B, H, W)
        in_specs.append(pl.BlockSpec((n_support, None, tile_h, W),
                                     lambda b, t: (0, b, t, 0)))

    partial_sums = pl.pallas_call(
        kernel,
        out_shape=jax.ShapeDtypeStruct((B, num_t, 1, 1), jnp.float32),
        grid=(B, num_t),
        in_specs=in_specs,
        out_specs=pl.BlockSpec((None, None, 1, 1), lambda b, t: (b, t, 0, 0)),
        compiler_params=pltpu.CompilerParams(
            dimension_semantics=("parallel", "parallel"),
            vmem_limit_bytes=budget),
    )(*operands)

    return partial_sums.sum() / (B * H * W)


# ----------------------------------------------------------------------------
# PSL (scale-shift-invariant) kernel
# ----------------------------------------------------------------------------
def _ssi_kernel(stats_ref, pred_ref, gt_ref, out_ref):
    b = pl.program_id(0)
    p = pred_ref[...]                    # (TH, W) f32
    g = gt_ref[...]
    # stats: [p_min, p_inv_range, p_med_norm, p_inv_s, g_min, g_inv_range,
    #         g_med_norm, g_inv_s]
    p_dev = ((p - stats_ref[b, 0]) * stats_ref[b, 1] - stats_ref[b, 2]) * stats_ref[b, 3]
    g_dev = ((g - stats_ref[b, 4]) * stats_ref[b, 5] - stats_ref[b, 6]) * stats_ref[b, 7]
    out_ref[...] = jnp.full((1, 1), jnp.sum(jnp.abs(p_dev - g_dev)),
                            dtype=out_ref.dtype)


def ssi_loss_pallas(pred_disp, pseudo_disp, tile_h=None):
    B, C, H, W = pred_disp.shape
    assert C == 1, "disparity maps are single-channel"
    N = H * W
    eps = 1e-6
    pred = pred_disp.reshape(B, H, W).astype(jnp.float32)
    gt = pseudo_disp.reshape(B, H, W).astype(jnp.float32)

    # TODO(synk): the exact lower-median selection + the s_p/s_g reductions run
    # as wrapper-side JAX (cheap fused passes); a first tiled Pallas reduction
    # pass could fold them in but is not needed for correctness.
    def stats(x):
        flat = x.reshape(B, N)
        mn = jnp.min(flat, axis=1)
        mx = jnp.max(flat, axis=1)
        inv_rng = 1.0 / (mx - mn + eps)
        med = (_lower_median(flat) - mn) * inv_rng    # median of normalized map
        s = jnp.mean(jnp.abs((flat - mn[:, None]) * inv_rng[:, None] - med[:, None]),
                     axis=1)
        inv_s = 1.0 / jnp.maximum(s, 1e-30)           # guard degenerate constant maps
        return mn, inv_rng, med, inv_s

    pmn, pir, pmed, pis = stats(pred)
    gmn, gir, gmed, gis = stats(gt)
    stats_arr = jnp.stack([pmn, pir, pmed, pis, gmn, gir, gmed, gis], axis=-1)

    budget = _vmem_budget_bytes()
    if tile_h is None:
        row_bytes = W * 4 * 12       # 2 maps x 2 buffers + live temporaries (f32)
        tile_h = _pick_tile_h(H, row_bytes, int(budget * 0.8),
                              prefer_multiple_tiles=(B == 1))
    assert H % tile_h == 0 and (tile_h % 8 == 0 or tile_h == H)
    num_t = H // tile_h

    out = pl.pallas_call(
        _ssi_kernel,
        out_shape=jax.ShapeDtypeStruct((B, num_t, 1, 1), jnp.float32),
        grid=(B, num_t),
        in_specs=[
            pl.BlockSpec(memory_space=pltpu.MemorySpace.SMEM),   # per-batch scalars
            pl.BlockSpec((None, tile_h, W), lambda b, t: (b, t, 0)),
            pl.BlockSpec((None, tile_h, W), lambda b, t: (b, t, 0)),
        ],
        out_specs=pl.BlockSpec((None, None, 1, 1), lambda b, t: (b, t, 0, 0)),
        compiler_params=pltpu.CompilerParams(
            dimension_semantics=("parallel", "parallel"),
            vmem_limit_bytes=budget),
    )(stats_arr, pred, gt)
    return out.sum() / (B * N)


# ----------------------------------------------------------------------------
# CombinedLoss forward
# ----------------------------------------------------------------------------
def combined_loss(target_frame, warped_support_frames, support_frames,
                  pred_disp, pseudo_disp, noise, lambda_factor=0.9,
                  tile_h=None, compute_dtype=jnp.float32):
    psl = ssi_loss_pallas(pred_disp, pseudo_disp)
    ssl = ssl_loss_pallas(target_frame, warped_support_frames, support_frames,
                          noise, tile_h=tile_h, compute_dtype=compute_dtype)
    total = lambda_factor * ssl + (1.0 - lambda_factor) * psl
    return {"psl": psl, "ssl": ssl, "total": total}


# ----------------------------------------------------------------------------
# Pure-JAX reference (mirrors the PyTorch code) for a correctness check
# ----------------------------------------------------------------------------
def _lower_median_bchw(t):
    B, C, H, W = t.shape
    srt = jnp.sort(t.reshape(B, C, H * W), axis=-1)
    return srt[..., (H * W - 1) // 2]


def _reference(target, warped, support, pred_disp, pseudo_disp, noise,
               lam=0.9, alpha=0.85):
    def normalize(t):
        B = t.shape[0]
        flat = t.reshape(B, -1)
        mn = flat.min(axis=1).reshape(B, 1, 1, 1)
        mx = flat.max(axis=1).reshape(B, 1, 1, 1)
        return (t - mn) / (mx - mn + 1e-6)

    def ssi(pred, gt):
        npd, ngt = normalize(pred), normalize(gt)
        tp = _lower_median_bchw(npd)[:, :, None, None]
        tg = _lower_median_bchw(ngt)[:, :, None, None]
        sp = jnp.mean(jnp.abs(npd - tp), axis=(2, 3), keepdims=True)
        sg = jnp.mean(jnp.abs(ngt - tg), axis=(2, 3), keepdims=True)
        return jnp.mean(jnp.abs((npd - tp) / sp - (ngt - tg) / sg))

    def pool3(p, H, W):
        return sum(p[:, :, di:di + H, dj:dj + W]
                   for di in range(3) for dj in range(3)) / 9.0

    def photometric(x, y):
        B, C, H, W = x.shape
        xp = jnp.pad(x, ((0, 0), (0, 0), (1, 1), (1, 1)), mode="reflect")
        yp = jnp.pad(y, ((0, 0), (0, 0), (1, 1), (1, 1)), mode="reflect")
        mux, muy = pool3(xp, H, W), pool3(yp, H, W)
        sx = pool3(xp * xp, H, W) - mux ** 2
        sy = pool3(yp * yp, H, W) - muy ** 2
        sxy = pool3(xp * yp, H, W) - mux * muy
        C1, C2 = 0.01 ** 2, 0.03 ** 2
        n = (2 * mux * muy + C1) * (2 * sxy + C2)
        d = (mux ** 2 + muy ** 2 + C1) * (sx + sy + C2)
        s_out = jnp.clip((1 - n / d) / 2, 0, 1).mean(axis=1, keepdims=True)
        l1_out = jnp.abs(y - x).mean(axis=1, keepdims=True)
        return alpha * s_out + (1 - alpha) * l1_out

    pw = jnp.concatenate([photometric(w, target) for w in warped], axis=1)
    ps = jnp.concatenate([photometric(s, target) for s in support], axis=1)
    ps = ps + jnp.transpose(noise, (1, 0, 2, 3)) * 1e-5
    ssl = jnp.min(jnp.concatenate([pw, ps], axis=1), axis=1).mean()
    psl = ssi(pred_disp, pseudo_disp)
    return {"psl": psl, "ssl": ssl, "total": lam * ssl + (1 - lam) * psl}


# ----------------------------------------------------------------------------
if __name__ == "__main__":
    key = jax.random.PRNGKey(0)
    ks = jax.random.split(key, 8)
    B, C, H, W = 2, 3, 16, 16
    n_warped, n_support = 2, 2

    target = jax.random.uniform(ks[0], (B, C, H, W), jnp.float32)
    warped = [jax.random.uniform(ks[1], (B, C, H, W), jnp.float32),
              jax.random.uniform(ks[2], (B, C, H, W), jnp.float32)]
    support = [jax.random.uniform(ks[3], (B, C, H, W), jnp.float32),
               jax.random.uniform(ks[4], (B, C, H, W), jnp.float32)]
    pred_disp = jax.random.uniform(ks[5], (B, 1, H, W), jnp.float32,
                                   minval=0.01, maxval=1.0)
    pseudo_disp = jax.random.uniform(ks[6], (B, 1, H, W), jnp.float32,
                                     minval=0.01, maxval=1.0)
    # automask noise (torch.randn_like equivalent; values differ from torch RNG)
    noise = jax.random.normal(ks[7], (n_support, B, H, W), jnp.float32)

    ref = _reference(target, warped, support, pred_disp, pseudo_disp, noise)

    # tile_h=8 exercises the multi-tile halo path; tile_h=None exercises the
    # VMEM-budgeted auto tile pick (single full-H tile at this size).
    for th in (8, None):
        loss_fn = jax.jit(functools.partial(combined_loss, lambda_factor=0.9,
                                            tile_h=th))
        out = jax.block_until_ready(
            loss_fn(target, warped, support, pred_disp, pseudo_disp, noise))
        for k in ("psl", "ssl", "total"):
            assert jnp.allclose(out[k], ref[k], rtol=1e-4, atol=1e-4), (
                th, k, float(out[k]), float(ref[k]))

    print("KERNEL_OK")
</pallas_src>

<mosaic_0001>
module attributes {stable_mosaic.version = 11 : i64} {
  func.func @_ssl_kernel(%arg0: i32, %arg1: i32, %arg2: memref<1x3x8x16xf32, #tpu.memory_space<vmem>>, %arg3: memref<1x3x1x2x16xf32, #tpu.memory_space<vmem>>, %arg4: memref<1x3x8x16xf32, #tpu.memory_space<vmem>>, %arg5: memref<1x3x1x2x16xf32, #tpu.memory_space<vmem>>, %arg6: memref<1x3x8x16xf32, #tpu.memory_space<vmem>>, %arg7: memref<1x3x1x2x16xf32, #tpu.memory_space<vmem>>, %arg8: memref<1x3x8x16xf32, #tpu.memory_space<vmem>>, %arg9: memref<1x3x1x2x16xf32, #tpu.memory_space<vmem>>, %arg10: memref<1x3x8x16xf32, #tpu.memory_space<vmem>>, %arg11: memref<1x3x1x2x16xf32, #tpu.memory_space<vmem>>, %arg12: memref<2x1x8x16xf32, #tpu.memory_space<vmem>>, %arg13: memref<1x1x1x1xf32, #tpu.memory_space<vmem>>) attributes {dimension_semantics = [#tpu.dimension_semantics<parallel>, #tpu.dimension_semantics<parallel>], iteration_bounds = array<i64: 2, 2>, scalar_prefetch = 0 : i64, scratch_operands = 0 : i64, tpu.core_type = #tpu.core_type<tc>, window_params = [{transform_indices = @transform_0, window_bounds = array<i64: 1, 3, 8, 16>}, {transform_indices = @transform_1, window_bounds = array<i64: 1, 3, 1, 2, 16>}, {transform_indices = @transform_2, window_bounds = array<i64: 1, 3, 8, 16>}, {transform_indices = @transform_3, window_bounds = array<i64: 1, 3, 1, 2, 16>}, {transform_indices = @transform_4, window_bounds = array<i64: 1, 3, 8, 16>}, {transform_indices = @transform_5, window_bounds = array<i64: 1, 3, 1, 2, 16>}, {transform_indices = @transform_6, window_bounds = array<i64: 1, 3, 8, 16>}, {transform_indices = @transform_7, window_bounds = array<i64: 1, 3, 1, 2, 16>}, {transform_indices = @transform_8, window_bounds = array<i64: 1, 3, 8, 16>}, {transform_indices = @transform_9, window_bounds = array<i64: 1, 3, 1, 2, 16>}, {transform_indices = @transform_10, window_bounds = array<i64: 2, 1, 8, 16>}, {transform_indices = @transform_11, window_bounds = array<i64: 1, 1, 1, 1>}]} {
    %0 = tpu.iota {dimensions = array<i32: 1>} : vector<1x8x16xi32>
    %1 = tpu.iota {dimensions = array<i32: 2>} : vector<1x8x16xi32>
    %c0_i32 = arith.constant 0 : i32
    %2 = vector.broadcast %c0_i32 : i32 to vector<1x8x16xi32>
    %3 = arith.cmpi eq, %0, %2 : vector<1x8x16xi32>
    %c7_i32 = arith.constant 7 : i32
    %4 = vector.broadcast %c7_i32 : i32 to vector<1x8x16xi32>
    %5 = arith.cmpi eq, %0, %4 : vector<1x8x16xi32>
    %c0_i32_0 = arith.constant 0 : i32
    %6 = vector.broadcast %c0_i32_0 : i32 to vector<1x8x16xi32>
    %7 = arith.cmpi eq, %1, %6 : vector<1x8x16xi32>
    %c15_i32 = arith.constant 15 : i32
    %8 = vector.broadcast %c15_i32 : i32 to vector<1x8x16xi32>
    %9 = arith.cmpi eq, %1, %8 : vector<1x8x16xi32>
    %c0 = arith.constant 0 : index
    %c0_1 = arith.constant 0 : index
    %c0_2 = arith.constant 0 : index
    %c0_3 = arith.constant 0 : index
    %10 = vector.load %arg2[%c0, %c0_1, %c0_2, %c0_3] : memref<1x3x8x16xf32, #tpu.memory_space<vmem>>, vector<1x3x8x16xf32>
    %11 = vector.shape_cast %10 : vector<1x3x8x16xf32> to vector<3x8x16xf32>
    %c0_4 = arith.constant 0 : index
    %c0_5 = arith.constant 0 : index
    %c0_6 = arith.constant 0 : index
    %c0_7 = arith.constant 0 : index
    %c0_8 = arith.constant 0 : index
    %12 = vector.load %arg3[%c0_4, %c0_5, %c0_6, %c0_7, %c0_8] : memref<1x3x1x2x16xf32, #tpu.memory_space<vmem>>, vector<1x3x1x2x16xf32>
    %13 = vector.shape_cast %12 : vector<1x3x1x2x16xf32> to vector<3x2x16xf32>
    %14 = vector.extract_strided_slice %13 {offsets = [0, 0, 0], sizes = [3, 1, 16], strides = [1, 1, 1]} : vector<3x2x16xf32> to vector<3x1x16xf32>
    %15 = vector.extract_strided_slice %13 {offsets = [0, 1, 0], sizes = [3, 1, 16], strides = [1, 1, 1]} : vector<3x2x16xf32> to vector<3x1x16xf32>
    %c1_i32 = arith.constant 1 : i32
    %16 = tpu.dynamic_rotate %11 by %c1_i32 dim 1 : vector<3x8x16xf32>, i32 -> vector<3x8x16xf32>
    %c7_i32_9 = arith.constant 7 : i32
    %17 = tpu.dynamic_rotate %11 by %c7_i32_9 dim 1 : vector<3x8x16xf32>, i32 -> vector<3x8x16xf32>
    %18 = vector.shape_cast %3 : vector<1x8x16xi1> to vector<1x8x16xi1>
    %19 = vector.broadcast %18 : vector<1x8x16xi1> to vector<3x8x16xi1>
    %20 = vector.shape_cast %14 : vector<3x1x16xf32> to vector<3x1x16xf32>
    %21 = vector.broadcast %20 : vector<3x1x16xf32> to vector<3x8x16xf32>
    %22 = arith.select %19, %21, %16 : vector<3x8x16xi1>, vector<3x8x16xf32>
    %23 = vector.shape_cast %5 : vector<1x8x16xi1> to vector<1x8x16xi1>
    %24 = vector.broadcast %23 : vector<1x8x16xi1> to vector<3x8x16xi1>
    %25 = vector.shape_cast %15 : vector<3x1x16xf32> to vector<3x1x16xf32>
    %26 = vector.broadcast %25 : vector<3x1x16xf32> to vector<3x8x16xf32>
    %27 = arith.select %24, %26, %17 : vector<3x8x16xi1>, vector<3x8x16xf32>
    %28 = arith.addf %22, %11 : vector<3x8x16xf32>
    %29 = arith.addf %28, %27 : vector<3x8x16xf32>
    %c1_i32_10 = arith.constant 1 : i32
    %30 = tpu.dynamic_rotate %29 by %c1_i32_10 dim 2 : vector<3x8x16xf32>, i32 -> vector<3x8x16xf32>
    %c15_i32_11 = arith.constant 15 : i32
    %31 = tpu.dynamic_rotate %29 by %c15_i32_11 dim 2 : vector<3x8x16xf32>, i32 -> vector<3x8x16xf32>
    %32 = vector.shape_cast %7 : vector<1x8x16xi1> to vector<1x8x16xi1>
    %33 = vector.broadcast %32 : vector<1x8x16xi1> to vector<3x8x16xi1>
    %34 = arith.select %33, %31, %30 : vector<3x8x16xi1>, vector<3x8x16xf32>
    %35 = vector.shape_cast %9 : vector<1x8x16xi1> to vector<1x8x16xi1>
    %36 = vector.broadcast %35 : vector<1x8x16xi1> to vector<3x8x16xi1>
    %37 = arith.select %36, %30, %31 : vector<3x8x16xi1>, vector<3x8x16xf32>
    %38 = arith.addf %34, %29 : vector<3x8x16xf32>
    %39 = arith.addf %38, %37 : vector<3x8x16xf32>
    %cst = arith.constant 0.111111112 : f32
    %40 = vector.broadcast %cst : f32 to vector<3x8x16xf32>
    %41 = arith.mulf %39, %40 : vector<3x8x16xf32>
    %42 = arith.mulf %11, %11 : vector<3x8x16xf32>
    %43 = arith.mulf %14, %14 : vector<3x1x16xf32>
    %44 = arith.mulf %15, %15 : vector<3x1x16xf32>
    %c1_i32_12 = arith.constant 1 : i32
    %45 = tpu.dynamic_rotate %42 by %c1_i32_12 dim 1 : vector<3x8x16xf32>, i32 -> vector<3x8x16xf32>
    %c7_i32_13 = arith.constant 7 : i32
    %46 = tpu.dynamic_rotate %42 by %c7_i32_13 dim 1 : vector<3x8x16xf32>, i32 -> vector<3x8x16xf32>
    %47 = vector.shape_cast %3 : vector<1x8x16xi1> to vector<1x8x16xi1>
    %48 = vector.broadcast %47 : vector<1x8x16xi1> to vector<3x8x16xi1>
    %49 = vector.shape_cast %43 : vector<3x1x16xf32> to vector<3x1x16xf32>
    %50 = vector.broadcast %49 : vector<3x1x16xf32> to vector<3x8x16xf32>
    %51 = arith.select %48, %50, %45 : vector<3x8x16xi1>, vector<3x8x16xf32>
    %52 = vector.shape_cast %5 : vector<1x8x16xi1> to vector<1x8x16xi1>
    %53 = vector.broadcast %52 : vector<1x8x16xi1> to vector<3x8x16xi1>
    %54 = vector.shape_cast %44 : vector<3x1x16xf32> to vector<3x1x16xf32>
    %55 = vector.broadcast %54 : vector<3x1x16xf32> to vector<3x8x16xf32>
    %56 = arith.select %53, %55, %46 : vector<3x8x16xi1>, vector<3x8x16xf32>
    %57 = arith.addf %51, %42 : vector<3x8x16xf32>
    %58 = arith.addf %57, %56 : vector<3x8x16xf32>
    %c1_i32_14 = arith.constant 1 : i32
    %59 = tpu.dynamic_rotate %58 by %c1_i32_14 dim 2 : vector<3x8x16xf32>, i32 -> vector<3x8x16xf32>
    %c15_i32_15 = arith.constant 15 : i32
    %60 = tpu.dynamic_rotate %58 by %c15_i32_15 dim 2 : vector<3x8x16xf32>, i32 -> vector<3x8x16xf32>
    %61 = vector.shape_cast %7 : vector<1x8x16xi1> to vector<1x8x16xi1>
    %62 = vector.broadcast %61 : vector<1x8x16xi1> to vector<3x8x16xi1>
    %63 = arith.select %62, %60, %59 : vector<3x8x16xi1>, vector<3x8x16xf32>
    %64 = vector.shape_cast %9 : vector<1x8x16xi1> to vector<1x8x16xi1>
    %65 = vector.broadcast %64 : vector<1x8x16xi1> to vector<3x8x16xi1>
    %66 = arith.select %65, %59, %60 : vector<3x8x16xi1>, vector<3x8x16xf32>
    %67 = arith.addf %63, %58 : vector<3x8x16xf32>
    %68 = arith.addf %67, %66 : vector<3x8x16xf32>
    %cst_16 = arith.constant 0.111111112 : f32
    %69 = vector.broadcast %cst_16 : f32 to vector<3x8x16xf32>
    %70 = arith.mulf %68, %69 : vector<3x8x16xf32>
    %71 = arith.mulf %41, %41 : vector<3x8x16xf32>
    %72 = arith.subf %70, %71 : vector<3x8x16xf32>
    %73 = arith.mulf %41, %41 : vector<3x8x16xf32>
    %cst_17 = arith.constant 9.99999974E-5 : f32
    %74 = vector.broadcast %cst_17 : f32 to vector<3x8x16xf32>
    %75 = arith.addf %73, %74 : vector<3x8x16xf32>
    %cst_18 = arith.constant 8.99999984E-4 : f32
    %76 = vector.broadcast %cst_18 : f32 to vector<3x8x16xf32>
    %77 = arith.addf %72, %76 : vector<3x8x16xf32>
    %cst_19 = arith.constant 2.000000e+00 : f32
    %78 = vector.broadcast %cst_19 : f32 to vector<3x8x16xf32>
    %79 = arith.mulf %78, %41 : vector<3x8x16xf32>
    %c0_20 = arith.constant 0 : index
    %c0_21 = arith.constant 0 : index
    %c0_22 = arith.constant 0 : index
    %c0_23 = arith.constant 0 : index
    %80 = vector.load %arg4[%c0_20, %c0_21, %c0_22, %c0_23] : memref<1x3x8x16xf32, #tpu.memory_space<vmem>>, vector<1x3x8x16xf32>
    %81 = vector.shape_cast %80 : vector<1x3x8x16xf32> to vector<3x8x16xf32>
    %c0_24 = arith.constant 0 : index
    %c0_25 = arith.constant 0 : index
    %c0_26 = arith.constant 0 : index
    %c0_27 = arith.constant 0 : index
    %c0_28 = arith.constant 0 : index
    %82 = vector.load %arg5[%c0_24, %c0_25, %c0_26, %c0_27, %c0_28] : memref<1x3x1x2x16xf32, #tpu.memory_space<vmem>>, vector<1x3x1x2x16xf32>
    %83 = vector.shape_cast %82 : vector<1x3x1x2x16xf32> to vector<3x2x16xf32>
    %84 = vector.extract_strided_slice %83 {offsets = [0, 0, 0], sizes = [3, 1, 16], strides = [1, 1, 1]} : vector<3x2x16xf32> to vector<3x1x16xf32>
    %85 = vector.extract_strided_slice %83 {offsets = [0, 1, 0], sizes = [3, 1, 16], strides = [1, 1, 1]} : vector<3x2x16xf32> to vector<3x1x16xf32>
    %c1_i32_29 = arith.constant 1 : i32
    %86 = tpu.dynamic_rotate %81 by %c1_i32_29 dim 1 : vector<3x8x16xf32>, i32 -> vector<3x8x16xf32>
    %c7_i32_30 = arith.constant 7 : i32
    %87 = tpu.dynamic_rotate %81 by %c7_i32_30 dim 1 : vector<3x8x16xf32>, i32 -> vector<3x8x16xf32>
    %88 = vector.shape_cast %3 : vector<1x8x16xi1> to vector<1x8x16xi1>
    %89 = vector.broadcast %88 : vector<1x8x16xi1> to vector<3x8x16xi1>
    %90 = vector.shape_cast %84 : vector<3x1x16xf32> to vector<3x1x16xf32>
    %91 = vector.broadcast %90 : vector<3x1x16xf32> to vector<3x8x16xf32>
    %92 = arith.select %89, %91, %86 : vector<3x8x16xi1>, vector<3x8x16xf32>
    %93 = vector.shape_cast %5 : vector<1x8x16xi1> to vector<1x8x16xi1>
    %94 = vector.broadcast %93 : vector<1x8x16xi1> to vector<3x8x16xi1>
    %95 = vector.shape_cast %85 : vector<3x1x16xf32> to vector<3x1x16xf32>
    %96 = vector.broadcast %95 : vector<3x1x16xf32> to vector<3x8x16xf32>
    %97 = arith.select %94, %96, %87 : vector<3x8x16xi1>, vector<3x8x16xf32>
    %98 = arith.addf %92, %81 : vector<3x8x16xf32>
    %99 = arith.addf %98, %97 : vector<3x8x16xf32>
    %c1_i32_31 = arith.constant 1 : i32
    %100 = tpu.dynamic_rotate %99 by %c1_i32_31 dim 2 : vector<3x8x16xf32>, i32 -> vector<3x8x16xf32>
    %c15_i32_32 = arith.constant 15 : i32
    %101 = tpu.dynamic_rotate %99 by %c15_i32_32 dim 2 : vector<3x8x16xf32>, i32 -> vector<3x8x16xf32>
    %102 = vector.shape_cast %7 : vector<1x8x16xi1> to vector<1x8x16xi1>
    %103 = vector.broadcast %102 : vector<1x8x16xi1> to vector<3x8x16xi1>
    %104 = arith.select %103, %101, %100 : vector<3x8x16xi1>, vector<3x8x16xf32>
    %105 = vector.shape_cast %9 : vector<1x8x16xi1> to vector<1x8x16xi1>
    %106 = vector.broadcast %105 : vector<1x8x16xi1> to vector<3x8x16xi1>
    %107 = arith.select %106, %100, %101 : vector<3x8x16xi1>, vector<3x8x16xf32>
    %108 = arith.addf %104, %99 : vector<3x8x16xf32>
    %109 = arith.addf %108, %107 : vector<3x8x16xf32>
    %cst_33 = arith.constant 0.111111112 : f32
    %110 = vector.broadcast %cst_33 : f32 to vector<3x8x16xf32>
    %111 = arith.mulf %109, %110 : vector<3x8x16xf32>
    %112 = arith.mulf %81, %81 : vector<3x8x16xf32>
    %113 = arith.mulf %84, %84 : vector<3x1x16xf32>
    %114 = arith.mulf %85, %85 : vector<3x1x16xf32>
    %c1_i32_34 = arith.constant 1 : i32
    %115 = tpu.dynamic_rotate %112 by %c1_i32_34 dim 1 : vector<3x8x16xf32>, i32 -> vector<3x8x16xf32>
    %c7_i32_35 = arith.constant 7 : i32
    %116 = tpu.dynamic_rotate %112 by %c7_i32_35 dim 1 : vector<3x8x16xf32>, i32 -> vector<3x8x16xf32>
    %117 = vector.shape_cast %3 : vector<1x8x16xi1> to vector<1x8x16xi1>
    %118 = vector.broadcast %117 : vector<1x8x16xi1> to vector<3x8x16xi1>
    %119 = vector.shape_cast %113 : vector<3x1x16xf32> to vector<3x1x16xf32>
    %120 = vector.broadcast %119 : vector<3x1x16xf32> to vector<3x8x16xf32>
    %121 = arith.select %118, %120, %115 : vector<3x8x16xi1>, vector<3x8x16xf32>
    %122 = vector.shape_cast %5 : vector<1x8x16xi1> to vector<1x8x16xi1>
    %123 = vector.broadcast %122 : vector<1x8x16xi1> to vector<3x8x16xi1>
    %124 = vector.shape_cast %114 : vector<3x1x16xf32> to vector<3x1x16xf32>
    %125 = vector.broadcast %124 : vector<3x1x16xf32> to vector<3x8x16xf32>
    %126 = arith.select %123, %125, %116 : vector<3x8x16xi1>, vector<3x8x16xf32>
    %127 = arith.addf %121, %112 : vector<3x8x16xf32>
    %128 = arith.addf %127, %126 : vector<3x8x16xf32>
    %c1_i32_36 = arith.constant 1 : i32
    %129 = tpu.dynamic_rotate %128 by %c1_i32_36 dim 2 : vector<3x8x16xf32>, i32 -> vector<3x8x16xf32>
    %c15_i32_37 = arith.constant 15 : i32
    %130 = tpu.dynamic_rotate %128 by %c15_i32_37 dim 2 : vector<3x8x16xf32>, i32 -> vector<3x8x16xf32>
    %131 = vector.shape_cast %7 : vector<1x8x16xi1> to vector<1x8x16xi1>
    %132 = vector.broadcast %131 : vector<1x8x16xi1> to vector<3x8x16xi1>
    %133 = arith.select %132, %130, %129 : vector<3x8x16xi1>, vector<3x8x16xf32>
    %134 = vector.shape_cast %9 : vector<1x8x16xi1> to vector<1x8x16xi1>
    %135 = vector.broadcast %134 : vector<1x8x16xi1> to vector<3x8x16xi1>
    %136 = arith.select %135, %129, %130 : vector<3x8x16xi1>, vector<3x8x16xf32>
    %137 = arith.addf %133, %128 : vector<3x8x16xf32>
    %138 = arith.addf %137, %136 : vector<3x8x16xf32>
    %cst_38 = arith.constant 0.111111112 : f32
    %139 = vector.broadcast %cst_38 : f32 to vector<3x8x16xf32>
    %140 = arith.mulf %138, %139 : vector<3x8x16xf32>
    %141 = arith.mulf %111, %111 : vector<3x8x16xf32>
    %142 = arith.subf %140, %141 : vector<3x8x16xf32>
    %143 = arith.mulf %81, %11 : vector<3x8x16xf32>
    %144 = arith.mulf %84, %14 : vector<3x1x16xf32>
    %145 = arith.mulf %85, %15 : vector<3x1x16xf32>
    %c1_i32_39 = arith.constant 1 : i32
    %146 = tpu.dynamic_rotate %143 by %c1_i32_39 dim 1 : vector<3x8x16xf32>, i32 -> vector<3x8x16xf32>
    %c7_i32_40 = arith.constant 7 : i32
    %147 = tpu.dynamic_rotate %143 by %c7_i32_40 dim 1 : vector<3x8x16xf32>, i32 -> vector<3x8x16xf32>
    %148 = vector.shape_cast %3 : vector<1x8x16xi1> to vector<1x8x16xi1>
    %149 = vector.broadcast %148 : vector<1x8x16xi1> to vector<3x8x16xi1>
    %150 = vector.shape_cast %144 : vector<3x1x16xf32> to vector<3x1x16xf32>
    %151 = vector.broadcast %150 : vector<3x1x16xf32> to vector<3x8x16xf32>
    %152 = arith.select %149, %151, %146 : vector<3x8x16xi1>, vector<3x8x16xf32>
    %153 = vector.shape_cast %5 : vector<1x8x16xi1> to vector<1x8x16xi1>
    %154 = vector.broadcast %153 : vector<1x8x16xi1> to vector<3x8x16xi1>
    %155 = vector.shape_cast %145 : vector<3x1x16xf32> to vector<3x1x16xf32>
    %156 = vector.broadcast %155 : vector<3x1x16xf32> to vector<3x8x16xf32>
    %157 = arith.select %154, %156, %147 : vector<3x8x16xi1>, vector<3x8x16xf32>
    %158 = arith.addf %152, %143 : vector<3x8x16xf32>
    %159 = arith.addf %158, %157 : vector<3x8x16xf32>
    %c1_i32_41 = arith.constant 1 : i32
    %160 = tpu.dynamic_rotate %159 by %c1_i32_41 dim 2 : vector<3x8x16xf32>, i32 -> vector<3x8x16xf32>
    %c15_i32_42 = arith.constant 15 : i32
    %161 = tpu.dynamic_rotate %159 by %c15_i32_42 dim 2 : vector<3x8x16xf32>, i32 -> vector<3x8x16xf32>
    %162 = vector.shape_cast %7 : vector<1x8x16xi1> to vector<1x8x16xi1>
    %163 = vector.broadcast %162 : vector<1x8x16xi1> to vector<3x8x16xi1>
    %164 = arith.select %163, %161, %160 : vector<3x8x16xi1>, vector<3x8x16xf32>
    %165 = vector.shape_cast %9 : vector<1x8x16xi1> to vector<1x8x16xi1>
    %166 = vector.broadcast %165 : vector<1x8x16xi1> to vector<3x8x16xi1>
    %167 = arith.select %166, %160, %161 : vector<3x8x16xi1>, vector<3x8x16xf32>
    %168 = arith.addf %164, %159 : vector<3x8x16xf32>
    %169 = arith.addf %168, %167 : vector<3x8x16xf32>
    %cst_43 = arith.constant 0.111111112 : f32
    %170 = vector.broadcast %cst_43 : f32 to vector<3x8x16xf32>
    %171 = arith.mulf %169, %170 : vector<3x8x16xf32>
    %172 = arith.mulf %111, %41 : vector<3x8x16xf32>
    %173 = arith.subf %171, %172 : vector<3x8x16xf32>
    %174 = arith.mulf %79, %111 : vector<3x8x16xf32>
    %cst_44 = arith.constant 9.99999974E-5 : f32
    %175 = vector.broadcast %cst_44 : f32 to vector<3x8x16xf32>
    %176 = arith.addf %174, %175 : vector<3x8x16xf32>
    %cst_45 = arith.constant 2.000000e+00 : f32
    %177 = vector.broadcast %cst_45 : f32 to vector<3x8x16xf32>
    %178 = arith.mulf %177, %173 : vector<3x8x16xf32>
    %cst_46 = arith.constant 8.99999984E-4 : f32
    %179 = vector.broadcast %cst_46 : f32 to vector<3x8x16xf32>
    %180 = arith.addf %178, %179 : vector<3x8x16xf32>
    %181 = arith.mulf %176, %180 : vector<3x8x16xf32>
    %182 = arith.mulf %111, %111 : vector<3x8x16xf32>
    %183 = arith.addf %182, %75 : vector<3x8x16xf32>
    %184 = arith.addf %142, %77 : vector<3x8x16xf32>
    %185 = arith.mulf %183, %184 : vector<3x8x16xf32>
    %186 = tpu.reciprocal %185 {approx = true} : vector<3x8x16xf32> -> vector<3x8x16xf32>
    %187 = arith.mulf %185, %186 : vector<3x8x16xf32>
    %cst_47 = arith.constant 2.000000e+00 : f32
    %188 = vector.broadcast %cst_47 : f32 to vector<3x8x16xf32>
    %189 = arith.subf %188, %187 : vector<3x8x16xf32>
    %190 = arith.mulf %186, %189 : vector<3x8x16xf32>
    %191 = arith.mulf %181, %190 : vector<3x8x16xf32>
    %cst_48 = arith.constant 1.000000e+00 : f32
    %192 = vector.broadcast %cst_48 : f32 to vector<3x8x16xf32>
    %193 = arith.subf %192, %191 : vector<3x8x16xf32>
    %cst_49 = arith.constant 5.000000e-01 : f32
    %194 = vector.broadcast %cst_49 : f32 to vector<3x8x16xf32>
    %195 = arith.mulf %193, %194 : vector<3x8x16xf32>
    %cst_50 = arith.constant 0.000000e+00 : f32
    %cst_51 = arith.constant 1.000000e+00 : f32
    %196 = vector.broadcast %cst_50 : f32 to vector<3x8x16xf32>
    %197 = arith.maximumf %196, %195 : vector<3x8x16xf32>
    %198 = vector.broadcast %cst_51 : f32 to vector<3x8x16xf32>
    %199 = arith.minimumf %198, %197 : vector<3x8x16xf32>
    %cst_52 = arith.constant dense<0.000000e+00> : vector<8x16xf32>
    %200 = vector.multi_reduction <add>, %199, %cst_52 [0] : vector<3x8x16xf32> to vector<8x16xf32>
    %cst_53 = arith.constant 3.000000e+00 : f32
    %201 = vector.broadcast %cst_53 : f32 to vector<8x16xf32>
    %202 = arith.divf %200, %201 : vector<8x16xf32>
    %203 = arith.subf %11, %81 : vector<3x8x16xf32>
    %204 = math.absf %203 : vector<3x8x16xf32>
    %cst_54 = arith.constant dense<0.000000e+00> : vector<8x16xf32>
    %205 = vector.multi_reduction <add>, %204, %cst_54 [0] : vector<3x8x16xf32> to vector<8x16xf32>
    %cst_55 = arith.constant 3.000000e+00 : f32
    %206 = vector.broadcast %cst_55 : f32 to vector<8x16xf32>
    %207 = arith.divf %205, %206 : vector<8x16xf32>
    %cst_56 = arith.constant 8.500000e-01 : f32
    %208 = vector.broadcast %cst_56 : f32 to vector<8x16xf32>
    %209 = arith.mulf %208, %202 : vector<8x16xf32>
    %cst_57 = arith.constant 1.500000e-01 : f32
    %210 = vector.broadcast %cst_57 : f32 to vector<8x16xf32>
    %211 = arith.mulf %210, %207 : vector<8x16xf32>
    %212 = arith.addf %209, %211 : vector<8x16xf32>
    %c0_58 = arith.constant 0 : index
    %c0_59 = arith.constant 0 : index
    %c0_60 = arith.constant 0 : index
    %c0_61 = arith.constant 0 : index
    %213 = vector.load %arg6[%c0_58, %c0_59, %c0_60, %c0_61] : memref<1x3x8x16xf32, #tpu.memory_space<vmem>>, vector<1x3x8x16xf32>
    %214 = vector.shape_cast %213 : vector<1x3x8x16xf32> to vector<3x8x16xf32>
    %c0_62 = arith.constant 0 : index
    %c0_63 = arith.constant 0 : index
    %c0_64 = arith.constant 0 : index
    %c0_65 = arith.constant 0 : index
    %c0_66 = arith.constant 0 : index
    %215 = vector.load %arg7[%c0_62, %c0_63, %c0_64, %c0_65, %c0_66] : memref<1x3x1x2x16xf32, #tpu.memory_space<vmem>>, vector<1x3x1x2x16xf32>
    %216 = vector.shape_cast %215 : vector<1x3x1x2x16xf32> to vector<3x2x16xf32>
    %217 = vector.extract_strided_slice %216 {offsets = [0, 0, 0], sizes = [3, 1, 16], strides = [1, 1, 1]} : vector<3x2x16xf32> to vector<3x1x16xf32>
    %218 = vector.extract_strided_slice %216 {offsets = [0, 1, 0], sizes = [3, 1, 16], strides = [1, 1, 1]} : vector<3x2x16xf32> to vector<3x1x16xf32>
    %c1_i32_67 = arith.constant 1 : i32
    %219 = tpu.dynamic_rotate %214 by %c1_i32_67 dim 1 : vector<3x8x16xf32>, i32 -> vector<3x8x16xf32>
    %c7_i32_68 = arith.constant 7 : i32
    %220 = tpu.dynamic_rotate %214 by %c7_i32_68 dim 1 : vector<3x8x16xf32>, i32 -> vector<3x8x16xf32>
    %221 = vector.shape_cast %3 : vector<1x8x16xi1> to vector<1x8x16xi1>
    %222 = vector.broadcast %221 : vector<1x8x16xi1> to vector<3x8x16xi1>
    %223 = vector.shape_cast %217 : vector<3x1x16xf32> to vector<3x1x16xf32>
    %224 = vector.broadcast %223 : vector<3x1x16xf32> to vector<3x8x16xf32>
    %225 = arith.select %222, %224, %219 : vector<3x8x16xi1>, vector<3x8x16xf32>
    %226 = vector.shape_cast %5 : vector<1x8x16xi1> to vector<1x8x16xi1>
    %227 = vector.broadcast %226 : vector<1x8x16xi1> to vector<3x8x16xi1>
    %228 = vector.shape_cast %218 : vector<3x1x16xf32> to vector<3x1x16xf32>
    %229 = vector.broadcast %228 : vector<3x1x16xf32> to vector<3x8x16xf32>
    %230 = arith.select %227, %229, %220 : vector<3x8x16xi1>, vector<3x8x16xf32>
    %231 = arith.addf %225, %214 : vector<3x8x16xf32>
    %232 = arith.addf %231, %230 : vector<3x8x16xf32>
    %c1_i32_69 = arith.constant 1 : i32
    %233 = tpu.dynamic_rotate %232 by %c1_i32_69 dim 2 : vector<3x8x16xf32>, i32 -> vector<3x8x16xf32>
    %c15_i32_70 = arith.constant 15 : i32
    %234 = tpu.dynamic_rotate %232 by %c15_i32_70 dim 2 : vector<3x8x16xf32>, i32 -> vector<3x8x16xf32>
    %235 = vector.shape_cast %7 : vector<1x8x16xi1> to vector<1x8x16xi1>
    %236 = vector.broadcast %235 : vector<1x8x16xi1> to vector<3x8x16xi1>
    %237 = arith.select %236, %234, %233 : vector<3x8x16xi1>, vector<3x8x16xf32>
    %238 = vector.shape_cast %9 : vector<1x8x16xi1> to vector<1x8x16xi1>
    %239 = vector.broadcast %238 : vector<1x8x16xi1> to vector<3x8x16xi1>
    %240 = arith.select %239, %233, %234 : vector<3x8x16xi1>, vector<3x8x16xf32>
    %241 = arith.addf %237, %232 : vector<3x8x16xf32>
    %242 = arith.addf %241, %240 : vector<3x8x16xf32>
    %cst_71 = arith.constant 0.111111112 : f32
    %243 = vector.broadcast %cst_71 : f32 to vector<3x8x16xf32>
    %244 = arith.mulf %242, %243 : vector<3x8x16xf32>
    %245 = arith.mulf %214, %214 : vector<3x8x16xf32>
    %246 = arith.mulf %217, %217 : vector<3x1x16xf32>
    %247 = arith.mulf %218, %218 : vector<3x1x16xf32>
    %c1_i32_72 = arith.constant 1 : i32
    %248 = tpu.dynamic_rotate %245 by %c1_i32_72 dim 1 : vector<3x8x16xf32>, i32 -> vector<3x8x16xf32>
    %c7_i32_73 = arith.constant 7 : i32
    %249 = tpu.dynamic_rotate %245 by %c7_i32_73 dim 1 : vector<3x8x16xf32>, i32 -> vector<3x8x16xf32>
    %250 = vector.shape_cast %3 : vector<1x8x16xi1> to vector<1x8x16xi1>
    %251 = vector.broadcast %250 : vector<1x8x16xi1> to vector<3x8x16xi1>
    %252 = vector.shape_cast %246 : vector<3x1x16xf32> to vector<3x1x16xf32>
    %253 = vector.broadcast %252 : vector<3x1x16xf32> to vector<3x8x16xf32>
    %254 = arith.select %251, %253, %248 : vector<3x8x16xi1>, vector<3x8x16xf32>
    %255 = vector.shape_cast %5 : vector<1x8x16xi1> to vector<1x8x16xi1>
    %256 = vector.broadcast %255 : vector<1x8x16xi1> to vector<3x8x16xi1>
    %257 = vector.shape_cast %247 : vector<3x1x16xf32> to vector<3x1x16xf32>
    %258 = vector.broadcast %257 : vector<3x1x16xf32> to vector<3x8x16xf32>
    %259 = arith.select %256, %258, %249 : vector<3x8x16xi1>, vector<3x8x16xf32>
    %260 = arith.addf %254, %245 : vector<3x8x16xf32>
    %261 = arith.addf %260, %259 : vector<3x8x16xf32>
    %c1_i32_74 = arith.constant 1 : i32
    %262 = tpu.dynamic_rotate %261 by %c1_i32_74 dim 2 : vector<3x8x16xf32>, i32 -> vector<3x8x16xf32>
    %c15_i32_75 = arith.constant 15 : i32
    %263 = tpu.dynamic_rotate %261 by %c15_i32_75 dim 2 : vector<3x8x16xf32>, i32 -> vector<3x8x16xf32>
    %264 = vector.shape_cast %7 : vector<1x8x16xi1> to vector<1x8x16xi1>
    %265 = vector.broadcast %264 : vector<1x8x16xi1> to vector<3x8x16xi1>
    %266 = arith.select %265, %263, %262 : vector<3x8x16xi1>, vector<3x8x16xf32>
    %267 = vector.shape_cast %9 : vector<1x8x16xi1> to vector<1x8x16xi1>
    %268 = vector.broadcast %267 : vector<1x8x16xi1> to vector<3x8x16xi1>
    %269 = arith.select %268, %262, %263 : vector<3x8x16xi1>, vector<3x8x16xf32>
    %270 = arith.addf %266, %261 : vector<3x8x16xf32>
    %271 = arith.addf %270, %269 : vector<3x8x16xf32>
    %cst_76 = arith.constant 0.111111112 : f32
    %272 = vector.broadcast %cst_76 : f32 to vector<3x8x16xf32>
    %273 = arith.mulf %271, %272 : vector<3x8x16xf32>
    %274 = arith.mulf %244, %244 : vector<3x8x16xf32>
    %275 = arith.subf %273, %274 : vector<3x8x16xf32>
    %276 = arith.mulf %214, %11 : vector<3x8x16xf32>
    %277 = arith.mulf %217, %14 : vector<3x1x16xf32>
    %278 = arith.mulf %218, %15 : vector<3x1x16xf32>
    %c1_i32_77 = arith.constant 1 : i32
    %279 = tpu.dynamic_rotate %276 by %c1_i32_77 dim 1 : vector<3x8x16xf32>, i32 -> vector<3x8x16xf32>
    %c7_i32_78 = arith.constant 7 : i32
    %280 = tpu.dynamic_rotate %276 by %c7_i32_78 dim 1 : vector<3x8x16xf32>, i32 -> vector<3x8x16xf32>
    %281 = vector.shape_cast %3 : vector<1x8x16xi1> to vector<1x8x16xi1>
    %282 = vector.broadcast %281 : vector<1x8x16xi1> to vector<3x8x16xi1>
    %283 = vector.shape_cast %277 : vector<3x1x16xf32> to vector<3x1x16xf32>
    %284 = vector.broadcast %283 : vector<3x1x16xf32> to vector<3x8x16xf32>
    %285 = arith.select %282, %284, %279 : vector<3x8x16xi1>, vector<3x8x16xf32>
    %286 = vector.shape_cast %5 : vector<1x8x16xi1> to vector<1x8x16xi1>
    %287 = vector.broadcast %286 : vector<1x8x16xi1> to vector<3x8x16xi1>
    %288 = vector.shape_cast %278 : vector<3x1x16xf32> to vector<3x1x16xf32>
    %289 = vector.broadcast %288 : vector<3x1x16xf32> to vector<3x8x16xf32>
    %290 = arith.select %287, %289, %280 : vector<3x8x16xi1>, vector<3x8x16xf32>
    %291 = arith.addf %285, %276 : vector<3x8x16xf32>
    %292 = arith.addf %291, %290 : vector<3x8x16xf32>
    %c1_i32_79 = arith.constant 1 : i32
    %293 = tpu.dynamic_rotate %292 by %c1_i32_79 dim 2 : vector<3x8x16xf32>, i32 -> vector<3x8x16xf32>
    %c15_i32_80 = arith.constant 15 : i32
    %294 = tpu.dynamic_rotate %292 by %c15_i32_80 dim 2 : vector<3x8x16xf32>, i32 -> vector<3x8x16xf32>
    %295 = vector.shape_cast %7 : vector<1x8x16xi1> to vector<1x8x16xi1>
    %296 = vector.broadcast %295 : vector<1x8x16xi1> to vector<3x8x16xi1>
    %297 = arith.select %296, %294, %293 : vector<3x8x16xi1>, vector<3x8x16xf32>
    %298 = vector.shape_cast %9 : vector<1x8x16xi1> to vector<1x8x16xi1>
    %299 = vector.broadcast %298 : vector<1x8x16xi1> to vector<3x8x16xi1>
    %300 = arith.select %299, %293, %294 : vector<3x8x16xi1>, vector<3x8x16xf32>
    %301 = arith.addf %297, %292 : vector<3x8x16xf32>
    %302 = arith.addf %301, %300 : vector<3x8x16xf32>
    %cst_81 = arith.constant 0.111111112 : f32
    %303 = vector.broadcast %cst_81 : f32 to vector<3x8x16xf32>
    %304 = arith.mulf %302, %303 : vector<3x8x16xf32>
    %305 = arith.mulf %244, %41 : vector<3x8x16xf32>
    %306 = arith.subf %304, %305 : vector<3x8x16xf32>
    %307 = arith.mulf %79, %244 : vector<3x8x16xf32>
    %cst_82 = arith.constant 9.99999974E-5 : f32
    %308 = vector.broadcast %cst_82 : f32 to vector<3x8x16xf32>
    %309 = arith.addf %307, %308 : vector<3x8x16xf32>
    %cst_83 = arith.constant 2.000000e+00 : f32
    %310 = vector.broadcast %cst_83 : f32 to vector<3x8x16xf32>
    %311 = arith.mulf %310, %306 : vector<3x8x16xf32>
    %cst_84 = arith.constant 8.99999984E-4 : f32
    %312 = vector.broadcast %cst_84 : f32 to vector<3x8x16xf32>
    %313 = arith.addf %311, %312 : vector<3x8x16xf32>
    %314 = arith.mulf %309, %313 : vector<3x8x16xf32>
    %315 = arith.mulf %244, %244 : vector<3x8x16xf32>
    %316 = arith.addf %315, %75 : vector<3x8x16xf32>
    %317 = arith.addf %275, %77 : vector<3x8x16xf32>
    %318 = arith.mulf %316, %317 : vector<3x8x16xf32>
    %319 = tpu.reciprocal %318 {approx = true} : vector<3x8x16xf32> -> vector<3x8x16xf32>
    %320 = arith.mulf %318, %319 : vector<3x8x16xf32>
    %cst_85 = arith.constant 2.000000e+00 : f32
    %321 = vector.broadcast %cst_85 : f32 to vector<3x8x16xf32>
    %322 = arith.subf %321, %320 : vector<3x8x16xf32>
    %323 = arith.mulf %319, %322 : vector<3x8x16xf32>
    %324 = arith.mulf %314, %323 : vector<3x8x16xf32>
    %cst_86 = arith.constant 1.000000e+00 : f32
    %325 = vector.broadcast %cst_86 : f32 to vector<3x8x16xf32>
    %326 = arith.subf %325, %324 : vector<3x8x16xf32>
    %cst_87 = arith.constant 5.000000e-01 : f32
    %327 = vector.broadcast %cst_87 : f32 to vector<3x8x16xf32>
    %328 = arith.mulf %326, %327 : vector<3x8x16xf32>
    %cst_88 = arith.constant 0.000000e+00 : f32
    %cst_89 = arith.constant 1.000000e+00 : f32
    %329 = vector.broadcast %cst_88 : f32 to vector<3x8x16xf32>
    %330 = arith.maximumf %329, %328 : vector<3x8x16xf32>
    %331 = vector.broadcast %cst_89 : f32 to vector<3x8x16xf32>
    %332 = arith.minimumf %331, %330 : vector<3x8x16xf32>
    %cst_90 = arith.constant dense<0.000000e+00> : vector<8x16xf32>
    %333 = vector.multi_reduction <add>, %332, %cst_90 [0] : vector<3x8x16xf32> to vector<8x16xf32>
    %cst_91 = arith.constant 3.000000e+00 : f32
    %334 = vector.broadcast %cst_91 : f32 to vector<8x16xf32>
    %335 = arith.divf %333, %334 : vector<8x16xf32>
    %336 = arith.subf %11, %214 : vector<3x8x16xf32>
    %337 = math.absf %336 : vector<3x8x16xf32>
    %cst_92 = arith.constant dense<0.000000e+00> : vector<8x16xf32>
    %338 = vector.multi_reduction <add>, %337, %cst_92 [0] : vector<3x8x16xf32> to vector<8x16xf32>
    %cst_93 = arith.constant 3.000000e+00 : f32
    %339 = vector.broadcast %cst_93 : f32 to vector<8x16xf32>
    %340 = arith.divf %338, %339 : vector<8x16xf32>
    %cst_94 = arith.constant 8.500000e-01 : f32
    %341 = vector.broadcast %cst_94 : f32 to vector<8x16xf32>
    %342 = arith.mulf %341, %335 : vector<8x16xf32>
    %cst_95 = arith.constant 1.500000e-01 : f32
    %343 = vector.broadcast %cst_95 : f32 to vector<8x16xf32>
    %344 = arith.mulf %343, %340 : vector<8x16xf32>
    %345 = arith.addf %342, %344 : vector<8x16xf32>
    %346 = arith.minimumf %212, %345 : vector<8x16xf32>
    %c0_96 = arith.constant 0 : index
    %c0_97 = arith.constant 0 : index
    %c0_98 = arith.constant 0 : index
    %c0_99 = arith.constant 0 : index
    %347 = vector.load %arg8[%c0_96, %c0_97, %c0_98, %c0_99] : memref<1x3x8x16xf32, #tpu.memory_space<vmem>>, vector<1x3x8x16xf32>
    %348 = vector.shape_cast %347 : vector<1x3x8x16xf32> to vector<3x8x16xf32>
    %c0_100 = arith.constant 0 : index
    %c0_101 = arith.constant 0 : index
    %c0_102 = arith.constant 0 : index
    %c0_103 = arith.constant 0 : index
    %c0_104 = arith.constant 0 : index
    %349 = vector.load %arg9[%c0_100, %c0_101, %c0_102, %c0_103, %c0_104] : memref<1x3x1x2x16xf32, #tpu.memory_space<vmem>>, vector<1x3x1x2x16xf32>
    %350 = vector.shape_cast %349 : vector<1x3x1x2x16xf32> to vector<3x2x16xf32>
    %351 = vector.extract_strided_slice %350 {offsets = [0, 0, 0], sizes = [3, 1, 16], strides = [1, 1, 1]} : vector<3x2x16xf32> to vector<3x1x16xf32>
    %352 = vector.extract_strided_slice %350 {offsets = [0, 1, 0], sizes = [3, 1, 16], strides = [1, 1, 1]} : vector<3x2x16xf32> to vector<3x1x16xf32>
    %c1_i32_105 = arith.constant 1 : i32
    %353 = tpu.dynamic_rotate %348 by %c1_i32_105 dim 1 : vector<3x8x16xf32>, i32 -> vector<3x8x16xf32>
    %c7_i32_106 = arith.constant 7 : i32
    %354 = tpu.dynamic_rotate %348 by %c7_i32_106 dim 1 : vector<3x8x16xf32>, i32 -> vector<3x8x16xf32>
    %355 = vector.shape_cast %3 : vector<1x8x16xi1> to vector<1x8x16xi1>
    %356 = vector.broadcast %355 : vector<1x8x16xi1> to vector<3x8x16xi1>
    %357 = vector.shape_cast %351 : vector<3x1x16xf32> to vector<3x1x16xf32>
    %358 = vector.broadcast %357 : vector<3x1x16xf32> to vector<3x8x16xf32>
    %359 = arith.select %356, %358, %353 : vector<3x8x16xi1>, vector<3x8x16xf32>
    %360 = vector.shape_cast %5 : vector<1x8x16xi1> to vector<1x8x16xi1>
    %361 = vector.broadcast %360 : vector<1x8x16xi1> to vector<3x8x16xi1>
    %362 = vector.shape_cast %352 : vector<3x1x16xf32> to vector<3x1x16xf32>
    %363 = vector.broadcast %362 : vector<3x1x16xf32> to vector<3x8x16xf32>
    %364 = arith.select %361, %363, %354 : vector<3x8x16xi1>, vector<3x8x16xf32>
    %365 = arith.addf %359, %348 : vector<3x8x16xf32>
    %366 = arith.addf %365, %364 : vector<3x8x16xf32>
    %c1_i32_107 = arith.constant 1 : i32
    %367 = tpu.dynamic_rotate %366 by %c1_i32_107 dim 2 : vector<3x8x16xf32>, i32 -> vector<3x8x16xf32>
    %c15_i32_108 = arith.constant 15 : i32
    %368 = tpu.dynamic_rotate %366 by %c15_i32_108 dim 2 : vector<3x8x16xf32>, i32 -> vector<3x8x16xf32>
    %369 = vector.shape_cast %7 : vector<1x8x16xi1> to vector<1x8x16xi1>
    %370 = vector.broadcast %369 : vector<1x8x16xi1> to vector<3x8x16xi1>
    %371 = arith.select %370, %368, %367 : vector<3x8x16xi1>, vector<3x8x16xf32>
    %372 = vector.shape_cast %9 : vector<1x8x16xi1> to vector<1x8x16xi1>
    %373 = vector.broadcast %372 : vector<1x8x16xi1> to vector<3x8x16xi1>
    %374 = arith.select %373, %367, %368 : vector<3x8x16xi1>, vector<3x8x16xf32>
    %375 = arith.addf %371, %366 : vector<3x8x16xf32>
    %376 = arith.addf %375, %374 : vector<3x8x16xf32>
    %cst_109 = arith.constant 0.111111112 : f32
    %377 = vector.broadcast %cst_109 : f32 to vector<3x8x16xf32>
    %378 = arith.mulf %376, %377 : vector<3x8x16xf32>
    %379 = arith.mulf %348, %348 : vector<3x8x16xf32>
    %380 = arith.mulf %351, %351 : vector<3x1x16xf32>
    %381 = arith.mulf %352, %352 : vector<3x1x16xf32>
    %c1_i32_110 = arith.constant 1 : i32
    %382 = tpu.dynamic_rotate %379 by %c1_i32_110 dim 1 : vector<3x8x16xf32>, i32 -> vector<3x8x16xf32>
    %c7_i32_111 = arith.constant 7 : i32
    %383 = tpu.dynamic_rotate %379 by %c7_i32_111 dim 1 : vector<3x8x16xf32>, i32 -> vector<3x8x16xf32>
    %384 = vector.shape_cast %3 : vector<1x8x16xi1> to vector<1x8x16xi1>
    %385 = vector.broadcast %384 : vector<1x8x16xi1> to vector<3x8x16xi1>
    %386 = vector.shape_cast %380 : vector<3x1x16xf32> to vector<3x1x16xf32>
    %387 = vector.broadcast %386 : vector<3x1x16xf32> to vector<3x8x16xf32>
    %388 = arith.select %385, %387, %382 : vector<3x8x16xi1>, vector<3x8x16xf32>
    %389 = vector.shape_cast %5 : vector<1x8x16xi1> to vector<1x8x16xi1>
    %390 = vector.broadcast %389 : vector<1x8x16xi1> to vector<3x8x16xi1>
    %391 = vector.shape_cast %381 : vector<3x1x16xf32> to vector<3x1x16xf32>
    %392 = vector.broadcast %391 : vector<3x1x16xf32> to vector<3x8x16xf32>
    %393 = arith.select %390, %392, %383 : vector<3x8x16xi1>, vector<3x8x16xf32>
    %394 = arith.addf %388, %379 : vector<3x8x16xf32>
    %395 = arith.addf %394, %393 : vector<3x8x16xf32>
    %c1_i32_112 = arith.constant 1 : i32
    %396 = tpu.dynamic_rotate %395 by %c1_i32_112 dim 2 : vector<3x8x16xf32>, i32 -> vector<3x8x16xf32>
    %c15_i32_113 = arith.constant 15 : i32
    %397 = tpu.dynamic_rotate %395 by %c15_i32_113 dim 2 : vector<3x8x16xf32>, i32 -> vector<3x8x16xf32>
    %398 = vector.shape_cast %7 : vector<1x8x16xi1> to vector<1x8x16xi1>
    %399 = vector.broadcast %398 : vector<1x8x16xi1> to vector<3x8x16xi1>
    %400 = arith.select %399, %397, %396 : vector<3x8x16xi1>, vector<3x8x16xf32>
    %401 = vector.shape_cast %9 : vector<1x8x16xi1> to vector<1x8x16xi1>
    %402 = vector.broadcast %401 : vector<1x8x16xi1> to vector<3x8x16xi1>
    %403 = arith.select %402, %396, %397 : vector<3x8x16xi1>, vector<3x8x16xf32>
    %404 = arith.addf %400, %395 : vector<3x8x16xf32>
    %405 = arith.addf %404, %403 : vector<3x8x16xf32>
    %cst_114 = arith.constant 0.111111112 : f32
    %406 = vector.broadcast %cst_114 : f32 to vector<3x8x16xf32>
    %407 = arith.mulf %405, %406 : vector<3x8x16xf32>
    %408 = arith.mulf %378, %378 : vector<3x8x16xf32>
    %409 = arith.subf %407, %408 : vector<3x8x16xf32>
    %410 = arith.mulf %348, %11 : vector<3x8x16xf32>
    %411 = arith.mulf %351, %14 : vector<3x1x16xf32>
    %412 = arith.mulf %352, %15 : vector<3x1x16xf32>
    %c1_i32_115 = arith.constant 1 : i32
    %413 = tpu.dynamic_rotate %410 by %c1_i32_115 dim 1 : vector<3x8x16xf32>, i32 -> vector<3x8x16xf32>
    %c7_i32_116 = arith.constant 7 : i32
    %414 = tpu.dynamic_rotate %410 by %c7_i32_116 dim 1 : vector<3x8x16xf32>, i32 -> vector<3x8x16xf32>
    %415 = vector.shape_cast %3 : vector<1x8x16xi1> to vector<1x8x16xi1>
    %416 = vector.broadcast %415 : vector<1x8x16xi1> to vector<3x8x16xi1>
    %417 = vector.shape_cast %411 : vector<3x1x16xf32> to vector<3x1x16xf32>
    %418 = vector.broadcast %417 : vector<3x1x16xf32> to vector<3x8x16xf32>
    %419 = arith.select %416, %418, %413 : vector<3x8x16xi1>, vector<3x8x16xf32>
    %420 = vector.shape_cast %5 : vector<1x8x16xi1> to vector<1x8x16xi1>
    %421 = vector.broadcast %420 : vector<1x8x16xi1> to vector<3x8x16xi1>
    %422 = vector.shape_cast %412 : vector<3x1x16xf32> to vector<3x1x16xf32>
    %423 = vector.broadcast %422 : vector<3x1x16xf32> to vector<3x8x16xf32>
    %424 = arith.select %421, %423, %414 : vector<3x8x16xi1>, vector<3x8x16xf32>
    %425 = arith.addf %419, %410 : vector<3x8x16xf32>
    %426 = arith.addf %425, %424 : vector<3x8x16xf32>
    %c1_i32_117 = arith.constant 1 : i32
    %427 = tpu.dynamic_rotate %426 by %c1_i32_117 dim 2 : vector<3x8x16xf32>, i32 -> vector<3x8x16xf32>
    %c15_i32_118 = arith.constant 15 : i32
    %428 = tpu.dynamic_rotate %426 by %c15_i32_118 dim 2 : vector<3x8x16xf32>, i32 -> vector<3x8x16xf32>
    %429 = vector.shape_cast %7 : vector<1x8x16xi1> to vector<1x8x16xi1>
    %430 = vector.broadcast %429 : vector<1x8x16xi1> to vector<3x8x16xi1>
    %431 = arith.select %430, %428, %427 : vector<3x8x16xi1>, vector<3x8x16xf32>
    %432 = vector.shape_cast %9 : vector<1x8x16xi1> to vector<1x8x16xi1>
    %433 = vector.broadcast %432 : vector<1x8x16xi1> to vector<3x8x16xi1>
    %434 = arith.select %433, %427, %428 : vector<3x8x16xi1>, vector<3x8x16xf32>
    %435 = arith.addf %431, %426 : vector<3x8x16xf32>
    %436 = arith.addf %435, %434 : vector<3x8x16xf32>
    %cst_119 = arith.constant 0.111111112 : f32
    %437 = vector.broadcast %cst_119 : f32 to vector<3x8x16xf32>
    %438 = arith.mulf %436, %437 : vector<3x8x16xf32>
    %439 = arith.mulf %378, %41 : vector<3x8x16xf32>
    %440 = arith.subf %438, %439 : vector<3x8x16xf32>
    %441 = arith.mulf %79, %378 : vector<3x8x16xf32>
    %cst_120 = arith.constant 9.99999974E-5 : f32
    %442 = vector.broadcast %cst_120 : f32 to vector<3x8x16xf32>
    %443 = arith.addf %441, %442 : vector<3x8x16xf32>
    %cst_121 = arith.constant 2.000000e+00 : f32
    %444 = vector.broadcast %cst_121 : f32 to vector<3x8x16xf32>
    %445 = arith.mulf %444, %440 : vector<3x8x16xf32>
    %cst_122 = arith.constant 8.99999984E-4 : f32
    %446 = vector.broadcast %cst_122 : f32 to vector<3x8x16xf32>
    %447 = arith.addf %445, %446 : vector<3x8x16xf32>
    %448 = arith.mulf %443, %447 : vector<3x8x16xf32>
    %449 = arith.mulf %378, %378 : vector<3x8x16xf32>
    %450 = arith.addf %449, %75 : vector<3x8x16xf32>
    %451 = arith.addf %409, %77 : vector<3x8x16xf32>
    %452 = arith.mulf %450, %451 : vector<3x8x16xf32>
    %453 = tpu.reciprocal %452 {approx = true} : vector<3x8x16xf32> -> vector<3x8x16xf32>
    %454 = arith.mulf %452, %453 : vector<3x8x16xf32>
    %cst_123 = arith.constant 2.000000e+00 : f32
    %455 = vector.broadcast %cst_123 : f32 to vector<3x8x16xf32>
    %456 = arith.subf %455, %454 : vector<3x8x16xf32>
    %457 = arith.mulf %453, %456 : vector<3x8x16xf32>
    %458 = arith.mulf %448, %457 : vector<3x8x16xf32>
    %cst_124 = arith.constant 1.000000e+00 : f32
    %459 = vector.broadcast %cst_124 : f32 to vector<3x8x16xf32>
    %460 = arith.subf %459, %458 : vector<3x8x16xf32>
    %cst_125 = arith.constant 5.000000e-01 : f32
    %461 = vector.broadcast %cst_125 : f32 to vector<3x8x16xf32>
    %462 = arith.mulf %460, %461 : vector<3x8x16xf32>
    %cst_126 = arith.constant 0.000000e+00 : f32
    %cst_127 = arith.constant 1.000000e+00 : f32
    %463 = vector.broadcast %cst_126 : f32 to vector<3x8x16xf32>
    %464 = arith.maximumf %463, %462 : vector<3x8x16xf32>
    %465 = vector.broadcast %cst_127 : f32 to vector<3x8x16xf32>
    %466 = arith.minimumf %465, %464 : vector<3x8x16xf32>
    %cst_128 = arith.constant dense<0.000000e+00> : vector<8x16xf32>
    %467 = vector.multi_reduction <add>, %466, %cst_128 [0] : vector<3x8x16xf32> to vector<8x16xf32>
    %cst_129 = arith.constant 3.000000e+00 : f32
    %468 = vector.broadcast %cst_129 : f32 to vector<8x16xf32>
    %469 = arith.divf %467, %468 : vector<8x16xf32>
    %470 = arith.subf %11, %348 : vector<3x8x16xf32>
    %471 = math.absf %470 : vector<3x8x16xf32>
    %cst_130 = arith.constant dense<0.000000e+00> : vector<8x16xf32>
    %472 = vector.multi_reduction <add>, %471, %cst_130 [0] : vector<3x8x16xf32> to vector<8x16xf32>
    %cst_131 = arith.constant 3.000000e+00 : f32
    %473 = vector.broadcast %cst_131 : f32 to vector<8x16xf32>
    %474 = arith.divf %472, %473 : vector<8x16xf32>
    %cst_132 = arith.constant 8.500000e-01 : f32
    %475 = vector.broadcast %cst_132 : f32 to vector<8x16xf32>
    %476 = arith.mulf %475, %469 : vector<8x16xf32>
    %cst_133 = arith.constant 1.500000e-01 : f32
    %477 = vector.broadcast %cst_133 : f32 to vector<8x16xf32>
    %478 = arith.mulf %477, %474 : vector<8x16xf32>
    %479 = arith.addf %476, %478 : vector<8x16xf32>
    %c0_134 = arith.constant 0 : index
    %c0_135 = arith.constant 0 : index
    %c0_136 = arith.constant 0 : index
    %c0_137 = arith.constant 0 : index
    %480 = vector.load %arg12[%c0_134, %c0_135, %c0_136, %c0_137] : memref<2x1x8x16xf32, #tpu.memory_space<vmem>>, vector<1x1x8x16xf32>
    %481 = vector.shape_cast %480 : vector<1x1x8x16xf32> to vector<8x16xf32>
    %cst_138 = arith.constant 9.99999974E-6 : f32
    %482 = vector.broadcast %cst_138 : f32 to vector<8x16xf32>
    %483 = arith.mulf %482, %481 : vector<8x16xf32>
    %484 = arith.addf %479, %483 : vector<8x16xf32>
    %485 = arith.minimumf %346, %484 : vector<8x16xf32>
    %c0_139 = arith.constant 0 : index
    %c0_140 = arith.constant 0 : index
    %c0_141 = arith.constant 0 : index
    %c0_142 = arith.constant 0 : index
    %486 = vector.load %arg10[%c0_139, %c0_140, %c0_141, %c0_142] : memref<1x3x8x16xf32, #tpu.memory_space<vmem>>, vector<1x3x8x16xf32>
    %487 = vector.shape_cast %486 : vector<1x3x8x16xf32> to vector<3x8x16xf32>
    %c0_143 = arith.constant 0 : index
    %c0_144 = arith.constant 0 : index
    %c0_145 = arith.constant 0 : index
    %c0_146 = arith.constant 0 : index
    %c0_147 = arith.constant 0 : index
    %488 = vector.load %arg11[%c0_143, %c0_144, %c0_145, %c0_146, %c0_147] : memref<1x3x1x2x16xf32, #tpu.memory_space<vmem>>, vector<1x3x1x2x16xf32>
    %489 = vector.shape_cast %488 : vector<1x3x1x2x16xf32> to vector<3x2x16xf32>
    %490 = vector.extract_strided_slice %489 {offsets = [0, 0, 0], sizes = [3, 1, 16], strides = [1, 1, 1]} : vector<3x2x16xf32> to vector<3x1x16xf32>
    %491 = vector.extract_strided_slice %489 {offsets = [0, 1, 0], sizes = [3, 1, 16], strides = [1, 1, 1]} : vector<3x2x16xf32> to vector<3x1x16xf32>
    %c1_i32_148 = arith.constant 1 : i32
    %492 = tpu.dynamic_rotate %487 by %c1_i32_148 dim 1 : vector<3x8x16xf32>, i32 -> vector<3x8x16xf32>
    %c7_i32_149 = arith.constant 7 : i32
    %493 = tpu.dynamic_rotate %487 by %c7_i32_149 dim 1 : vector<3x8x16xf32>, i32 -> vector<3x8x16xf32>
    %494 = vector.shape_cast %3 : vector<1x8x16xi1> to vector<1x8x16xi1>
    %495 = vector.broadcast %494 : vector<1x8x16xi1> to vector<3x8x16xi1>
    %496 = vector.shape_cast %490 : vector<3x1x16xf32> to vector<3x1x16xf32>
    %497 = vector.broadcast %496 : vector<3x1x16xf32> to vector<3x8x16xf32>
    %498 = arith.select %495, %497, %492 : vector<3x8x16xi1>, vector<3x8x16xf32>
    %499 = vector.shape_cast %5 : vector<1x8x16xi1> to vector<1x8x16xi1>
    %500 = vector.broadcast %499 : vector<1x8x16xi1> to vector<3x8x16xi1>
    %501 = vector.shape_cast %491 : vector<3x1x16xf32> to vector<3x1x16xf32>
    %502 = vector.broadcast %501 : vector<3x1x16xf32> to vector<3x8x16xf32>
    %503 = arith.select %500, %502, %493 : vector<3x8x16xi1>, vector<3x8x16xf32>
    %504 = arith.addf %498, %487 : vector<3x8x16xf32>
    %505 = arith.addf %504, %503 : vector<3x8x16xf32>
    %c1_i32_150 = arith.constant 1 : i32
    %506 = tpu.dynamic_rotate %505 by %c1_i32_150 dim 2 : vector<3x8x16xf32>, i32 -> vector<3x8x16xf32>
    %c15_i32_151 = arith.constant 15 : i32
    %507 = tpu.dynamic_rotate %505 by %c15_i32_151 dim 2 : vector<3x8x16xf32>, i32 -> vector<3x8x16xf32>
    %508 = vector.shape_cast %7 : vector<1x8x16xi1> to vector<1x8x16xi1>
    %509 = vector.broadcast %508 : vector<1x8x16xi1> to vector<3x8x16xi1>
    %510 = arith.select %509, %507, %506 : vector<3x8x16xi1>, vector<3x8x16xf32>
    %511 = vector.shape_cast %9 : vector<1x8x16xi1> to vector<1x8x16xi1>
    %512 = vector.broadcast %511 : vector<1x8x16xi1> to vector<3x8x16xi1>
    %513 = arith.select %512, %506, %507 : vector<3x8x16xi1>, vector<3x8x16xf32>
    %514 = arith.addf %510, %505 : vector<3x8x16xf32>
    %515 = arith.addf %514, %513 : vector<3x8x16xf32>
    %cst_152 = arith.constant 0.111111112 : f32
    %516 = vector.broadcast %cst_152 : f32 to vector<3x8x16xf32>
    %517 = arith.mulf %515, %516 : vector<3x8x16xf32>
    %518 = arith.mulf %487, %487 : vector<3x8x16xf32>
    %519 = arith.mulf %490, %490 : vector<3x1x16xf32>
    %520 = arith.mulf %491, %491 : vector<3x1x16xf32>
    %c1_i32_153 = arith.constant 1 : i32
    %521 = tpu.dynamic_rotate %518 by %c1_i32_153 dim 1 : vector<3x8x16xf32>, i32 -> vector<3x8x16xf32>
    %c7_i32_154 = arith.constant 7 : i32
    %522 = tpu.dynamic_rotate %518 by %c7_i32_154 dim 1 : vector<3x8x16xf32>, i32 -> vector<3x8x16xf32>
    %523 = vector.shape_cast %3 : vector<1x8x16xi1> to vector<1x8x16xi1>
    %524 = vector.broadcast %523 : vector<1x8x16xi1> to vector<3x8x16xi1>
    %525 = vector.shape_cast %519 : vector<3x1x16xf32> to vector<3x1x16xf32>
    %526 = vector.broadcast %525 : vector<3x1x16xf32> to vector<3x8x16xf32>
    %527 = arith.select %524, %526, %521 : vector<3x8x16xi1>, vector<3x8x16xf32>
    %528 = vector.shape_cast %5 : vector<1x8x16xi1> to vector<1x8x16xi1>
    %529 = vector.broadcast %528 : vector<1x8x16xi1> to vector<3x8x16xi1>
    %530 = vector.shape_cast %520 : vector<3x1x16xf32> to vector<3x1x16xf32>
    %531 = vector.broadcast %530 : vector<3x1x16xf32> to vector<3x8x16xf32>
    %532 = arith.select %529, %531, %522 : vector<3x8x16xi1>, vector<3x8x16xf32>
    %533 = arith.addf %527, %518 : vector<3x8x16xf32>
    %534 = arith.addf %533, %532 : vector<3x8x16xf32>
    %c1_i32_155 = arith.constant 1 : i32
    %535 = tpu.dynamic_rotate %534 by %c1_i32_155 dim 2 : vector<3x8x16xf32>, i32 -> vector<3x8x16xf32>
    %c15_i32_156 = arith.constant 15 : i32
    %536 = tpu.dynamic_rotate %534 by %c15_i32_156 dim 2 : vector<3x8x16xf32>, i32 -> vector<3x8x16xf32>
    %537 = vector.shape_cast %7 : vector<1x8x16xi1> to vector<1x8x16xi1>
    %538 = vector.broadcast %537 : vector<1x8x16xi1> to vector<3x8x16xi1>
    %539 = arith.select %538, %536, %535 : vector<3x8x16xi1>, vector<3x8x16xf32>
    %540 = vector.shape_cast %9 : vector<1x8x16xi1> to vector<1x8x16xi1>
    %541 = vector.broadcast %540 : vector<1x8x16xi1> to vector<3x8x16xi1>
    %542 = arith.select %541, %535, %536 : vector<3x8x16xi1>, vector<3x8x16xf32>
    %543 = arith.addf %539, %534 : vector<3x8x16xf32>
    %544 = arith.addf %543, %542 : vector<3x8x16xf32>
    %cst_157 = arith.constant 0.111111112 : f32
    %545 = vector.broadcast %cst_157 : f32 to vector<3x8x16xf32>
    %546 = arith.mulf %544, %545 : vector<3x8x16xf32>
    %547 = arith.mulf %517, %517 : vector<3x8x16xf32>
    %548 = arith.subf %546, %547 : vector<3x8x16xf32>
    %549 = arith.mulf %487, %11 : vector<3x8x16xf32>
    %550 = arith.mulf %490, %14 : vector<3x1x16xf32>
    %551 = arith.mulf %491, %15 : vector<3x1x16xf32>
    %c1_i32_158 = arith.constant 1 : i32
    %552 = tpu.dynamic_rotate %549 by %c1_i32_158 dim 1 : vector<3x8x16xf32>, i32 -> vector<3x8x16xf32>
    %c7_i32_159 = arith.constant 7 : i32
    %553 = tpu.dynamic_rotate %549 by %c7_i32_159 dim 1 : vector<3x8x16xf32>, i32 -> vector<3x8x16xf32>
    %554 = vector.shape_cast %3 : vector<1x8x16xi1> to vector<1x8x16xi1>
    %555 = vector.broadcast %554 : vector<1x8x16xi1> to vector<3x8x16xi1>
    %556 = vector.shape_cast %550 : vector<3x1x16xf32> to vector<3x1x16xf32>
    %557 = vector.broadcast %556 : vector<3x1x16xf32> to vector<3x8x16xf32>
    %558 = arith.select %555, %557, %552 : vector<3x8x16xi1>, vector<3x8x16xf32>
    %559 = vector.shape_cast %5 : vector<1x8x16xi1> to vector<1x8x16xi1>
    %560 = vector.broadcast %559 : vector<1x8x16xi1> to vector<3x8x16xi1>
    %561 = vector.shape_cast %551 : vector<3x1x16xf32> to vector<3x1x16xf32>
    %562 = vector.broadcast %561 : vector<3x1x16xf32> to vector<3x8x16xf32>
    %563 = arith.select %560, %562, %553 : vector<3x8x16xi1>, vector<3x8x16xf32>
    %564 = arith.addf %558, %549 : vector<3x8x16xf32>
    %565 = arith.addf %564, %563 : vector<3x8x16xf32>
    %c1_i32_160 = arith.constant 1 : i32
    %566 = tpu.dynamic_rotate %565 by %c1_i32_160 dim 2 : vector<3x8x16xf32>, i32 -> vector<3x8x16xf32>
    %c15_i32_161 = arith.constant 15 : i32
    %567 = tpu.dynamic_rotate %565 by %c15_i32_161 dim 2 : vector<3x8x16xf32>, i32 -> vector<3x8x16xf32>
    %568 = vector.shape_cast %7 : vector<1x8x16xi1> to vector<1x8x16xi1>
    %569 = vector.broadcast %568 : vector<1x8x16xi1> to vector<3x8x16xi1>
    %570 = arith.select %569, %567, %566 : vector<3x8x16xi1>, vector<3x8x16xf32>
    %571 = vector.shape_cast %9 : vector<1x8x16xi1> to vector<1x8x16xi1>
    %572 = vector.broadcast %571 : vector<1x8x16xi1> to vector<3x8x16xi1>
    %573 = arith.select %572, %566, %567 : vector<3x8x16xi1>, vector<3x8x16xf32>
    %574 = arith.addf %570, %565 : vector<3x8x16xf32>
    %575 = arith.addf %574, %573 : vector<3x8x16xf32>
    %cst_162 = arith.constant 0.111111112 : f32
    %576 = vector.broadcast %cst_162 : f32 to vector<3x8x16xf32>
    %577 = arith.mulf %575, %576 : vector<3x8x16xf32>
    %578 = arith.mulf %517, %41 : vector<3x8x16xf32>
    %579 = arith.subf %577, %578 : vector<3x8x16xf32>
    %580 = arith.mulf %79, %517 : vector<3x8x16xf32>
    %cst_163 = arith.constant 9.99999974E-5 : f32
    %581 = vector.broadcast %cst_163 : f32 to vector<3x8x16xf32>
    %582 = arith.addf %580, %581 : vector<3x8x16xf32>
    %cst_164 = arith.constant 2.000000e+00 : f32
    %583 = vector.broadcast %cst_164 : f32 to vector<3x8x16xf32>
    %584 = arith.mulf %583, %579 : vector<3x8x16xf32>
    %cst_165 = arith.constant 8.99999984E-4 : f32
    %585 = vector.broadcast %cst_165 : f32 to vector<3x8x16xf32>
    %586 = arith.addf %584, %585 : vector<3x8x16xf32>
    %587 = arith.mulf %582, %586 : vector<3x8x16xf32>
    %588 = arith.mulf %517, %517 : vector<3x8x16xf32>
    %589 = arith.addf %588, %75 : vector<3x8x16xf32>
    %590 = arith.addf %548, %77 : vector<3x8x16xf32>
    %591 = arith.mulf %589, %590 : vector<3x8x16xf32>
    %592 = tpu.reciprocal %591 {approx = true} : vector<3x8x16xf32> -> vector<3x8x16xf32>
    %593 = arith.mulf %591, %592 : vector<3x8x16xf32>
    %cst_166 = arith.constant 2.000000e+00 : f32
    %594 = vector.broadcast %cst_166 : f32 to vector<3x8x16xf32>
    %595 = arith.subf %594, %593 : vector<3x8x16xf32>
    %596 = arith.mulf %592, %595 : vector<3x8x16xf32>
    %597 = arith.mulf %587, %596 : vector<3x8x16xf32>
    %cst_167 = arith.constant 1.000000e+00 : f32
    %598 = vector.broadcast %cst_167 : f32 to vector<3x8x16xf32>
    %599 = arith.subf %598, %597 : vector<3x8x16xf32>
    %cst_168 = arith.constant 5.000000e-01 : f32
    %600 = vector.broadcast %cst_168 : f32 to vector<3x8x16xf32>
    %601 = arith.mulf %599, %600 : vector<3x8x16xf32>
    %cst_169 = arith.constant 0.000000e+00 : f32
    %cst_170 = arith.constant 1.000000e+00 : f32
    %602 = vector.broadcast %cst_169 : f32 to vector<3x8x16xf32>
    %603 = arith.maximumf %602, %601 : vector<3x8x16xf32>
    %604 = vector.broadcast %cst_170 : f32 to vector<3x8x16xf32>
    %605 = arith.minimumf %604, %603 : vector<3x8x16xf32>
    %cst_171 = arith.constant dense<0.000000e+00> : vector<8x16xf32>
    %606 = vector.multi_reduction <add>, %605, %cst_171 [0] : vector<3x8x16xf32> to vector<8x16xf32>
    %cst_172 = arith.constant 3.000000e+00 : f32
    %607 = vector.broadcast %cst_172 : f32 to vector<8x16xf32>
    %608 = arith.divf %606, %607 : vector<8x16xf32>
    %609 = arith.subf %11, %487 : vector<3x8x16xf32>
    %610 = math.absf %609 : vector<3x8x16xf32>
    %cst_173 = arith.constant dense<0.000000e+00> : vector<8x16xf32>
    %611 = vector.multi_reduction <add>, %610, %cst_173 [0] : vector<3x8x16xf32> to vector<8x16xf32>
    %cst_174 = arith.constant 3.000000e+00 : f32
    %612 = vector.broadcast %cst_174 : f32 to vector<8x16xf32>
    %613 = arith.divf %611, %612 : vector<8x16xf32>
    %cst_175 = arith.constant 8.500000e-01 : f32
    %614 = vector.broadcast %cst_175 : f32 to vector<8x16xf32>
    %615 = arith.mulf %614, %608 : vector<8x16xf32>
    %cst_176 = arith.constant 1.500000e-01 : f32
    %616 = vector.broadcast %cst_176 : f32 to vector<8x16xf32>
    %617 = arith.mulf %616, %613 : vector<8x16xf32>
    %618 = arith.addf %615, %617 : vector<8x16xf32>
    %c1 = arith.constant 1 : index
    %c0_177 = arith.constant 0 : index
    %c0_178 = arith.constant 0 : index
    %c0_179 = arith.constant 0 : index
    %619 = vector.load %arg12[%c1, %c0_177, %c0_178, %c0_179] : memref<2x1x8x16xf32, #tpu.memory_space<vmem>>, vector<1x1x8x16xf32>
    %620 = vector.shape_cast %619 : vector<1x1x8x16xf32> to vector<8x16xf32>
    %cst_180 = arith.constant 9.99999974E-6 : f32
    %621 = vector.broadcast %cst_180 : f32 to vector<8x16xf32>
    %622 = arith.mulf %621, %620 : vector<8x16xf32>
    %623 = arith.addf %618, %622 : vector<8x16xf32>
    %624 = arith.minimumf %485, %623 : vector<8x16xf32>
    %625 = vector.shape_cast %624 : vector<8x16xf32> to vector<1x8x16xf32>
    %cst_181 = arith.constant dense<0.000000e+00> : vector<1xf32>
    %626 = vector.multi_reduction <add>, %625, %cst_181 [1, 2] : vector<1x8x16xf32> to vector<1xf32>
    %627 = vector.shape_cast %626 : vector<1xf32> to vector<1x1x1xf32>
    %628 = vector.extract %627[0, 0, 0] : f32 from vector<1x1x1xf32>
    %629 = vector.broadcast %628 : f32 to vector<1x1xf32>
    %c0_182 = arith.constant 0 : index
    %c0_183 = arith.constant 0 : index
    %c0_184 = arith.constant 0 : index
    %c0_185 = arith.constant 0 : index
    %630 = vector.load %arg13[%c0_182, %c0_183, %c0_184, %c0_185] : memref<1x1x1x1xf32, #tpu.memory_space<vmem>>, vector<1x1x1x1xf32>
    %631 = vector.shape_cast %630 : vector<1x1x1x1xf32> to vector<1x1xf32>
    %632 = vector.shape_cast %629 : vector<1x1xf32> to vector<1x1x1x1xf32>
    tpu.vector_store %arg13[%c0_182, %c0_183, %c0_184, %c0_185], %632 {strides = array<i32>} : memref<1x1x1x1xf32, #tpu.memory_space<vmem>>, vector<1x1x1x1xf32>,
    return
  }
  func.func @transform_0(%arg0: i32, %arg1: i32) -> (i32, i32, i32, i32) {
    %c0_i32 = arith.constant 0 : i32
    %c0_i32_0 = arith.constant 0 : i32
    %c0_i32_1 = arith.constant 0 : i32
    return %arg0, %c0_i32, %arg1, %c0_i32_0 : i32, i32, i32, i32
  }
  func.func @transform_1(%arg0: i32, %arg1: i32) -> (i32, i32, i32, i32, i32) {
    %c0_i32 = arith.constant 0 : i32
    %c0_i32_0 = arith.constant 0 : i32
    %c0_i32_1 = arith.constant 0 : i32
    %c0_i32_2 = arith.constant 0 : i32
    return %arg0, %c0_i32, %arg1, %c0_i32_0, %c0_i32_1 : i32, i32, i32, i32, i32
  }
  func.func @transform_2(%arg0: i32, %arg1: i32) -> (i32, i32, i32, i32) {
    %c0_i32 = arith.constant 0 : i32
    %c0_i32_0 = arith.constant 0 : i32
    %c0_i32_1 = arith.constant 0 : i32
    return %arg0, %c0_i32, %arg1, %c0_i32_0 : i32, i32, i32, i32
  }
  func.func @transform_3(%arg0: i32, %arg1: i32) -> (i32, i32, i32, i32, i32) {
    %c0_i32 = arith.constant 0 : i32
    %c0_i32_0 = arith.constant 0 : i32
    %c0_i32_1 = arith.constant 0 : i32
    %c0_i32_2 = arith.constant 0 : i32
    return %arg0, %c0_i32, %arg1, %c0_i32_0, %c0_i32_1 : i32, i32, i32, i32, i32
  }
  func.func @transform_4(%arg0: i32, %arg1: i32) -> (i32, i32, i32, i32) {
    %c0_i32 = arith.constant 0 : i32
    %c0_i32_0 = arith.constant 0 : i32
    %c0_i32_1 = arith.constant 0 : i32
    return %arg0, %c0_i32, %arg1, %c0_i32_0 : i32, i32, i32, i32
  }
  func.func @transform_5(%arg0: i32, %arg1: i32) -> (i32, i32, i32, i32, i32) {
    %c0_i32 = arith.constant 0 : i32
    %c0_i32_0 = arith.constant 0 : i32
    %c0_i32_1 = arith.constant 0 : i32
    %c0_i32_2 = arith.constant 0 : i32
    return %arg0, %c0_i32, %arg1, %c0_i32_0, %c0_i32_1 : i32, i32, i32, i32, i32
  }
  func.func @transform_6(%arg0: i32, %arg1: i32) -> (i32, i32, i32, i32) {
    %c0_i32 = arith.constant 0 : i32
    %c0_i32_0 = arith.constant 0 : i32
    %c0_i32_1 = arith.constant 0 : i32
    return %arg0, %c0_i32, %arg1, %c0_i32_0 : i32, i32, i32, i32
  }
  func.func @transform_7(%arg0: i32, %arg1: i32) -> (i32, i32, i32, i32, i32) {
    %c0_i32 = arith.constant 0 : i32
    %c0_i32_0 = arith.constant 0 : i32
    %c0_i32_1 = arith.constant 0 : i32
    %c0_i32_2 = arith.constant 0 : i32
    return %arg0, %c0_i32, %arg1, %c0_i32_0, %c0_i32_1 : i32, i32, i32, i32, i32
  }
  func.func @transform_8(%arg0: i32, %arg1: i32) -> (i32, i32, i32, i32) {
    %c0_i32 = arith.constant 0 : i32
    %c0_i32_0 = arith.constant 0 : i32
    %c0_i32_1 = arith.constant 0 : i32
    return %arg0, %c0_i32, %arg1, %c0_i32_0 : i32, i32, i32, i32
  }
  func.func @transform_9(%arg0: i32, %arg1: i32) -> (i32, i32, i32, i32, i32) {
    %c0_i32 = arith.constant 0 : i32
    %c0_i32_0 = arith.constant 0 : i32
    %c0_i32_1 = arith.constant 0 : i32
    %c0_i32_2 = arith.constant 0 : i32
    return %arg0, %c0_i32, %arg1, %c0_i32_0, %c0_i32_1 : i32, i32, i32, i32, i32
  }
  func.func @transform_10(%arg0: i32, %arg1: i32) -> (i32, i32, i32, i32) {
    %c0_i32 = arith.constant 0 : i32
    %c0_i32_0 = arith.constant 0 : i32
    %c0_i32_1 = arith.constant 0 : i32
    return %c0_i32, %arg0, %arg1, %c0_i32_0 : i32, i32, i32, i32
  }
  func.func @transform_11(%arg0: i32, %arg1: i32) -> (i32, i32, i32, i32) {
    %c0_i32 = arith.constant 0 : i32
    %c0_i32_0 = arith.constant 0 : i32
    %c0_i32_1 = arith.constant 0 : i32
    return %arg0, %arg1, %c0_i32, %c0_i32_0 : i32, i32, i32, i32
  }
}

module attributes {stable_mosaic.version = 11 : i64} {
  func.func @_ssi_kernel(%arg0: i32, %arg1: i32, %arg2: memref<2x8xf32, #tpu.memory_space<smem>>, %arg3: memref<1x16x16xf32, #tpu.memory_space<vmem>>, %arg4: memref<1x16x16xf32, #tpu.memory_space<vmem>>, %arg5: memref<1x1x1x1xf32, #tpu.memory_space<vmem>>) attributes {dimension_semantics = [#tpu.dimension_semantics<parallel>, #tpu.dimension_semantics<parallel>], iteration_bounds = array<i64: 2, 1>, scalar_prefetch = 0 : i64, scratch_operands = 0 : i64, tpu.core_type = #tpu.core_type<tc>, window_params = [{transform_indices = @transform_0, window_bounds = array<i64: 2, 8>}, {transform_indices = @transform_1, window_bounds = array<i64: 1, 16, 16>}, {transform_indices = @transform_2, window_bounds = array<i64: 1, 16, 16>}, {transform_indices = @transform_3, window_bounds = array<i64: 1, 1, 1, 1>}]} {
    %c0 = arith.constant 0 : index
    %c0_0 = arith.constant 0 : index
    %c0_1 = arith.constant 0 : index
    %0 = vector.load %arg3[%c0, %c0_0, %c0_1] : memref<1x16x16xf32, #tpu.memory_space<vmem>>, vector<1x16x16xf32>
    %1 = vector.shape_cast %0 : vector<1x16x16xf32> to vector<16x16xf32>
    %c0_2 = arith.constant 0 : index
    %c0_3 = arith.constant 0 : index
    %c0_4 = arith.constant 0 : index
    %2 = vector.load %arg4[%c0_2, %c0_3, %c0_4] : memref<1x16x16xf32, #tpu.memory_space<vmem>>, vector<1x16x16xf32>
    %3 = vector.shape_cast %2 : vector<1x16x16xf32> to vector<16x16xf32>
    %4 = arith.index_cast %arg0 : i32 to index
    %c0_5 = arith.constant 0 : index
    %5 = memref.load %arg2[%4, %c0_5] : memref<2x8xf32, #tpu.memory_space<smem>>
    %6 = vector.broadcast %5 : f32 to vector<16x16xf32>
    %7 = arith.subf %1, %6 : vector<16x16xf32>
    %8 = arith.index_cast %arg0 : i32 to index
    %c1 = arith.constant 1 : index
    %9 = memref.load %arg2[%8, %c1] : memref<2x8xf32, #tpu.memory_space<smem>>
    %10 = vector.broadcast %9 : f32 to vector<16x16xf32>
    %11 = arith.mulf %7, %10 : vector<16x16xf32>
    %12 = arith.index_cast %arg0 : i32 to index
    %c2 = arith.constant 2 : index
    %13 = memref.load %arg2[%12, %c2] : memref<2x8xf32, #tpu.memory_space<smem>>
    %14 = vector.broadcast %13 : f32 to vector<16x16xf32>
    %15 = arith.subf %11, %14 : vector<16x16xf32>
    %16 = arith.index_cast %arg0 : i32 to index
    %c3 = arith.constant 3 : index
    %17 = memref.load %arg2[%16, %c3] : memref<2x8xf32, #tpu.memory_space<smem>>
    %18 = vector.broadcast %17 : f32 to vector<16x16xf32>
    %19 = arith.mulf %15, %18 : vector<16x16xf32>
    %20 = arith.index_cast %arg0 : i32 to index
    %c4 = arith.constant 4 : index
    %21 = memref.load %arg2[%20, %c4] : memref<2x8xf32, #tpu.memory_space<smem>>
    %22 = vector.broadcast %21 : f32 to vector<16x16xf32>
    %23 = arith.subf %3, %22 : vector<16x16xf32>
    %24 = arith.index_cast %arg0 : i32 to index
    %c5 = arith.constant 5 : index
    %25 = memref.load %arg2[%24, %c5] : memref<2x8xf32, #tpu.memory_space<smem>>
    %26 = vector.broadcast %25 : f32 to vector<16x16xf32>
    %27 = arith.mulf %23, %26 : vector<16x16xf32>
    %28 = arith.index_cast %arg0 : i32 to index
    %c6 = arith.constant 6 : index
    %29 = memref.load %arg2[%28, %c6] : memref<2x8xf32, #tpu.memory_space<smem>>
    %30 = vector.broadcast %29 : f32 to vector<16x16xf32>
    %31 = arith.subf %27, %30 : vector<16x16xf32>
    %32 = arith.index_cast %arg0 : i32 to index
    %c7 = arith.constant 7 : index
    %33 = memref.load %arg2[%32, %c7] : memref<2x8xf32, #tpu.memory_space<smem>>
    %34 = vector.broadcast %33 : f32 to vector<16x16xf32>
    %35 = arith.mulf %31, %34 : vector<16x16xf32>
    %36 = arith.subf %19, %35 : vector<16x16xf32>
    %37 = math.absf %36 : vector<16x16xf32>
    %38 = vector.shape_cast %37 : vector<16x16xf32> to vector<1x16x16xf32>
    %cst = arith.constant dense<0.000000e+00> : vector<1xf32>
    %39 = vector.multi_reduction <add>, %38, %cst [1, 2] : vector<1x16x16xf32> to vector<1xf32>
    %40 = vector.shape_cast %39 : vector<1xf32> to vector<1x1x1xf32>
    %41 = vector.extract %40[0, 0, 0] : f32 from vector<1x1x1xf32>
    %42 = vector.broadcast %41 : f32 to vector<1x1xf32>
    %c0_6 = arith.constant 0 : index
    %c0_7 = arith.constant 0 : index
    %c0_8 = arith.constant 0 : index
    %c0_9 = arith.constant 0 : index
    %43 = vector.load %arg5[%c0_6, %c0_7, %c0_8, %c0_9] : memref<1x1x1x1xf32, #tpu.memory_space<vmem>>, vector<1x1x1x1xf32>
    %44 = vector.shape_cast %43 : vector<1x1x1x1xf32> to vector<1x1xf32>
    %45 = vector.shape_cast %42 : vector<1x1xf32> to vector<1x1x1x1xf32>
    tpu.vector_store %arg5[%c0_6, %c0_7, %c0_8, %c0_9], %45 {strides = array<i32>} : memref<1x1x1x1xf32, #tpu.memory_space<vmem>>, vector<1x1x1x1xf32>,
    return
  }
  func.func @transform_0(%arg0: i32, %arg1: i32) -> (i32, i32) {
    %c0_i32 = arith.constant 0 : i32
    %c0_i32_0 = arith.constant 0 : i32
    %c0_i32_1 = arith.constant 0 : i32
    return %c0_i32, %c0_i32_0 : i32, i32
  }
  func.func @transform_1(%arg0: i32, %arg1: i32) -> (i32, i32, i32) {
    %c0_i32 = arith.constant 0 : i32
    %c0_i32_0 = arith.constant 0 : i32
    return %arg0, %arg1, %c0_i32 : i32, i32, i32
  }
  func.func @transform_2(%arg0: i32, %arg1: i32) -> (i32, i32, i32) {
    %c0_i32 = arith.constant 0 : i32
    %c0_i32_0 = arith.constant 0 : i32
    return %arg0, %arg1, %c0_i32 : i32, i32, i32
  }
  func.func @transform_3(%arg0: i32, %arg1: i32) -> (i32, i32, i32, i32) {
    %c0_i32 = arith.constant 0 : i32
    %c0_i32_0 = arith.constant 0 : i32
    %c0_i32_1 = arith.constant 0 : i32
    return %arg0, %arg1, %c0_i32, %c0_i32_0 : i32, i32, i32, i32
  }
}

</mosaic_0001>

<bundles_post_ra>
// kernel: custom-call.1
= control target key start
LH: loop header
LB: loop body
LE: loop exit
PB: predicated region body
PF: predicated region fallthrough
CT: control target
= control target key end

     0   :  { %s6_s0 = inlined_call_operand.vmem [shape: u32[2], index: 0, kind: output, shape index: {}]  }

// kernel: combined_loss.2
= control target key start
LH: loop header
LB: loop body
LE: loop exit
PB: predicated region body
PF: predicated region fallthrough
CT: control target
= control target key end

     0   :  { %8 = vsyncpa [#allocation3], 0  ;;  %s536_s12 = smov 0   ;;  %s538_s13 = smov 0   ;;  %s603_s0 = inlined_call_operand.vmem [shape: f32[2,8], index: 0, kind: input, shape index: {}]   ;;  %s604_s1 = inlined_call_operand.vmem [shape: f32[2,16,16], index: 1, kind: input, shape index: {}]   ;;  %s605_s2 = inlined_call_operand.vmem [shape: f32[2,16,16], index: 2, kind: input, shape index: {}]   ;;  %s606_s3 = inlined_call_operand.vmem [shape: f32[2,1,1,1], index: 3, kind: output, shape index: {}]  }
   0x1   :  { %s540_s14 = smov 0  }
   0x2 LB: > { %s419_s15 = sadd.s32 4294967295, %s513_s14   ;;  %s26_s16 = sadd.s32 1, %s509_s13  ;;  %s513_s14 = sphi %s540_s14, %s14_s14   ;;  %s509_s13 = sphi %s538_s13, %s610_s13   ;;  %s505_s12 = sphi %s536_s12, %s609_s12  }
   0x3   : > { %p28_p0 = scmp.ge.s32.totalorder %s26_s16, 2  ;;  %p421_p1 = scmp.ge.s32.totalorder %s513_s14, 1 }
   0x4   : > { %p136_p2 = scmp.lt.s32.totalorder %s513_s14, 3  ;;  %p561_p4 = scmp.eq.s32.totalorder %s419_s15, 0 }
   0x5   : > { %s612_s16 = smov (%p28_p0, %s26_s16), 0  ;;  %s149_s21 = sshll.u32 %s603_s0, 4  ;;  %s150_s21 = int_to_ptr.vmem [resolvable:$true] %s149_s21 }
   0x6   : > { %p557_p3 = pnand %p421_p1, %p136_p2  ;;  %s472_s22 = scalar_lea.vmem %s150_s21, 32 }
   0x7   : > { %p473_p7 = scmp.ne.s32.totalorder %s150_s21, %s472_s22  ;;  %p480_p11 = scmp.lt.s32.totalorder %s150_s21, %s150_s21 }
   0x8   : > { %p441_p5 = pneg %p557_p3  ;;  %p481_p12 = scmp.lt.s32.totalorder %s472_s22, %s472_s22 }
   0xa   : > { %p442_p6 = pnand %p561_p4, %p441_p5  ;;  %p482_p13 = por %p481_p12, %p480_p11 }
   0xc   : > { %p474_p8 = pneg %p442_p6 }
   0xe   : > { %p475_p9 = pnand %p474_p8, %p473_p7 }
  0x10   : > { %p476_p10 = pneg %p475_p9 }
  0x12   : > { %p483_p0 = pnand %p482_p13, %p476_p10 }
  0x14   : > { %486 = shalt.err (!%p483_p0)
}
  0x15   : > { %s515_s23 = smov [#allocation2]   ;;  %188 = sbr.rel (%p557_p3) target bundleno = 260 (0x104), region = 32 }
  0x16   : > { %444 = dma.vmem_to_smem (!%p442_p6), %s150_s21, 32, %s515_s23, [#allocation3]  }
  0x1a   : > { %500 = dma.done.wait (%p561_p4), [#allocation3], 32  }
  0x1b   : > { %502 = vsyncadd (%p561_p4), [#allocation3], 4294967264 }
  0x1c   : > { %194 = sfence }
  0x1d   : > { %p228_p1 = scmp.lt.s32.totalorder %s505_s12, 1  ;;  %s430_s24 = sshll.u32 %s505_s12, 7  ;;  %vm301_vm0 = vcmask 130048   ;;  %vm315_vm1 = vcmask 0  }
  0x1e   : > { %s258_s25 = sld [smem:[#allocation2 + %s430_s24]]  ;;  %s262_s26 = sadd.s32 1, %s430_s24 }
  0x1f   : > { %s614_s12 = smov (!%p228_p1, %s505_s12), 1  ;;  %s263_s27 = sld [smem:[#allocation2 + %s262_s26]] }
  0x20   : > { %s267_s28 = sadd.s32 2, %s430_s24  ;;  %s433_s29 = sshll.u32 %s614_s12, 4 }
  0x21   : > { %s268_s30 = sld [smem:[#allocation2 + %s267_s28]]  ;;  %s235_s6 = scalar_lea.vmem %s604_s1, %s433_s29 }
  0x22   : > { %s245_s9 = scalar_lea.vmem %s605_s2, %s433_s29  ;;  %v253_v0 = vld [vmem:[%s235_s6] sm:$0xff]  ;;  %v254_v1 = vld [vmem:[%s235_s6 + $0x8] sm:$0xff]  ;;  %s272_s10 = sadd.s32 3, %s430_s24 }
  0x23   : > { %s277_s11 = sadd.s32 4, %s430_s24  ;;  %s273_s15 = sld [smem:[#allocation2 + %s272_s10]]  ;;  %v255_v9 = vld [vmem:[%s245_s9] sm:$0xff]  ;;  %v256_v10 = vld [vmem:[%s245_s9 + $0x8] sm:$0xff] }
  0x24   : > { %v259_v2 = vstv %s258_s25  ;;  %s282_s17 = sadd.s32 5, %s430_s24  ;;  %s278_s18 = sld [smem:[#allocation2 + %s277_s11]] }
  0x25   : > { %v260_v3 = vsub.f32 %v253_v0, %v259_v2  ;;  %v261_v4 = vsub.f32 %v254_v1, %v259_v2  ;;  %s287_s19 = sadd.s32 6, %s430_s24  ;;  %v264_v5 = vstv %s263_s27  ;;  %s283_s20 = sld [smem:[#allocation2 + %s282_s17]] }
  0x26   : > { %s292_s21 = sadd.s32 7, %s430_s24  ;;  %s288_s22 = sld [smem:[#allocation2 + %s287_s19]] }
  0x27   : > { %v265_v6 = vmul.f32 %v264_v5, %v260_v3  ;;  %v266_v7 = vmul.f32 %v264_v5, %v261_v4  ;;  %v269_v8 = vstv %s268_s30  ;;  %s293_s23 = sld [smem:[#allocation2 + %s292_s21]]  ;;  %s252_s26 = scalar_lea.vmem %s606_s3, %s614_s12 }
  0x29   : > { %v270_v11 = vsub.f32 %v265_v6, %v269_v8  ;;  %v271_v13 = vsub.f32 %v266_v7, %v269_v8  ;;  %v274_v17 = vstv %s273_s15 }
  0x2a   : > { %v279_v12 = vstv %s278_s18 }
  0x2b   : > { %v280_v14 = vsub.f32 %v255_v9, %v279_v12  ;;  %v281_v15 = vsub.f32 %v256_v10, %v279_v12  ;;  %v284_v16 = vstv %s283_s20  ;;  %v275_v22 = vmul.f32 %v274_v17, %v270_v11 }
  0x2c   : > { %v289_v18 = vstv %s288_s22  ;;  %v276_v23 = vmul.f32 %v274_v17, %v271_v13 }
  0x2d   : > { %v285_v19 = vmul.f32 %v284_v16, %v280_v14  ;;  %v286_v20 = vmul.f32 %v284_v16, %v281_v15  ;;  %v294_v21 = vstv %s293_s23 }
  0x2f   : > { %v290_v24 = vsub.f32 %v285_v19, %v289_v18  ;;  %v291_v25 = vsub.f32 %v286_v20, %v289_v18 }
  0x31   : > { %v295_v26 = vmul.f32 %v294_v21, %v290_v24  ;;  %v296_v27 = vmul.f32 %v294_v21, %v291_v25 }
  0x33   : > { %v297_v28 = vsub.f32 %v275_v22, %v295_v26  ;;  %v298_v29 = vsub.f32 %v276_v23, %v296_v27 }
  0x35   : > { %v299_v30 = vand.u32 2147483647, %v297_v28  ;;  %v300_v31 = vand.u32 2147483647, %v298_v29 }
  0x37   : > { %v302_v32 = vsel %vm301_vm0, %v299_v30, 0.0  ;;  %v303_v33 = vsel %vm301_vm0, %v300_v31, 0.0 }
  0x38   : > { %v304_v34 = vadd.f32 %v303_v33, %v302_v32 }
  0x3a   : > { %305 = vadd.xlane.f32.xlu0 %v304_v34 }
  0xc3   : > { %v306_v35 = vpop.xlane.xlu0 %305 }
  0xc4   : > { %v307_v36 = vrot.slane %v306_v35, 4 }
  0xc6   : > { %v308_v37 = vadd.f32 %v307_v36, %v306_v35 }
  0xc8   : > { %v309_v38 = vrot.slane %v308_v37, 2 }
  0xca   : > { %v310_v39 = vadd.f32 %v309_v38, %v308_v37 }
  0xcc   : > { %v311_v40 = vrot.slane %v310_v39, 1 }
  0xce   : > { %v312_v41 = vadd.f32 %v311_v40, %v310_v39 }
  0xd0   : > { %435 = vpush %v312_v41 }
 0x101   : > { %s436_s27 = spop %435 }
 0x102   : > { %v314_v42 = vstv %s436_s27 }
 0x103   : > { %316 = vst.msk [vmem:[%s252_s26] sm:$0x1] %vm315_vm1, %v314_v42 }
 0x104 PF: > { %s14_s14 = sadd.s32 1, %s513_s14   ;;  %s609_s12 = smov %s509_s13 }
 0x105   : > { %p11_p2 = scmp.ge.s32.totalorder %s14_s14, 4   ;;  %s610_s13 = smov %s612_s16 }
 0x107   :  { %13 = sbr.rel (!%p11_p2) target bundleno = 2 (0x2), region = 70 }
 0x10c   :  { %340 = vsyncpa [#allocation3], 1 }
 0x10d   :  { %342 = vsyncpa [#allocation3 + $0x1], 1 }

// kernel: combined_loss.3
= control target key start
LH: loop header
LB: loop body
LE: loop exit
PB: predicated region body
PF: predicated region fallthrough
CT: control target
= control target key end

     0   :  { %s3485_s17 = smov 0   ;;  %s3487_s18 = smov 0   ;;  %s5400_s0 = inlined_call_operand.vmem [shape: f32[2,3,16,16], index: 0, kind: input, shape index: {}]   ;;  %s5401_s1 = inlined_call_operand.vmem [shape: f32[2,3,2,2,16], index: 1, kind: input, shape index: {}]   ;;  %s5402_s2 = inlined_call_operand.vmem [shape: f32[2,3,16,16], index: 2, kind: input, shape index: {}]   ;;  %s5403_s3 = inlined_call_operand.vmem [shape: f32[2,3,2,2,16], index: 3, kind: input, shape index: {}]   ;;  %s5404_s4 = inlined_call_operand.vmem [shape: f32[2,3,16,16], index: 4, kind: input, shape index: {}]   ;;  %s5405_s5 = inlined_call_operand.vmem [shape: f32[2,3,2,2,16], index: 5, kind: input, shape index: {}]   ;;  %s5406_s6 = inlined_call_operand.vmem [shape: f32[2,3,16,16], index: 6, kind: input, shape index: {}]   ;;  %s5407_s7 = inlined_call_operand.vmem [shape: f32[2,3,2,2,16], index: 7, kind: input, shape index: {}]   ;;  %s5408_s8 = inlined_call_operand.vmem [shape: f32[2,3,16,16], index: 8, kind: input, shape index: {}]   ;;  %s5409_s9 = inlined_call_operand.vmem [shape: f32[2,3,2,2,16], index: 9, kind: input, shape index: {}]   ;;  %s5410_s10 = inlined_call_operand.vmem [shape: f32[2,2,16,16], index: 10, kind: input, shape index: {}]   ;;  %s5411_s11 = inlined_call_operand.vmem [shape: f32[2,2,1,1], index: 11, kind: output, shape index: {}]  }
   0x1   :  { %s3489_s19 = smov 0   ;;  %s3491_s20 = smov 0  }
   0x2   :  { %s3493_s21 = smov 0   ;;  %s3495_s22 = smov 0  }
   0x3   :  { %s3497_s23 = smov 0  }
   0x4 LB: > { %s30_s24 = sadd.s32 1, %s3412_s21  ;;  %s33_s25 = sadd.s32 1, %s3416_s22  ;;  %s3420_s23 = sphi %s3497_s23, %s21_s23   ;;  %s3416_s22 = sphi %s3495_s22, %s5572_s22   ;;  %s3412_s21 = sphi %s3493_s21, %s5571_s21   ;;  %s3408_s20 = sphi %s3491_s20, %s5570_s20   ;;  %s3404_s19 = sphi %s3489_s19, %s5569_s19   ;;  %s3400_s18 = sphi %s3487_s18, %s5568_s18   ;;  %s3396_s17 = sphi %s3485_s17, %s5567_s17  }
   0x5   : > { %p31_p0 = scmp.ge.s32.totalorder %s30_s24, 2  ;;  %p49_p1 = scmp.ne.s32.totalorder %s3400_s18, %s3396_s17 }
   0x6   : > { %p50_p2 = scmp.eq.s32.totalorder %s3420_s23, 0  ;;  %s42_s30 = sadd.s32 1, %s3400_s18 }
   0x7   : > { %s5574_s24 = smov (%p31_p0, %s30_s24), 0  ;;  %s5576_s25 = smov (!%p31_p0, %s33_s25), %s3416_s22 }
   0x8   : > { %5467 = sst [smem:[#allocation13_spill]] %s5574_s24  ;;  %p3528_p3 = por %p50_p2, %p49_p1 }
   0x9   : > { %p35_p4 = scmp.ge.s32.totalorder %s5576_s25, 2  ;;  %s38_s27 = ssub.s32 %s3412_s21, %s5574_s24 }
   0xa   : > { %p3224_p6 = scmp.ge.s32.totalorder %s3420_s23, 4 }
   0xb   : > { %s5578_s25 = smov (%p35_p4, %s5576_s25), 0 }
   0xc   : > { %5469 = sst [smem:[#allocation14_spill]] %s5578_s25  ;;  %s37_s28 = ssub.s32 %s3416_s22, %s5578_s25 }
   0xd   : > { %s39_s29 = sor.u32 %s38_s27, %s37_s28  ;;  %383 = sbr.rel (%p3224_p6) target bundleno = 116 (0x74), region = 16 }
   0xe   : > { %p40_p5 = scmp.eq.s32.totalorder %s39_s29, 0 }
  0x10   : > { %s3540_s12 = scalar_select %p40_p5, %s3400_s18, %s42_s30  }
  0x12   : > { %386 = sbr.rel (!%p3528_p3) target bundleno = 27 (0x1b), region = 20  ;;  %s388_s13 = sand.u32 (%p3528_p3), 1, %s3400_s18  }
  0x13   : > { %s3245_s14 = smul.u32 (%p3528_p3), 6, %s3416_s22 }
  0x14   : > { %s3244_s15 = smul.u32 (%p3528_p3), 24, %s388_s13 }
  0x15   : > { %s392_s16 = sadd.s32 (%p3528_p3), %s3412_s21, %s3245_s14 }
  0x16   : > { %s3225_s24 = sshll.u32 (%p3528_p3), %s392_s16, 3  ;;  %s390_s29 = scalar_lea.vmem (%p3528_p3), [#allocation2], %s3244_s15 }
  0x17   : > { %s394_s28 = scalar_lea.vmem %s5400_s0, %s3225_s24 }
  0x18   : > { %v427_v0 = vld [vmem:[%s394_s28] sm:$0xff]  ;;  %v429_v1 = vld [vmem:[%s394_s28 + $0x10] sm:$0xff] }
  0x19   : > { %v431_v2 = vld [vmem:[%s394_s28 + $0x20] sm:$0xff]  ;;  %428 = vst [vmem:[%s390_s29] sm:$0xff] %v427_v0  ;;  %430 = vst [vmem:[%s390_s29 + $0x8] sm:$0xff] %v429_v1 }
  0x1a   : > { %432 = vst [vmem:[%s390_s29 + $0x10] sm:$0xff] %v431_v2 }
  0x1b PF: > { %438 = sbr.rel (!%p3528_p3) target bundleno = 36 (0x24), region = 58  ;;  %s440_s30 = sand.u32 (%p3528_p3), 1, %s3400_s18  }
  0x1c   : > { %s3247_s13 = smul.u32 (%p3528_p3), 6, %s3416_s22 }
  0x1d   : > { %s3246_s14 = smul.u32 (%p3528_p3), 6, %s440_s30 }
  0x1e   : > { %s444_s16 = sadd.s32 (%p3528_p3), %s3412_s21, %s3247_s13 }
  0x1f   : > { %s3226_s25 = sshll.u32 (%p3528_p3), %s444_s16, 1  ;;  %s442_s15 = scalar_lea.vmem (%p3528_p3), [#allocation3], %s3246_s14 }
  0x20   : > { %s446_s28 = scalar_lea.vmem %s5401_s1, %s3226_s25 }
  0x21   : > { %v463_v3 = vld [vmem:[%s446_s28] sm:$0x3]  ;;  %v465_v4 = vld [vmem:[%s446_s28 + $0x4] sm:$0x3]  ;;  %v467_v5 = vld [vmem:[%s446_s28 + $0x8] sm:$0x3] }
  0x22   : > { %464 = vst [vmem:[%s442_s15] sm:$0x3] %v463_v3  ;;  %466 = vst [vmem:[%s442_s15 + $0x2] sm:$0x3] %v465_v4 }
  0x23   : > { %468 = vst [vmem:[%s442_s15 + $0x4] sm:$0x3] %v467_v5 }
  0x24 PF: > { %490 = sbr.rel (!%p3528_p3) target bundleno = 45 (0x2d), region = 92  ;;  %s492_s29 = sand.u32 (%p3528_p3), 1, %s3400_s18  }
  0x25   : > { %s3249_s30 = smul.u32 (%p3528_p3), 6, %s3416_s22 }
  0x26   : > { %s3248_s13 = smul.u32 (%p3528_p3), 24, %s492_s29 }
  0x27   : > { %s496_s16 = sadd.s32 (%p3528_p3), %s3412_s21, %s3249_s30 }
  0x28   : > { %s3227_s24 = sshll.u32 (%p3528_p3), %s496_s16, 3  ;;  %s494_s14 = scalar_lea.vmem (%p3528_p3), [#allocation4], %s3248_s13 }
  0x29   : > { %s498_s28 = scalar_lea.vmem %s5402_s2, %s3227_s24 }
  0x2a   : > { %v531_v6 = vld [vmem:[%s498_s28] sm:$0xff]  ;;  %v533_v7 = vld [vmem:[%s498_s28 + $0x10] sm:$0xff] }
  0x2b   : > { %v535_v8 = vld [vmem:[%s498_s28 + $0x20] sm:$0xff]  ;;  %532 = vst [vmem:[%s494_s14] sm:$0xff] %v531_v6  ;;  %534 = vst [vmem:[%s494_s14 + $0x8] sm:$0xff] %v533_v7 }
  0x2c   : > { %536 = vst [vmem:[%s494_s14 + $0x10] sm:$0xff] %v535_v8 }
  0x2d PF: > { %542 = sbr.rel (!%p3528_p3) target bundleno = 54 (0x36), region = 130  ;;  %s544_s15 = sand.u32 (%p3528_p3), 1, %s3400_s18  }
  0x2e   : > { %s3251_s29 = smul.u32 (%p3528_p3), 6, %s3416_s22 }
  0x2f   : > { %s3250_s30 = smul.u32 (%p3528_p3), 6, %s544_s15 }
  0x30   : > { %s548_s16 = sadd.s32 (%p3528_p3), %s3412_s21, %s3251_s29 }
  0x31   : > { %s3228_s25 = sshll.u32 (%p3528_p3), %s548_s16, 1  ;;  %s546_s13 = scalar_lea.vmem (%p3528_p3), [#allocation5], %s3250_s30 }
  0x32   : > { %s550_s28 = scalar_lea.vmem %s5403_s3, %s3228_s25 }
  0x33   : > { %v567_v9 = vld [vmem:[%s550_s28] sm:$0x3]  ;;  %v569_v10 = vld [vmem:[%s550_s28 + $0x4] sm:$0x3]  ;;  %v571_v11 = vld [vmem:[%s550_s28 + $0x8] sm:$0x3] }
  0x34   : > { %568 = vst [vmem:[%s546_s13] sm:$0x3] %v567_v9  ;;  %570 = vst [vmem:[%s546_s13 + $0x2] sm:$0x3] %v569_v10 }
  0x35   : > { %572 = vst [vmem:[%s546_s13 + $0x4] sm:$0x3] %v571_v11 }
  0x36 PF: > { %594 = sbr.rel (!%p3528_p3) target bundleno = 63 (0x3f), region = 164  ;;  %s596_s14 = sand.u32 (%p3528_p3), 1, %s3400_s18  }
  0x37   : > { %s3253_s15 = smul.u32 (%p3528_p3), 6, %s3416_s22 }
  0x38   : > { %s3252_s29 = smul.u32 (%p3528_p3), 24, %s596_s14 }
  0x39   : > { %s600_s16 = sadd.s32 (%p3528_p3), %s3412_s21, %s3253_s15 }
  0x3a   : > { %s3229_s24 = sshll.u32 (%p3528_p3), %s600_s16, 3  ;;  %s598_s30 = scalar_lea.vmem (%p3528_p3), [#allocation6], %s3252_s29 }
  0x3b   : > { %s602_s28 = scalar_lea.vmem %s5404_s4, %s3229_s24 }
  0x3c   : > { %v635_v12 = vld [vmem:[%s602_s28] sm:$0xff]  ;;  %v637_v13 = vld [vmem:[%s602_s28 + $0x10] sm:$0xff] }
  0x3d   : > { %v639_v14 = vld [vmem:[%s602_s28 + $0x20] sm:$0xff]  ;;  %636 = vst [vmem:[%s598_s30] sm:$0xff] %v635_v12  ;;  %638 = vst [vmem:[%s598_s30 + $0x8] sm:$0xff] %v637_v13 }
  0x3e   : > { %640 = vst [vmem:[%s598_s30 + $0x10] sm:$0xff] %v639_v14 }
  0x3f PF: > { %646 = sbr.rel (!%p3528_p3) target bundleno = 72 (0x48), region = 202  ;;  %s648_s13 = sand.u32 (%p3528_p3), 1, %s3400_s18  }
  0x40   : > { %s3255_s14 = smul.u32 (%p3528_p3), 6, %s3416_s22 }
  0x41   : > { %s3254_s15 = smul.u32 (%p3528_p3), 6, %s648_s13 }
  0x42   : > { %s652_s16 = sadd.s32 (%p3528_p3), %s3412_s21, %s3255_s14 }
  0x43   : > { %s3230_s25 = sshll.u32 (%p3528_p3), %s652_s16, 1  ;;  %s650_s29 = scalar_lea.vmem (%p3528_p3), [#allocation7], %s3254_s15 }
  0x44   : > { %s654_s28 = scalar_lea.vmem %s5405_s5, %s3230_s25 }
  0x45   : > { %v671_v15 = vld [vmem:[%s654_s28] sm:$0x3]  ;;  %v673_v16 = vld [vmem:[%s654_s28 + $0x4] sm:$0x3]  ;;  %v675_v17 = vld [vmem:[%s654_s28 + $0x8] sm:$0x3] }
  0x46   : > { %672 = vst [vmem:[%s650_s29] sm:$0x3] %v671_v15  ;;  %674 = vst [vmem:[%s650_s29 + $0x2] sm:$0x3] %v673_v16 }
  0x47   : > { %676 = vst [vmem:[%s650_s29 + $0x4] sm:$0x3] %v675_v17 }
  0x48 PF: > { %698 = sbr.rel (!%p3528_p3) target bundleno = 81 (0x51), region = 236  ;;  %s700_s30 = sand.u32 (%p3528_p3), 1, %s3400_s18  }
  0x49   : > { %s3257_s13 = smul.u32 (%p3528_p3), 6, %s3416_s22 }
  0x4a   : > { %s3256_s14 = smul.u32 (%p3528_p3), 24, %s700_s30 }
  0x4b   : > { %s704_s16 = sadd.s32 (%p3528_p3), %s3412_s21, %s3257_s13 }
  0x4c   : > { %s3231_s24 = sshll.u32 (%p3528_p3), %s704_s16, 3  ;;  %s702_s15 = scalar_lea.vmem (%p3528_p3), [#allocation8], %s3256_s14 }
  0x4d   : > { %s706_s28 = scalar_lea.vmem %s5406_s6, %s3231_s24 }
  0x4e   : > { %v739_v18 = vld [vmem:[%s706_s28] sm:$0xff]  ;;  %v741_v19 = vld [vmem:[%s706_s28 + $0x10] sm:$0xff] }
  0x4f   : > { %v743_v20 = vld [vmem:[%s706_s28 + $0x20] sm:$0xff]  ;;  %740 = vst [vmem:[%s702_s15] sm:$0xff] %v739_v18  ;;  %742 = vst [vmem:[%s702_s15 + $0x8] sm:$0xff] %v741_v19 }
  0x50   : > { %744 = vst [vmem:[%s702_s15 + $0x10] sm:$0xff] %v743_v20 }
  0x51 PF: > { %750 = sbr.rel (!%p3528_p3) target bundleno = 90 (0x5a), region = 274  ;;  %s752_s29 = sand.u32 (%p3528_p3), 1, %s3400_s18  }
  0x52   : > { %s3259_s30 = smul.u32 (%p3528_p3), 6, %s3416_s22 }
  0x53   : > { %s3258_s13 = smul.u32 (%p3528_p3), 6, %s752_s29 }
  0x54   : > { %s756_s16 = sadd.s32 (%p3528_p3), %s3412_s21, %s3259_s30 }
  0x55   : > { %s3232_s25 = sshll.u32 (%p3528_p3), %s756_s16, 1  ;;  %s754_s14 = scalar_lea.vmem (%p3528_p3), [#allocation9], %s3258_s13 }
  0x56   : > { %s758_s28 = scalar_lea.vmem %s5407_s7, %s3232_s25 }
  0x57   : > { %v775_v21 = vld [vmem:[%s758_s28] sm:$0x3]  ;;  %v777_v22 = vld [vmem:[%s758_s28 + $0x4] sm:$0x3]  ;;  %v779_v23 = vld [vmem:[%s758_s28 + $0x8] sm:$0x3] }
  0x58   : > { %776 = vst [vmem:[%s754_s14] sm:$0x3] %v775_v21  ;;  %778 = vst [vmem:[%s754_s14 + $0x2] sm:$0x3] %v777_v22 }
  0x59   : > { %780 = vst [vmem:[%s754_s14 + $0x4] sm:$0x3] %v779_v23 }
  0x5a PF: > { %802 = sbr.rel (!%p3528_p3) target bundleno = 99 (0x63), region = 308  ;;  %s804_s15 = sand.u32 (%p3528_p3), 1, %s3400_s18  }
  0x5b   : > { %s3261_s29 = smul.u32 (%p3528_p3), 6, %s3416_s22 }
  0x5c   : > { %s3260_s30 = smul.u32 (%p3528_p3), 24, %s804_s15 }
  0x5d   : > { %s808_s16 = sadd.s32 (%p3528_p3), %s3412_s21, %s3261_s29 }
  0x5e   : > { %s3233_s24 = sshll.u32 (%p3528_p3), %s808_s16, 3  ;;  %s806_s13 = scalar_lea.vmem (%p3528_p3), [#allocation10], %s3260_s30 }
  0x5f   : > { %s810_s28 = scalar_lea.vmem %s5408_s8, %s3233_s24 }
  0x60   : > { %v843_v24 = vld [vmem:[%s810_s28] sm:$0xff]  ;;  %v845_v25 = vld [vmem:[%s810_s28 + $0x10] sm:$0xff] }
  0x61   : > { %v847_v26 = vld [vmem:[%s810_s28 + $0x20] sm:$0xff]  ;;  %844 = vst [vmem:[%s806_s13] sm:$0xff] %v843_v24  ;;  %846 = vst [vmem:[%s806_s13 + $0x8] sm:$0xff] %v845_v25 }
  0x62   : > { %848 = vst [vmem:[%s806_s13 + $0x10] sm:$0xff] %v847_v26 }
  0x63 PF: > { %854 = sbr.rel (!%p3528_p3) target bundleno = 108 (0x6c), region = 346  ;;  %s856_s14 = sand.u32 (%p3528_p3), 1, %s3400_s18  }
  0x64   : > { %s3263_s15 = smul.u32 (%p3528_p3), 6, %s3416_s22 }
  0x65   : > { %s3262_s29 = smul.u32 (%p3528_p3), 6, %s856_s14 }
  0x66   : > { %s860_s16 = sadd.s32 (%p3528_p3), %s3412_s21, %s3263_s15 }
  0x67   : > { %s3234_s25 = sshll.u32 (%p3528_p3), %s860_s16, 1  ;;  %s858_s30 = scalar_lea.vmem (%p3528_p3), [#allocation11], %s3262_s29 }
  0x68   : > { %s862_s28 = scalar_lea.vmem %s5409_s9, %s3234_s25 }
  0x69   : > { %v879_v27 = vld [vmem:[%s862_s28] sm:$0x3]  ;;  %v881_v28 = vld [vmem:[%s862_s28 + $0x4] sm:$0x3]  ;;  %v883_v29 = vld [vmem:[%s862_s28 + $0x8] sm:$0x3] }
  0x6a   : > { %880 = vst [vmem:[%s858_s30] sm:$0x3] %v879_v27  ;;  %882 = vst [vmem:[%s858_s30 + $0x2] sm:$0x3] %v881_v28 }
  0x6b   : > { %884 = vst [vmem:[%s858_s30 + $0x4] sm:$0x3] %v883_v29 }
  0x6c PF: > { %906 = sbr.rel (!%p3528_p3) target bundleno = 116 (0x74), region = 380  ;;  %s908_s13 = sand.u32 (%p3528_p3), 1, %s3400_s18  }
  0x6d   : > { %s3236_s14 = sshll.u32 (%p3528_p3), %s3416_s22, 1  ;;  %s3235_s15 = sshll.u32 (%p3528_p3), %s908_s13, 4 }
  0x6e   : > { %s912_s16 = sadd.s32 (%p3528_p3), %s3412_s21, %s3236_s14  ;;  %s910_s29 = scalar_lea.vmem (%p3528_p3), [#allocation12], %s3235_s15 }
  0x6f   : > { %s3237_s24 = sshll.u32 (%p3528_p3), %s912_s16, 3 }
  0x70   : > { %s914_s28 = scalar_lea.vmem (%p3528_p3), %s5410_s10, %s3237_s24 }
  0x71   : > { %v945_v30 = vld [vmem:[%s914_s28] sm:$0xff] }
  0x72   : > { %v947_v31 = vld [vmem:[%s914_s28 + $0x20] sm:$0xff]  ;;  %946 = vst [vmem:[%s910_s29] sm:$0xff] %v945_v30 }
  0x73   : > { %948 = vst [vmem:[%s910_s29 + $0x8] sm:$0xff] %v947_v31 }
  0x74 PF: > { %p3238_p7 = scmp.ge.s32.totalorder %s3420_s23, 1  ;;  %p953_p8 = scmp.lt.s32.totalorder %s3420_s23, 5 }
  0x76   : > { %p954_p9 = pnand %p3238_p7, %p953_p8 }
  0x78   : > { %957 = sbr.rel (%p954_p9) target bundleno = 897 (0x381), region = 418 }
  0x7d   : > { %s3634_s26 = sand.u32 1, %s3396_s17   ;;  %v5414_v32 = vlaneseq  ;;  %s3422_s27 = smov 16   ;;  %vm1178_vm2 = vcmask 1047680   ;;  %vm1723_vm5 = vcmask 130048   ;;  %vm2937_vm6 = vcmask 0  }
  0x7e   : > { %s3637_s30 = smul.u32 24, %s3634_s26  ;;  %p1111_p10 = scmp.lt.s32.totalorder %s3408_s20, 1 }
  0x7f   : > { %s3640_s13 = smul.u32 6, %s3634_s26  ;;  %v3643_v33 = vshrl.u32 %v5414_v32, 7  ;;  %p1113_p11 = scmp.lt.s32.totalorder %s3404_s19, 1 }
  0x80   : > { %s3648_s14 = scalar_lea.vmem [#allocation2], %s3637_s30  ;;  %s3680_s15 = scalar_lea.vmem [#allocation4], %s3637_s30 }
  0x81   : > { %vm1122_vm0 = vcmp.eq.s32.totalorder %v3643_v33, 0  ;;  %vm1123_vm1 = vcmp.eq.s32.totalorder %v3643_v33, 7  ;;  %v3651_v34 = vld [vmem:[%s3648_s14 + $0x10] sm:$0xff]  ;;  %v3654_v35 = vsub.s32 0, %v3643_v33  ;;  %v3657_v36 = vsub.s32 1, %v3643_v33  ;;  %s969_s17 = scalar_lea.vmem [#allocation3], %s3640_s13 }
  0x82   : > { %v3660_v37 = vld [vmem:[%s969_s17 + $0x4] sm:$0x3]  ;;  %v1134_v38 = vrot.slane %v3651_v34, 7  ;;  %v1137_v39 = vrot.slane %v3651_v34, 1  ;;  %v3669_v41 = vmul.f32 %v3651_v34, %v3651_v34  ;;  %v3675_v44 = vld [vmem:[%s969_s17] sm:$0x3] }
  0x83   : > { %v3665_v40 = vld [vmem:[%s3648_s14] sm:$0xff]  ;;  %v1151_v42 = vrot.slane %v3660_v37, %v3654_v35  ;;  %v1168_v43 = vrot.slane %v3660_v37, %v3657_v36  ;;  %v3686_v48 = vld [vmem:[%s3648_s14 + $0x8] sm:$0xff]  ;;  %v1143_v49 = vrot.slane %v3675_v44, %v3654_v35  ;;  %v1160_v50 = vrot.slane %v3675_v44, %v3657_v36  ;;  %s3693_s16 = scalar_lea.vmem [#allocation5], %s3640_s13  ;;  %s3717_s24 = scalar_lea.vmem [#allocation6], %s3637_s30 }
  0x84   : > { %v1132_v45 = vrot.slane %v3665_v40, 7  ;;  %v1135_v46 = vrot.slane %v3665_v40, 1  ;;  %v3683_v47 = vld [vmem:[%s3680_s15] sm:$0xff]  ;;  %v3696_v51 = vld [vmem:[%s3693_s16] sm:$0x3]  ;;  %v1133_v62 = vrot.slane %v3686_v48, 7  ;;  %v1237_v28 = vmul.f32 %v3665_v40, %v3665_v40 }
  0x85   : > { %v1360_v52 = vrot.slane %v3683_v47, 7  ;;  %v1363_v53 = vrot.slane %v3683_v47, 1  ;;  %v1154_v54 = vsel %vm1122_vm0, %v1151_v42, %v1134_v38  ;;  %v1171_v55 = vsel %vm1123_vm1, %v1168_v43, %v1137_v39  ;;  %v3708_v58 = vld [vmem:[%s969_s17 + $0x2] sm:$0x3]  ;;  %v3720_v63 = vld [vmem:[%s3717_s24] sm:$0xff]  ;;  %s3723_s25 = scalar_lea.vmem [#allocation7], %s3640_s13 }
  0x86   : > { %v1369_v56 = vrot.slane %v3696_v51, %v3654_v35  ;;  %v1384_v57 = vrot.slane %v3696_v51, %v3657_v36  ;;  %v1174_v59 = vadd.f32 %v1154_v54, %v3651_v34  ;;  %v1152_v60 = vsel %vm1122_vm0, %v1143_v49, %v1132_v45  ;;  %v3726_v0 = vld [vmem:[%s3723_s25] sm:$0x3]  ;;  %v3751_v14 = vld [vmem:[%s3693_s16 + $0x2] sm:$0x3]  ;;  %s3796_s28 = scalar_lea.vmem [#allocation8], %s3637_s30  ;;  %s3808_s29 = scalar_lea.vmem [#allocation9], %s3640_s13 }
  0x87   : > { %v1169_v61 = vsel %vm1123_vm1, %v1160_v50, %v1135_v46  ;;  %v1172_v1 = vadd.f32 %v1152_v60, %v3665_v40  ;;  %v1136_v4 = vrot.slane %v3686_v48, 1  ;;  %v1147_v7 = vrot.slane %v3708_v58, %v3654_v35  ;;  %v3742_v9 = vld [vmem:[%s3680_s15 + $0x8] sm:$0xff]  ;;  %v3799_v43 = vld [vmem:[%s3796_s28] sm:$0xff]  ;;  %s4006_s17 = scalar_lea.vmem [#allocation10], %s3637_s30  ;;  %s4027_s30 = scalar_lea.vmem [#allocation11], %s3640_s13 }
  0x88   : > { %v1378_v2 = vsel %vm1122_vm0, %v1369_v56, %v1360_v52  ;;  %v1393_v3 = vsel %vm1123_vm1, %v1384_v57, %v1363_v53  ;;  %v3734_v5 = vadd.f32 %v1174_v59, %v1171_v55  ;;  %v1164_v8 = vrot.slane %v3708_v58, %v3657_v36  ;;  %v3811_v56 = vld [vmem:[%s3808_s29] sm:$0x3]  ;;  %s3423_s13 = smov 127   ;;  %s5580_s20 = smov (!%p1111_p10, %s3408_s20), 1 }
  0x89   : > { %v1396_v6 = vadd.f32 %v1378_v2, %v3683_v47  ;;  %v3744_v10 = vadd.f32 %v1172_v1, %v1169_v61  ;;  %v1752_v11 = vrot.slane %v3720_v63, 7  ;;  %v1755_v12 = vrot.slane %v3720_v63, 1  ;;  %v3823_v1 = vld [vmem:[%s3723_s25 + $0x2] sm:$0x3]  ;;  %s5582_s19 = smov (!%p1113_p11, %s3404_s19), 1 }
  0x8a   : > { %v1761_v13 = vrot.slane %v3726_v0, %v3654_v35  ;;  %1185 = vrot.lane.b32.xlu1 %v3734_v5, %s3422_s27  ;;  %v1153_v16 = vsel %vm1122_vm0, %v1147_v7, %v1133_v62  ;;  %v1170_v17 = vsel %vm1123_vm1, %v1164_v8, %v1136_v4  ;;  %v1776_v18 = vrot.slane %v3726_v0, %v3657_v36  ;;  %v3820_v62 = vld [vmem:[%s3717_s24 + $0x8] sm:$0xff] }
  0x8b   : > { %v3755_v15 = vadd.f32 %v1396_v6, %v1393_v3  ;;  %1179 = vrot.lane.b32.xlu0 %v3744_v10, %s3422_s27  ;;  %v1173_v19 = vadd.f32 %v1153_v16, %v3686_v48  ;;  %v1361_v21 = vrot.slane %v3742_v9, 7  ;;  %v1364_v22 = vrot.slane %v3742_v9, 1 }
  0x8c   : > { %v1770_v20 = vsel %vm1122_vm0, %v1761_v13, %v1752_v11  ;;  %v1785_v23 = vsel %vm1123_vm1, %v1776_v18, %v1755_v12  ;;  %v1373_v25 = vrot.slane %v3751_v14, %v3654_v35  ;;  %v1388_v26 = vrot.slane %v3751_v14, %v3657_v36 }
  0x8d   : > { %v1788_v24 = vadd.f32 %v1770_v20, %v3720_v63  ;;  %v3777_v27 = vadd.f32 %v1173_v19, %v1170_v17  ;;  %v1240_v29 = vmul.f32 %v3675_v44, %v3675_v44  ;;  %v1238_v30 = vmul.f32 %v3686_v48, %v3686_v48  ;;  %v3847_v19 = vld [vmem:[%s3796_s28 + $0x8] sm:$0xff] }
  0x8e   : > { %1402 = vrot.lane.b32.xlu1 %v3755_v15, %s3422_s27  ;;  %v1379_v38 = vsel %vm1122_vm0, %v1373_v25, %v1361_v21  ;;  %v1394_v39 = vsel %vm1123_vm1, %v1388_v26, %v1364_v22  ;;  %v1241_v42 = vmul.f32 %v3708_v58, %v3708_v58  ;;  %v1243_v46 = vrot.slane %v1237_v28, 7 }
  0x8f   : > { %v3787_v31 = vadd.f32 %v1788_v24, %v1785_v23  ;;  %1182 = vrot.lane.b32.xlu0 %v3777_v27, %s3422_s27  ;;  %v1397_v45 = vadd.f32 %v1379_v38, %v3742_v9  ;;  %v1246_v49 = vrot.slane %v1237_v28, 1  ;;  %v1252_v50 = vrot.slane %v1240_v29, %v3654_v35 }
  0x90   : > { %v1267_v52 = vrot.slane %v1240_v29, %v3657_v36  ;;  %v1244_v53 = vrot.slane %v1238_v30, 7  ;;  %v1247_v54 = vrot.slane %v1238_v30, 1  ;;  %v1256_v55 = vrot.slane %v1241_v42, %v3654_v35  ;;  %v3866_v29 = vld [vmem:[%s3808_s29 + $0x2] sm:$0x3] }
  0x91   : > { %v3813_v57 = vadd.f32 %v1397_v45, %v1394_v39  ;;  %v1261_v59 = vsel %vm1122_vm0, %v1252_v50, %v1243_v46  ;;  %v1271_v60 = vrot.slane %v1241_v42, %v3657_v36  ;;  %v2143_v61 = vrot.slane %v3799_v43, 7  ;;  %v3876_v45 = vld [vmem:[%s3680_s15 + $0x10] sm:$0xff] }
  0x92   : > { %1794 = vrot.lane.b32.xlu1 %v3787_v31, %s3422_s27  ;;  %v1276_v2 = vsel %vm1123_vm1, %v1267_v52, %v1246_v49  ;;  %v1279_v3 = vadd.f32 %v1261_v59, %v1237_v28  ;;  %v1262_v4 = vsel %vm1122_vm0, %v1256_v55, %v1244_v53  ;;  %v2146_v6 = vrot.slane %v3799_v43, 1 }
  0x93   : > { %1405 = vrot.lane.b32.xlu0 %v3813_v57, %s3422_s27  ;;  %v1277_v7 = vsel %vm1123_vm1, %v1271_v60, %v1247_v54  ;;  %v1280_v8 = vadd.f32 %v1262_v4, %v1238_v30  ;;  %v2152_v11 = vrot.slane %v3811_v56, %v3654_v35  ;;  %v2167_v12 = vrot.slane %v3811_v56, %v3657_v36 }
  0x94   : > { %v3840_v13 = vadd.f32 %v1279_v3, %v1276_v2  ;;  %v1753_v16 = vrot.slane %v3820_v62, 7  ;;  %v1756_v17 = vrot.slane %v3820_v62, 1  ;;  %v1765_v18 = vrot.slane %v3823_v1, %v3654_v35  ;;  %v3900_v3 = vld [vmem:[%s3693_s16 + $0x4] sm:$0x3]  ;;  %s3424_s16 = smov 113  }
  0x95   : > { %v3849_v20 = vadd.f32 %v1280_v8, %v1277_v7  ;;  %v2161_v21 = vsel %vm1122_vm0, %v2152_v11, %v2143_v61  ;;  %v2176_v22 = vsel %vm1123_vm1, %v2167_v12, %v2146_v6  ;;  %v1780_v23 = vrot.slane %v3823_v1, %v3657_v36  ;;  %v3911_v12 = vld [vmem:[%s3717_s24 + $0x10] sm:$0xff] }
  0x96   : > { %5470 = vst [vmem:[#allocation15_spill] sm:$0xff] %v3840_v13  ;;  %1285 = vrot.lane.b32.xlu1 %v3840_v13, %s3422_s27  ;;  %v2179_v24 = vadd.f32 %v2161_v21, %v3799_v43  ;;  %v1771_v25 = vsel %vm1122_vm0, %v1765_v18, %v1753_v16  ;;  %v1242_v26 = vmul.f32 %v3660_v37, %v3660_v37  ;;  %v1245_v28 = vrot.slane %v3669_v41, 7 }
  0x97   : > { %5471 = vst [vmem:[#allocation16_spill] sm:$0xff] %v3849_v20  ;;  %1288 = vrot.lane.b32.xlu0 %v3849_v20, %s3422_s27  ;;  %v1786_v30 = vsel %vm1123_vm1, %v1780_v23, %v1756_v17  ;;  %v1789_v38 = vadd.f32 %v1771_v25, %v3820_v62  ;;  %v1248_v39 = vrot.slane %v3669_v41, 1  ;;  %v2144_v42 = vrot.slane %v3847_v19, 7  ;;  %v3924_v25 = vld [vmem:[%s3723_s25 + $0x4] sm:$0x3] }
  0x98   : > { %v3878_v46 = vadd.f32 %v2179_v24, %v2176_v22  ;;  %v1260_v49 = vrot.slane %v1242_v26, %v3654_v35  ;;  %v1275_v50 = vrot.slane %v1242_v26, %v3657_v36  ;;  %v2147_v52 = vrot.slane %v3847_v19, 1 }
  0x99   : > { %v3883_v53 = vadd.f32 %v1789_v38, %v1786_v30  ;;  %v2156_v54 = vrot.slane %v3866_v29, %v3654_v35  ;;  %v2171_v55 = vrot.slane %v3866_v29, %v3657_v36  ;;  %v1456_v59 = vmul.f32 %v3683_v47, %v3683_v47 }
  0x9a   : > { %2185 = vrot.lane.b32.xlu1 %v3878_v46, %s3422_s27  ;;  %v1263_v60 = vsel %vm1122_vm0, %v1260_v49, %v1245_v28  ;;  %v1278_v61 = vsel %vm1123_vm1, %v1275_v50, %v1248_v39  ;;  %v1459_v2 = vmul.f32 %v3696_v51, %v3696_v51  ;;  %v1362_v4 = vrot.slane %v3876_v45, 7 }
  0x9b   : > { %1797 = vrot.lane.b32.xlu0 %v3883_v53, %s3422_s27  ;;  %v1281_v6 = vadd.f32 %v1263_v60, %v3669_v41  ;;  %v2162_v7 = vsel %vm1122_vm0, %v2156_v54, %v2144_v42  ;;  %v2177_v8 = vsel %vm1123_vm1, %v2171_v55, %v2147_v52  ;;  %v1462_v11 = vrot.slane %v1456_v59, 7 }
  0x9c   : > { %v2180_v16 = vadd.f32 %v2162_v7, %v3847_v19  ;;  %v1465_v17 = vrot.slane %v1456_v59, 1  ;;  %v1471_v18 = vrot.slane %v1459_v2, %v3654_v35  ;;  %v1486_v21 = vrot.slane %v1459_v2, %v3657_v36 }
  0x9d   : > { %v3916_v22 = vadd.f32 %v1281_v6, %v1278_v61  ;;  %v1365_v41 = vrot.slane %v3876_v45, 1  ;;  %v1377_v23 = vrot.slane %v3900_v3, %v3654_v35  ;;  %v1392_v24 = vrot.slane %v3900_v3, %v3657_v36 }
  0x9e   : > { %v3926_v26 = vadd.f32 %v2180_v16, %v2177_v8  ;;  %v1480_v28 = vsel %vm1122_vm0, %v1471_v18, %v1462_v11  ;;  %v1495_v30 = vsel %vm1123_vm1, %v1486_v21, %v1465_v17  ;;  %v1754_v38 = vrot.slane %v3911_v12, 7 }
  0x9f   : > { %5472 = vst [vmem:[#allocation17_spill] sm:$0xff] %v3916_v22  ;;  %1291 = vrot.lane.b32.xlu1 %v3916_v22, %s3422_s27  ;;  %v1498_v39 = vadd.f32 %v1480_v28, %v1456_v59  ;;  %v1380_v42 = vsel %vm1122_vm0, %v1377_v23, %v1362_v4  ;;  %v1395_v49 = vsel %vm1123_vm1, %v1392_v24, %v1365_v41  ;;  %v1757_v50 = vrot.slane %v3911_v12, 1 }
  0xa0   : > { %2188 = vrot.lane.b32.xlu0 %v3926_v26, %s3422_s27  ;;  %v1398_v52 = vadd.f32 %v1380_v42, %v3876_v45  ;;  %v1769_v54 = vrot.slane %v3924_v25, %v3654_v35  ;;  %v1784_v55 = vrot.slane %v3924_v25, %v3657_v36  ;;  %v1457_v59 = vmul.f32 %v3742_v9, %v3742_v9 }
  0xa1   : > { %v3949_v60 = vadd.f32 %v1498_v39, %v1495_v30  ;;  %v1460_v61 = vmul.f32 %v3751_v14, %v3751_v14  ;;  %v1849_v2 = vmul.f32 %v3820_v62, %v3820_v62  ;;  %v1852_v4 = vmul.f32 %v3823_v1, %v3823_v1 }
  0xa2   : > { %v3957_v6 = vadd.f32 %v1398_v52, %v1395_v49  ;;  %v1772_v7 = vsel %vm1122_vm0, %v1769_v54, %v1754_v38  ;;  %v1787_v8 = vsel %vm1123_vm1, %v1784_v55, %v1757_v50  ;;  %v1463_v11 = vrot.slane %v1457_v59, 7  ;;  %v3987_v55 = vld [vmem:[%s3796_s28 + $0x10] sm:$0xff] }
  0xa3   : > { %5473 = vst [vmem:[#allocation18_spill] sm:$0xff] %v3949_v60  ;;  %1504 = vrot.lane.b32.xlu1 %v3949_v60, %s3422_s27  ;;  %v1790_v16 = vadd.f32 %v1772_v7, %v3911_v12  ;;  %v1466_v17 = vrot.slane %v1457_v59, 1  ;;  %v1475_v18 = vrot.slane %v1460_v61, %v3654_v35  ;;  %v1490_v21 = vrot.slane %v1460_v61, %v3657_v36 }
  0xa4   : > { %5474 = vst [vmem:[#allocation19_spill] sm:$0xff] %v3957_v6  ;;  %1408 = vrot.lane.b32.xlu0 %v3957_v6, %s3422_s27  ;;  %v1855_v41 = vrot.slane %v1849_v2, 7  ;;  %v1858_v23 = vrot.slane %v1849_v2, 1  ;;  %v1867_v24 = vrot.slane %v1852_v4, %v3654_v35  ;;  %v1882_v28 = vrot.slane %v1852_v4, %v3657_v36 }
  0xa5   : > { %v3972_v30 = vadd.f32 %v1790_v16, %v1787_v8  ;;  %v1481_v38 = vsel %vm1122_vm0, %v1475_v18, %v1463_v11  ;;  %v1496_v39 = vsel %vm1123_vm1, %v1490_v21, %v1466_v17  ;;  %v1848_v42 = vmul.f32 %v3720_v63, %v3720_v63  ;;  %v4000_v18 = vld [vmem:[%s3808_s29 + $0x4] sm:$0x3] }
  0xa6   : > { %v1499_v49 = vadd.f32 %v1481_v38, %v1457_v59  ;;  %v1873_v50 = vsel %vm1122_vm0, %v1867_v24, %v1855_v41  ;;  %v1888_v52 = vsel %vm1123_vm1, %v1882_v28, %v1858_v23  ;;  %v1851_v54 = vmul.f32 %v3726_v0, %v3726_v0  ;;  %v4009_v24 = vld [vmem:[%s4006_s17] sm:$0xff] }
  0xa7   : > { %5475 = vst [vmem:[#allocation20_spill] sm:$0xff] %v3972_v30  ;;  %1800 = vrot.lane.b32.xlu1 %v3972_v30, %s3422_s27  ;;  %v1891_v61 = vadd.f32 %v1873_v50, %v1849_v2  ;;  %v1854_v4 = vrot.slane %v1848_v42, 7  ;;  %v1857_v7 = vrot.slane %v1848_v42, 1  ;;  %v2239_v59 = vmul.f32 %v3799_v43, %v3799_v43 }
  0xa8   : > { %v3993_v8 = vadd.f32 %v1499_v49, %v1496_v39  ;;  %v1863_v11 = vrot.slane %v1851_v54, %v3654_v35  ;;  %v1878_v16 = vrot.slane %v1851_v54, %v3657_v36  ;;  %v2242_v17 = vmul.f32 %v3811_v56, %v3811_v56 }
  0xa9   : > { %v4002_v21 = vadd.f32 %v1891_v61, %v1888_v52  ;;  %v2245_v2 = vrot.slane %v2239_v59, 7  ;;  %v2248_v41 = vrot.slane %v2239_v59, 1  ;;  %v2145_v23 = vrot.slane %v3987_v55, 7 }
  0xaa   : > { %5476 = vst [vmem:[#allocation21_spill] sm:$0xff] %v3993_v8  ;;  %1507 = vrot.lane.b32.xlu0 %v3993_v8, %s3422_s27  ;;  %v1872_v28 = vsel %vm1122_vm0, %v1863_v11, %v1854_v4  ;;  %v1887_v38 = vsel %vm1123_vm1, %v1878_v16, %v1857_v7  ;;  %v2254_v39 = vrot.slane %v2242_v17, %v3654_v35  ;;  %v2148_v52 = vrot.slane %v3987_v55, 1  ;;  %v4030_v4 = vld [vmem:[%s4027_s30] sm:$0x3] }
  0xab   : > { %5477 = vst [vmem:[#allocation22_spill] sm:$0xff] %v4002_v21  ;;  %v2269_v49 = vrot.slane %v2242_v17, %v3657_v36  ;;  %1899 = vrot.lane.b32.xlu1 %v4002_v21, %s3422_s27  ;;  %v1890_v50 = vadd.f32 %v1872_v28, %v1848_v42  ;;  %v2160_v54 = vrot.slane %v4000_v18, %v3654_v35  ;;  %v2537_v11 = vrot.slane %v4009_v24, 7  ;;  %v4039_v17 = vld [vmem:[%s4006_s17 + $0x8] sm:$0xff] }
  0xac   : > { %v2175_v61 = vrot.slane %v4000_v18, %v3657_v36  ;;  %v2263_v7 = vsel %vm1122_vm0, %v2254_v39, %v2245_v2  ;;  %v2540_v16 = vrot.slane %v4009_v24, 1  ;;  %v2561_v39 = vrot.slane %v4030_v4, %v3657_v36 }
  0xad   : > { %v2278_v42 = vsel %vm1123_vm1, %v2269_v49, %v2248_v41  ;;  %v4041_v28 = vadd.f32 %v1890_v50, %v1887_v38  ;;  %v2281_v32 = vadd.f32 %v2263_v7, %v2239_v59  ;;  %v2163_v21 = vsel %vm1122_vm0, %v2160_v54, %v2145_v23  ;;  %v4061_v38 = vld [vmem:[%s4027_s30 + $0x2] sm:$0x3] }
  0xae   : > { %v2178_v8 = vsel %vm1123_vm1, %v2175_v61, %v2148_v52  ;;  %v2181_v2 = vadd.f32 %v2163_v21, %v3987_v55  ;;  %v2546_v41 = vrot.slane %v4030_v4, %v3654_v35  ;;  %v2240_v49 = vmul.f32 %v3847_v19, %v3847_v19 }
  0xaf   : > { %5478 = vst [vmem:[#allocation23_spill] sm:$0xff] %v4041_v28  ;;  %1896 = vrot.lane.b32.xlu0 %v4041_v28, %s3422_s27  ;;  %v4056_v59 = vadd.f32 %v2281_v32, %v2278_v42  ;;  %v2243_v23 = vmul.f32 %v3866_v29, %v3866_v29  ;;  %v2538_v21 = vrot.slane %v4039_v17, 7  ;;  %v2541_v50 = vrot.slane %v4039_v17, 1 }
  0xb0   : > { %v4065_v52 = vadd.f32 %v2181_v2, %v2178_v8  ;;  %v2555_v54 = vsel %vm1122_vm0, %v2546_v41, %v2537_v11  ;;  %v2570_v61 = vsel %vm1123_vm1, %v2561_v39, %v2540_v16  ;;  %v2246_v7 = vrot.slane %v2240_v49, 7 }
  0xb1   : > { %5479 = vst [vmem:[#allocation24_spill] sm:$0xff] %v4056_v59  ;;  %2287 = vrot.lane.b32.xlu1 %v4056_v59, %s3422_s27  ;;  %v2573_v32 = vadd.f32 %v2555_v54, %v4009_v24  ;;  %v2249_v42 = vrot.slane %v2240_v49, 1  ;;  %v2258_v28 = vrot.slane %v2243_v23, %v3654_v35  ;;  %v2273_v60 = vrot.slane %v2243_v23, %v3657_v36 }
  0xb2   : > { %5480 = vst [vmem:[#allocation25_spill] sm:$0xff] %v4065_v52  ;;  %v2550_v8 = vrot.slane %v4061_v38, %v3654_v35  ;;  %v2565_v11 = vrot.slane %v4061_v38, %v3657_v36  ;;  %v1458_v16 = vmul.f32 %v3876_v45, %v3876_v45  ;;  %v1461_v2 = vmul.f32 %v3900_v3, %v3900_v3 }
  0xb3   : > { %2191 = vrot.lane.b32.xlu0 %v4065_v52, %s3422_s27  ;;  %v4086_v41 = vadd.f32 %v2573_v32, %v2570_v61  ;;  %v2264_v39 = vsel %vm1122_vm0, %v2258_v28, %v2246_v7  ;;  %v2279_v23 = vsel %vm1123_vm1, %v2273_v60, %v2249_v42  ;;  %v1850_v54 = vmul.f32 %v3911_v12, %v3911_v12 }
  0xb4   : > { %v2282_v59 = vadd.f32 %v2264_v39, %v2240_v49  ;;  %v2556_v20 = vsel %vm1122_vm0, %v2550_v8, %v2538_v21  ;;  %v2571_v22 = vsel %vm1123_vm1, %v2565_v11, %v2541_v50  ;;  %v1464_v13 = vrot.slane %v1458_v16, 7  ;;  %v4108_v50 = vld [vmem:[%s4006_s17 + $0x10] sm:$0xff] }
  0xb5   : > { %5481 = vst [vmem:[#allocation26_spill] sm:$0xff] %v4086_v41  ;;  %2579 = vrot.lane.b32.xlu1 %v4086_v41, %s3422_s27  ;;  %v2574_v28 = vadd.f32 %v2556_v20, %v4039_v17  ;;  %v1467_v61 = vrot.slane %v1458_v16, 1  ;;  %v1479_v7 = vrot.slane %v1461_v2, %v3654_v35  ;;  %v1494_v60 = vrot.slane %v1461_v2, %v3657_v36 }
  0xb6   : > { %v4103_v32 = vadd.f32 %v2282_v59, %v2279_v23  ;;  %v1853_v49 = vmul.f32 %v3924_v25, %v3924_v25  ;;  %v1856_v21 = vrot.slane %v1850_v54, 7  ;;  %v1859_v42 = vrot.slane %v1850_v54, 1 }
  0xb7   : > { %v4110_v8 = vadd.f32 %v2574_v28, %v2571_v22  ;;  %v1482_v20 = vsel %vm1122_vm0, %v1479_v7, %v1464_v13  ;;  %v1497_v11 = vsel %vm1123_vm1, %v1494_v60, %v1467_v61  ;;  %v2241_v2 = vmul.f32 %v3987_v55, %v3987_v55  ;;  %v4125_v28 = vld [vmem:[%s4027_s30 + $0x4] sm:$0x3] }
  0xb8   : > { %5482 = vst [vmem:[#allocation27_spill] sm:$0xff] %v4103_v32  ;;  %2290 = vrot.lane.b32.xlu0 %v4103_v32, %s3422_s27  ;;  %v1500_v59 = vadd.f32 %v1482_v20, %v1458_v16  ;;  %v1871_v39 = vrot.slane %v1853_v49, %v3654_v35  ;;  %v1886_v23 = vrot.slane %v1853_v49, %v3657_v36  ;;  %v2539_v61 = vrot.slane %v4108_v50, 7 }
  0xb9   : > { %5483 = vst [vmem:[#allocation28_spill] sm:$0xff] %v4110_v8  ;;  %v2244_v22 = vmul.f32 %v4000_v18, %v4000_v18  ;;  %v2247_v13 = vrot.slane %v2241_v2, 7  ;;  %v2250_v7 = vrot.slane %v2241_v2, 1  ;;  %v2542_v60 = vrot.slane %v4108_v50, 1 }
  0xba   : > { %v4129_v41 = vadd.f32 %v1500_v59, %v1497_v11  ;;  %v1874_v16 = vsel %vm1122_vm0, %v1871_v39, %v1856_v21  ;;  %v1889_v20 = vsel %vm1123_vm1, %v1886_v23, %v1859_v42  ;;  %v2554_v30 = vrot.slane %v4125_v28, %v3654_v35 }
  0xbb   : > { %v2262_v49 = vrot.slane %v2244_v22, %v3654_v35  ;;  %v1892_v32 = vadd.f32 %v1874_v16, %v1850_v54  ;;  %v2277_v52 = vrot.slane %v2244_v22, %v3657_v36  ;;  %v2569_v6 = vrot.slane %v4125_v28, %v3657_v36 }
  0xbc   : > { %5484 = vst [vmem:[#allocation29_spill] sm:$0xff] %v4129_v41  ;;  %2582 = vrot.lane.b32.xlu0 %v4110_v8, %s3422_s27  ;;  %1510 = vrot.lane.b32.xlu1 %v4129_v41, %s3422_s27  ;;  %v2633_v54 = vmul.f32 %v4009_v24, %v4009_v24  ;;  %v2636_v42 = vmul.f32 %v4030_v4, %v4030_v4 }
  0xbd   : > { %v2265_v21 = vsel %vm1122_vm0, %v2262_v49, %v2247_v13  ;;  %v4151_v11 = vadd.f32 %v1892_v32, %v1889_v20  ;;  %v2280_v59 = vsel %vm1123_vm1, %v2277_v52, %v2250_v7  ;;  %v2557_v23 = vsel %vm1122_vm0, %v2554_v30, %v2539_v61 }
  0xbe   : > { %v2283_v39 = vadd.f32 %v2265_v21, %v2241_v2  ;;  %v2572_v22 = vsel %vm1123_vm1, %v2569_v6, %v2542_v60  ;;  %v2575_v13 = vadd.f32 %v2557_v23, %v4108_v50  ;;  %v2639_v16 = vrot.slane %v2633_v54, 7 }
  0xbf   : > { %5485 = vst [vmem:[#allocation30_spill] sm:$0xff] %v4151_v11  ;;  %v2642_v49 = vrot.slane %v2633_v54, 1  ;;  %v2648_v8 = vrot.slane %v2636_v42, %v3654_v35  ;;  %v2663_v32 = vrot.slane %v2636_v42, %v3657_v36  ;;  %v2634_v52 = vmul.f32 %v4039_v17, %v4039_v17 }
  0xc0   : > { %v4160_v41 = vadd.f32 %v2283_v39, %v2280_v59  ;;  %1902 = vrot.lane.b32.xlu0 %v4151_v11, %s3422_s27  ;;  %v4168_v30 = vadd.f32 %v2575_v13, %v2572_v22  ;;  %v2637_v6 = vmul.f32 %v4061_v38, %v4061_v38  ;;  %v2635_v2 = vmul.f32 %v4108_v50, %v4108_v50 }
  0xc1   : > { %v2638_v7 = vmul.f32 %v4125_v28, %v4125_v28  ;;  %v2657_v61 = vsel %vm1122_vm0, %v2648_v8, %v2639_v16  ;;  %v2672_v60 = vsel %vm1123_vm1, %v2663_v32, %v2642_v49  ;;  %v2640_v20 = vrot.slane %v2634_v52, 7 }
  0xc2   : > { %5486 = vst [vmem:[#allocation31_spill] sm:$0xff] %v4160_v41  ;;  %2293 = vrot.lane.b32.xlu1 %v4160_v41, %s3422_s27  ;;  %v2643_v21 = vrot.slane %v2634_v52, 1  ;;  %v2675_v42 = vadd.f32 %v2657_v61, %v2633_v54  ;;  %v2652_v59 = vrot.slane %v2637_v6, %v3654_v35  ;;  %v2667_v39 = vrot.slane %v2637_v6, %v3657_v36 }
  0xc3   : > { %v2641_v23 = vrot.slane %v2635_v2, 7  ;;  %v2644_v22 = vrot.slane %v2635_v2, 1  ;;  %v2656_v13 = vrot.slane %v2638_v7, %v3654_v35  ;;  %v2671_v11 = vrot.slane %v2638_v7, %v3657_v36 }
  0xc4   : > { %v1564_v41 = vmul.f32 %v3683_v47, %v3665_v40  ;;  %2585 = vrot.lane.b32.xlu0 %v4168_v30, %s3422_s27  ;;  %v4190_v8 = vadd.f32 %v2675_v42, %v2672_v60  ;;  %v2658_v54 = vsel %vm1122_vm0, %v2652_v59, %v2640_v20  ;;  %v2673_v16 = vsel %vm1123_vm1, %v2667_v39, %v2643_v21 }
  0xc5   : > { %v1567_v49 = vmul.f32 %v3696_v51, %v3675_v44  ;;  %v2676_v32 = vadd.f32 %v2658_v54, %v2634_v52  ;;  %v2659_v6 = vsel %vm1122_vm0, %v2656_v13, %v2641_v23  ;;  %v2674_v47 = vsel %vm1123_vm1, %v2671_v11, %v2644_v22 }
  0xc6   : > { %5487 = vst [vmem:[#allocation32_spill] sm:$0xff] %v4190_v8  ;;  %v1570_v7 = vrot.slane %v1564_v41, 7  ;;  %2681 = vrot.lane.b32.xlu1 %v4190_v8, %s3422_s27  ;;  %v2677_v61 = vadd.f32 %v2659_v6, %v2635_v2  ;;  %v1573_v60 = vrot.slane %v1564_v41, 1  ;;  %v1565_v51 = vmul.f32 %v3742_v9, %v3686_v48 }
  0xc7   : > { %v1579_v20 = vrot.slane %v1567_v49, %v3654_v35  ;;  %v1594_v21 = vrot.slane %v1567_v49, %v3657_v36  ;;  %v4206_v42 = vadd.f32 %v2676_v32, %v2673_v16  ;;  %v1568_v52 = vmul.f32 %v3751_v14, %v3708_v58 }
  0xc8   : > { %v1956_v11 = vmul.f32 %v3720_v63, %v3665_v40  ;;  %v4214_v59 = vadd.f32 %v2677_v61, %v2674_v47  ;;  %v1959_v23 = vmul.f32 %v3726_v0, %v3675_v44  ;;  %v1571_v22 = vrot.slane %v1565_v51, 7 }
  0xc9   : > { %5488 = vst [vmem:[#allocation33_spill] sm:$0xff] %v4206_v42  ;;  %v1588_v2 = vsel %vm1122_vm0, %v1579_v20, %v1570_v7  ;;  %v1603_v39 = vsel %vm1123_vm1, %v1594_v21, %v1573_v60  ;;  %2684 = vrot.lane.b32.xlu0 %v4206_v42, %s3422_s27  ;;  %v1574_v14 = vrot.slane %v1565_v51, 1  ;;  %v1583_v13 = vrot.slane %v1568_v52, %v3654_v35 }
  0xca   : > { %5489 = vst [vmem:[#allocation34_spill] sm:$0xff] %v4214_v59  ;;  %v1606_v9 = vadd.f32 %v1588_v2, %v1564_v41  ;;  %2687 = vrot.lane.b32.xlu1 %v4214_v59, %s3422_s27  ;;  %v1598_v63 = vrot.slane %v1568_v52, %v3657_v36  ;;  %v1962_v54 = vrot.slane %v1956_v11, 7  ;;  %v1965_v16 = vrot.slane %v1956_v11, 1 }
  0xcb   : > { %v1971_v49 = vrot.slane %v1959_v23, %v3654_v35  ;;  %v1589_v0 = vsel %vm1122_vm0, %v1583_v13, %v1571_v22  ;;  %v1986_v41 = vrot.slane %v1959_v23, %v3657_v36  ;;  %v1957_v6 = vmul.f32 %v3820_v62, %v3686_v48 }
  0xcc   : > { %v4229_v32 = vadd.f32 %v1606_v9, %v1603_v39  ;;  %v1604_v47 = vsel %vm1123_vm1, %v1598_v63, %v1574_v14  ;;  %v1607_v7 = vadd.f32 %v1589_v0, %v1565_v51  ;;  %v1960_v60 = vmul.f32 %v3823_v1, %v3708_v58 }
  0xcd   : > { %v1980_v61 = vsel %vm1122_vm0, %v1971_v49, %v1962_v54  ;;  %v1995_v20 = vsel %vm1123_vm1, %v1986_v41, %v1965_v16  ;;  %v1963_v52 = vrot.slane %v1957_v6, 7  ;;  %v1966_v2 = vrot.slane %v1957_v6, 1 }
  0xce   : > { %5490 = vst [vmem:[#allocation35_spill] sm:$0xff] %v4229_v32  ;;  %1612 = vrot.lane.b32.xlu0 %v4229_v32, %s3422_s27  ;;  %v1998_v21 = vadd.f32 %v1980_v61, %v1956_v11  ;;  %v4246_v62 = vadd.f32 %v1607_v7, %v1604_v47  ;;  %v1975_v39 = vrot.slane %v1960_v60, %v3654_v35 }
  0xcf   : > { %v1990_v51 = vrot.slane %v1960_v60, %v3657_v36  ;;  %v2347_v23 = vmul.f32 %v3799_v43, %v3665_v40  ;;  %v2350_v1 = vmul.f32 %v3811_v56, %v3675_v44  ;;  %v2348_v22 = vmul.f32 %v3847_v19, %v3686_v48 }
  0xd0   : > { %5491 = vst [vmem:[#allocation36_spill] sm:$0xff] %v4246_v62  ;;  %v4252_v9 = vadd.f32 %v1998_v21, %v1995_v20  ;;  %v2351_v11 = vmul.f32 %v3866_v29, %v3708_v58  ;;  %1615 = vrot.lane.b32.xlu1 %v4246_v62, %s3422_s27  ;;  %v1981_v14 = vsel %vm1122_vm0, %v1975_v39, %v1963_v52 }
  0xd1   : > { %v1996_v43 = vsel %vm1123_vm1, %v1990_v51, %v1966_v2  ;;  %v2353_v13 = vrot.slane %v2347_v23, 7  ;;  %v2356_v63 = vrot.slane %v2347_v23, 1  ;;  %v1999_v56 = vadd.f32 %v1981_v14, %v1957_v6 }
  0xd2   : > { %5492 = vst [vmem:[#allocation37_spill] sm:$0xff] %v4252_v9  ;;  %2004 = vrot.lane.b32.xlu0 %v4252_v9, %s3422_s27  ;;  %v2362_v19 = vrot.slane %v2350_v1, %v3654_v35  ;;  %v2377_v54 = vrot.slane %v2350_v1, %v3657_v36  ;;  %v2354_v29 = vrot.slane %v2348_v22, 7  ;;  %v2357_v16 = vrot.slane %v2348_v22, 1 }
  0xd3   : > { %v2366_v49 = vrot.slane %v2351_v11, %v3654_v35  ;;  %v2381_v0 = vrot.slane %v2351_v11, %v3657_v36  ;;  %v1566_v41 = vmul.f32 %v3876_v45, %v3651_v34  ;;  %v4274_v47 = vadd.f32 %v1999_v56, %v1996_v43 }
  0xd4   : > { %v2371_v7 = vsel %vm1122_vm0, %v2362_v19, %v2353_v13  ;;  %v2386_v6 = vsel %vm1123_vm1, %v2377_v54, %v2356_v63  ;;  %v1569_v61 = vmul.f32 %v3900_v3, %v3660_v37  ;;  %v1958_v3 = vmul.f32 %v3911_v12, %v3651_v34 }
  0xd5   : > { %5493 = vst [vmem:[#allocation38_spill] sm:$0xff] %v4274_v47  ;;  %v2389_v60 = vadd.f32 %v2371_v7, %v2347_v23  ;;  %v2372_v20 = vsel %vm1122_vm0, %v2366_v49, %v2354_v29  ;;  %v2387_v21 = vsel %vm1123_vm1, %v2381_v0, %v2357_v16  ;;  %v1572_v52 = vrot.slane %v1566_v41, 7  ;;  %2007 = vrot.lane.b32.xlu1 %v4274_v47, %s3422_s27 }
  0xd6   : > { %v2390_v45 = vadd.f32 %v2372_v20, %v2348_v22  ;;  %v1575_v2 = vrot.slane %v1566_v41, 1  ;;  %v1587_v39 = vrot.slane %v1569_v61, %v3654_v35  ;;  %v1602_v51 = vrot.slane %v1569_v61, %v3657_v36 }
  0xd7   : > { %v4290_v1 = vadd.f32 %v2389_v60, %v2386_v6  ;;  %v1961_v23 = vmul.f32 %v3924_v25, %v3660_v37  ;;  %v2349_v11 = vmul.f32 %v3987_v55, %v3651_v34  ;;  %v2352_v13 = vmul.f32 %v4000_v18, %v3660_v37 }
  0xd8   : > { %v4298_v14 = vadd.f32 %v2390_v45, %v2387_v21  ;;  %v1590_v22 = vsel %vm1122_vm0, %v1587_v39, %v1572_v52  ;;  %v1605_v43 = vsel %vm1123_vm1, %v1602_v51, %v1575_v2  ;;  %v1964_v63 = vrot.slane %v1958_v3, 7 }
  0xd9   : > { %5494 = vst [vmem:[#allocation39_spill] sm:$0xff] %v4290_v1  ;;  %2395 = vrot.lane.b32.xlu0 %v4290_v1, %s3422_s27  ;;  %v1608_v12 = vadd.f32 %v1590_v22, %v1566_v41  ;;  %v1967_v25 = vrot.slane %v1958_v3, 1  ;;  %v1979_v56 = vrot.slane %v1961_v23, %v3654_v35  ;;  %v1994_v55 = vrot.slane %v1961_v23, %v3657_v36 }
  0xda   : > { %5495 = vst [vmem:[#allocation40_spill] sm:$0xff] %v4298_v14  ;;  %2398 = vrot.lane.b32.xlu1 %v4298_v14, %s3422_s27  ;;  %v2355_v19 = vrot.slane %v2349_v11, 7  ;;  %v2358_v54 = vrot.slane %v2349_v11, 1  ;;  %v2370_v29 = vrot.slane %v2352_v13, %v3654_v35  ;;  %v2385_v49 = vrot.slane %v2352_v13, %v3657_v36 }
  0xdb   : > { %v4313_v16 = vadd.f32 %v1608_v12, %v1605_v43  ;;  %v1982_v18 = vsel %vm1122_vm0, %v1979_v56, %v1964_v63  ;;  %v2741_v0 = vmul.f32 %v4009_v24, %v3665_v40  ;;  %v1997_v41 = vsel %vm1123_vm1, %v1994_v55, %v1967_v25 }
  0xdc   : > { %v2000_v7 = vadd.f32 %v1982_v18, %v1958_v3  ;;  %v2373_v6 = vsel %vm1122_vm0, %v2370_v29, %v2355_v19  ;;  %v2744_v61 = vmul.f32 %v4030_v4, %v3675_v44  ;;  %v2388_v60 = vsel %vm1123_vm1, %v2385_v49, %v2358_v54 }
  0xdd   : > { %5496 = vst [vmem:[#allocation41_spill] sm:$0xff] %v4313_v16  ;;  %1618 = vrot.lane.b32.xlu0 %v4313_v16, %s3422_s27  ;;  %v2391_v20 = vadd.f32 %v2373_v6, %v2349_v11  ;;  %v2747_v21 = vrot.slane %v2741_v0, 7  ;;  %v2750_v52 = vrot.slane %v2741_v0, 1  ;;  %v2742_v2 = vmul.f32 %v4039_v17, %v3686_v48 }
  0xde   : > { %v4330_v40 = vadd.f32 %v2000_v7, %v1997_v41  ;;  %v2756_v24 = vrot.slane %v2744_v61, %v3654_v35  ;;  %v2771_v45 = vrot.slane %v2744_v61, %v3657_v36  ;;  %v2745_v44 = vmul.f32 %v4061_v38, %v3708_v58 }
  0xdf   : > { %v4336_v39 = vadd.f32 %v2391_v20, %v2388_v60  ;;  %v2743_v4 = vmul.f32 %v4108_v50, %v3651_v34  ;;  %v2746_v51 = vmul.f32 %v4125_v28, %v3660_v37  ;;  %v2748_v17 = vrot.slane %v2742_v2, 7 }
  0xe0   : > { %5497 = vst [vmem:[#allocation42_spill] sm:$0xff] %v4330_v40  ;;  %2010 = vrot.lane.b32.xlu1 %v4330_v40, %s3422_s27  ;;  %v2765_v3 = vsel %vm1122_vm0, %v2756_v24, %v2747_v21  ;;  %v2780_v48 = vsel %vm1123_vm1, %v2771_v45, %v2750_v52  ;;  %v2751_v23 = vrot.slane %v2742_v2, 1  ;;  %v2760_v34 = vrot.slane %v2745_v44, %v3654_v35 }
  0xe1   : > { %5498 = vst [vmem:[#allocation43_spill] sm:$0xff] %v4336_v39  ;;  %2401 = vrot.lane.b32.xlu0 %v4336_v39, %s3422_s27  ;;  %v2783_v58 = vadd.f32 %v2765_v3, %v2741_v0  ;;  %v2775_v38 = vrot.slane %v2745_v44, %v3657_v36  ;;  %v2749_v37 = vrot.slane %v2743_v4, 7  ;;  %v2752_v50 = vrot.slane %v2743_v4, 1 }
  0xe2   : > { %v2764_v28 = vrot.slane %v2746_v51, %v3654_v35  ;;  %v2779_v11 = vrot.slane %v2746_v51, %v3657_v36  ;;  %v2766_v43 = vsel %vm1122_vm0, %v2760_v34, %v2748_v17 }
  0xe3   : > { %v4356_v22 = vadd.f32 %v2783_v58, %v2780_v48  ;;  %v2781_v13 = vsel %vm1123_vm1, %v2775_v38, %v2751_v23  ;;  %v2784_v12 = vadd.f32 %v2766_v43, %v2742_v2  ;;  %v5502_v48 = vld [vmem:[#allocation19_spill] sm:$0xff]  ;;  %v5503_v58 = vld [vmem:[#allocation20_spill] sm:$0xff]  ;;  %v5504_v43 = vld [vmem:[#allocation25_spill] sm:$0xff] }
  0xe4   : > { %v2767_v63 = vsel %vm1122_vm0, %v2764_v28, %v2749_v37  ;;  %v2782_v25 = vsel %vm1123_vm1, %v2779_v11, %v2752_v50 }
  0xe5   : > { %5499 = vst [vmem:[#allocation44_spill] sm:$0xff] %v4356_v22  ;;  %2789 = vrot.lane.b32.xlu1 %v4356_v22, %s3422_s27  ;;  %v2785_v35 = vadd.f32 %v2767_v63, %v2743_v4  ;;  %v4368_v36 = vadd.f32 %v2784_v12, %v2781_v13  ;;  %v5505_v63 = vld [vmem:[#allocation26_spill] sm:$0xff] }
  0xe7   : > { %5500 = vst [vmem:[#allocation45_spill] sm:$0xff] %v4368_v36  ;;  %v4370_v56 = vadd.f32 %v2785_v35, %v2782_v25  ;;  %2792 = vrot.lane.b32.xlu0 %v4368_v36, %s3422_s27 }
  0xe9   : > { %5501 = vst [vmem:[#allocation46_spill] sm:$0xff] %v4370_v56  ;;  %2795 = vrot.lane.b32.xlu1 %v4370_v56, %s3422_s27 }
  0xfc   : > { %v1186_v55 = vpop.permute.xlu1 %1185 }
  0xfd   : > { %v1180_v19 = vpop.permute.xlu0 %1179  ;;  %v1187_v29 = vsel %vm1178_vm2, %v1186_v55, %v3734_v5  ;;  %v5506_v55 = vld [vmem:[#allocation15_spill] sm:$0xff] }
  0xfe   : > { %v1181_v33 = vsel %vm1178_vm2, %v1180_v19, %v3744_v10 }
  0xff   : > { %1188 = vrot.lane.b32.xlu0 %v1181_v33, %s3422_s27 }
 0x100   : > { %v1403_v54 = vpop.permute.xlu1 %1402 }
 0x101   : > { %v1183_v18 = vpop.permute.xlu0 %1182  ;;  %v1404_v41 = vsel %vm1178_vm2, %v1403_v54, %v3755_v15 }
 0x102   : > { %v1184_v49 = vsel %vm1178_vm2, %v1183_v18, %v3777_v27 }
 0x103   : > { %1190 = vrot.lane.b32.xlu1 %v1184_v49, %s3422_s27  ;;  %1192 = vrot.lane.b32.xlu0 %v1187_v29, %s3422_s27  ;;  %v5507_v29 = vld [vmem:[#allocation28_spill] sm:$0xff]  ;;  %v5508_v49 = vld [vmem:[#allocation17_spill] sm:$0xff] }
 0x104   : > { %v1795_v0 = vpop.permute.xlu1 %1794 }
 0x105   : > { %v1406_v7 = vpop.permute.xlu0 %1405  ;;  %v1796_v60 = vsel %vm1178_vm2, %v1795_v0, %v3787_v31 }
 0x106   : > { %v1407_v6 = vsel %vm1178_vm2, %v1406_v7, %v3813_v57  ;;  %v5509_v7 = vld [vmem:[#allocation16_spill] sm:$0xff] }
 0x107   : > { %1411 = vrot.lane.b32.xlu1 %v1404_v41, %s3422_s27  ;;  %1413 = vrot.lane.b32.xlu0 %v1407_v6, %s3422_s27 }
 0x108   : > { %v1286_v61 = vpop.permute.xlu1 %1285 }
 0x109   : > { %v1289_v20 = vpop.permute.xlu0 %1288  ;;  %v1287_v19 = vsel %vm1178_vm2, %v1286_v61, %v5506_v55  ;;  %v5510_v61 = vld [vmem:[#allocation18_spill] sm:$0xff] }
 0x10a   : > { %v1290_v6 = vsel %vm1178_vm2, %v1289_v20, %v5509_v7  ;;  %v5513_v20 = vld [vmem:[#allocation23_spill] sm:$0xff] }
 0x10b   : > { %1803 = vrot.lane.b32.xlu1 %v1796_v60, %s3422_s27 }
 0x10c   : > { %v2186_v21 = vpop.permute.xlu1 %2185 }
 0x10d   : > { %v1798_v52 = vpop.permute.xlu0 %1797  ;;  %v2187_v24 = vsel %vm1178_vm2, %v2186_v21, %v3878_v46 }
 0x10e   : > { %v1799_v45 = vsel %vm1178_vm2, %v1798_v52, %v3883_v53 }
 0x10f   : > { %1805 = vrot.lane.b32.xlu0 %v1799_v45, %s3422_s27  ;;  %2194 = vrot.lane.b32.xlu1 %v2187_v24, %s3422_s27  ;;  %v5511_v24 = vld [vmem:[#allocation21_spill] sm:$0xff] }
 0x111   : > { %v1292_v2 = vpop.permute.xlu1 %1291 }
 0x112   : > { %v2189_v44 = vpop.permute.xlu0 %2188  ;;  %v1293_v0 = vsel %vm1178_vm2, %v1292_v2, %v5508_v49  ;;  %v5512_v2 = vld [vmem:[#allocation22_spill] sm:$0xff] }
 0x113   : > { %v2190_v4 = vsel %vm1178_vm2, %v2189_v44, %v3926_v26 }
 0x114   : > { %2196 = vrot.lane.b32.xlu0 %v2190_v4, %s3422_s27 }
 0x115   : > { %v1505_v51 = vpop.permute.xlu1 %1504 }
 0x116   : > { %v1409_v3 = vpop.permute.xlu0 %1408  ;;  %v1506_v21 = vsel %vm1178_vm2, %v1505_v51, %v5510_v61  ;;  %v5514_v51 = vld [vmem:[#allocation24_spill] sm:$0xff] }
 0x117   : > { %v1410_v17 = vsel %vm1178_vm2, %v1409_v3, %v5502_v48 }
 0x118   : > { %1415 = vrot.lane.b32.xlu0 %v1410_v17, %s3422_s27 }
 0x119   : > { %v1801_v23 = vpop.permute.xlu1 %1800 }
 0x11a   : > { %v1802_v34 = vsel %vm1178_vm2, %v1801_v23, %v5503_v58 }
 0x11b   : > { %1807 = vrot.lane.b32.xlu1 %v1802_v34, %s3422_s27 }
 0x11c   : > { %v1508_v38 = vpop.permute.xlu0 %1507 }
 0x11d   : > { %v1900_v37 = vpop.permute.xlu1 %1899  ;;  %v1509_v45 = vsel %vm1178_vm2, %v1508_v38, %v5511_v24  ;;  %v5515_v38 = vld [vmem:[#allocation29_spill] sm:$0xff] }
 0x11e   : > { %v1901_v44 = vsel %vm1178_vm2, %v1900_v37, %v5512_v2 }
 0x121   : > { %v1897_v50 = vpop.permute.xlu0 %1896 }
 0x122   : > { %v1898_v3 = vsel %vm1178_vm2, %v1897_v50, %v5513_v20  ;;  %v5517_v50 = vld [vmem:[#allocation30_spill] sm:$0xff] }
 0x123   : > { %v2288_v28 = vpop.permute.xlu1 %2287 }
 0x124   : > { %v2289_v23 = vsel %vm1178_vm2, %v2288_v28, %v5514_v51 }
 0x125   : > { %v2192_v11 = vpop.permute.xlu0 %2191 }
 0x126   : > { %v2193_v13 = vsel %vm1178_vm2, %v2192_v11, %v5504_v43 }
 0x127   : > { %v2580_v12 = vpop.permute.xlu1 %2579  ;;  %2198 = vrot.lane.b32.xlu0 %v2193_v13, %s3422_s27  ;;  %v5516_v13 = vld [vmem:[#allocation27_spill] sm:$0xff] }
 0x128   : > { %v2581_v25 = vsel %vm1178_vm2, %v2580_v12, %v5505_v63 }
 0x129   : > { %2588 = vrot.lane.b32.xlu1 %v2581_v25, %s3422_s27 }
 0x12a   : > { %v2291_v35 = vpop.permute.xlu0 %2290 }
 0x12b   : > { %v2292_v37 = vsel %vm1178_vm2, %v2291_v35, %v5516_v13 }
 0x12d   : > { %1294 = vrot.lane.b32.xlu1 %v1287_v19, %s3422_s27  ;;  %v5518_v19 = vld [vmem:[#allocation31_spill] sm:$0xff] }
 0x12e   : > { %v2583_v33 = vpop.permute.xlu0 %2582  ;;  %v1511_v54 = vpop.permute.xlu1 %1510 }
 0x12f   : > { %v2584_v18 = vsel %vm1178_vm2, %v2583_v33, %v5507_v29  ;;  %v1512_v11 = vsel %vm1178_vm2, %v1511_v54, %v5515_v38 }
 0x130   : > { %2590 = vrot.lane.b32.xlu0 %v2584_v18, %s3422_s27 }
 0x131   : > { %1298 = vrot.lane.b32.xlu1 %v1293_v0, %s3422_s27 }
 0x132   : > { %v1903_v41 = vpop.permute.xlu0 %1902 }
 0x133   : > { %v1904_v25 = vsel %vm1178_vm2, %v1903_v41, %v5517_v50 }
 0x134   : > { %v2294_v60 = vpop.permute.xlu1 %2293  ;;  %1296 = vrot.lane.b32.xlu0 %v1290_v6, %s3422_s27 }
 0x135   : > { %1513 = vrot.lane.b32.xlu1 %v1506_v21, %s3422_s27  ;;  %v2295_v28 = vsel %vm1178_vm2, %v2294_v60, %v5518_v19 }
 0x136   : > { %v2586_v52 = vpop.permute.xlu0 %2585 }
 0x137   : > { %v2587_v54 = vsel %vm1178_vm2, %v2586_v52, %v4168_v30 }
 0x138   : > { %1515 = vrot.lane.b32.xlu0 %v1509_v45, %s3422_s27  ;;  %v2682_v4 = vpop.permute.xlu1 %2681 }
 0x139   : > { %1907 = vrot.lane.b32.xlu1 %v1901_v44, %s3422_s27  ;;  %v2683_v35 = vsel %vm1178_vm2, %v2682_v4, %v4190_v8 }
 0x13b   : > { %v2685_v17 = vpop.permute.xlu0 %2684 }
 0x13c   : > { %1905 = vrot.lane.b32.xlu0 %v1898_v3, %s3422_s27  ;;  %v2688_v34 = vpop.permute.xlu1 %2687  ;;  %v2686_v41 = vsel %vm1178_vm2, %v2685_v17, %v4206_v42 }
 0x13d   : > { %2296 = vrot.lane.b32.xlu1 %v2289_v23, %s3422_s27  ;;  %v2689_v6 = vsel %vm1178_vm2, %v2688_v34, %v4214_v59 }
 0x140   : > { %2298 = vrot.lane.b32.xlu0 %v2292_v37, %s3422_s27  ;;  %v1613_v12 = vpop.permute.xlu0 %1612 }
 0x141   : > { %1517 = vrot.lane.b32.xlu1 %v1512_v11, %s3422_s27  ;;  %v1614_v21 = vsel %vm1178_vm2, %v1613_v12, %v4229_v32 }
 0x142   : > { %v1616_v33 = vpop.permute.xlu1 %1615 }
 0x143   : > { %v1617_v45 = vsel %vm1178_vm2, %v1616_v33, %v4246_v62 }
 0x144   : > { %1909 = vrot.lane.b32.xlu0 %v1904_v25, %s3422_s27  ;;  %v2005_v18 = vpop.permute.xlu0 %2004 }
 0x145   : > { %2300 = vrot.lane.b32.xlu1 %v2295_v28, %s3422_s27  ;;  %v2006_v44 = vsel %vm1178_vm2, %v2005_v18, %v4252_v9 }
 0x147   : > { %v2008_v0 = vpop.permute.xlu1 %2007 }
 0x148   : > { %2592 = vrot.lane.b32.xlu0 %v2587_v54, %s3422_s27  ;;  %v2009_v4 = vsel %vm1178_vm2, %v2008_v0, %v4274_v47 }
 0x149   : > { %2690 = vrot.lane.b32.xlu1 %v2683_v35, %s3422_s27 }
 0x14b   : > { %v2396_v60 = vpop.permute.xlu0 %2395 }
 0x14c   : > { %2692 = vrot.lane.b32.xlu0 %v2686_v41, %s3422_s27  ;;  %v2399_v52 = vpop.permute.xlu1 %2398  ;;  %v2397_v23 = vsel %vm1178_vm2, %v2396_v60, %v4290_v1 }
 0x14d   : > { %2694 = vrot.lane.b32.xlu1 %v2689_v6, %s3422_s27  ;;  %v2400_v34 = vsel %vm1178_vm2, %v2399_v52, %v4298_v14 }
 0x14f   : > { %v1619_v3 = vpop.permute.xlu0 %1618 }
 0x150   : > { %1621 = vrot.lane.b32.xlu0 %v1614_v21, %s3422_s27  ;;  %v1620_v37 = vsel %vm1178_vm2, %v1619_v3, %v4313_v16 }
 0x151   : > { %1623 = vrot.lane.b32.xlu1 %v1617_v45, %s3422_s27 }
 0x152   : > { %v2011_v17 = vpop.permute.xlu1 %2010 }
 0x153   : > { %v2402_v11 = vpop.permute.xlu0 %2401  ;;  %v2012_v25 = vsel %vm1178_vm2, %v2011_v17, %v4330_v40 }
 0x154   : > { %2013 = vrot.lane.b32.xlu0 %v2006_v44, %s3422_s27  ;;  %v2403_v28 = vsel %vm1178_vm2, %v2402_v11, %v4336_v39 }
 0x155   : > { %2015 = vrot.lane.b32.xlu1 %v2009_v4, %s3422_s27 }
 0x157   : > { %v2790_v12 = vpop.permute.xlu1 %2789 }
 0x158   : > { %2404 = vrot.lane.b32.xlu0 %v2397_v23, %s3422_s27  ;;  %v2791_v54 = vsel %vm1178_vm2, %v2790_v12, %v4356_v22 }
 0x159   : > { %2406 = vrot.lane.b32.xlu1 %v2400_v34, %s3422_s27  ;;  %v2793_v33 = vpop.permute.xlu0 %2792 }
 0x15a   : > { %v2794_v18 = vsel %vm1178_vm2, %v2793_v33, %v4368_v36 }
 0x15b   : > { %v2796_v35 = vpop.permute.xlu1 %2795 }
 0x15c   : > { %1625 = vrot.lane.b32.xlu0 %v1620_v37, %s3422_s27  ;;  %v2797_v0 = vsel %vm1178_vm2, %v2796_v35, %v4370_v56 }
 0x15d   : > { %2017 = vrot.lane.b32.xlu1 %v2012_v25, %s3422_s27 }
 0x160   : > { %2408 = vrot.lane.b32.xlu0 %v2403_v28, %s3422_s27 }
 0x161   : > { %2798 = vrot.lane.b32.xlu1 %v2791_v54, %s3422_s27 }
 0x164   : > { %2800 = vrot.lane.b32.xlu0 %v2794_v18, %s3422_s27 }
 0x165   : > { %2802 = vrot.lane.b32.xlu1 %v2797_v0, %s3422_s27 }
 0x171   : > { %v1189_v41 = vpop.permute.xlu0 %1188 }
 0x172   : > { %v1194_v6 = vsel %vm1178_vm2, %v1189_v41, %v3744_v10 }
 0x173   : > { %1202 = vrot.lane.b32.xlu0 %v1194_v6, %s3423_s13 }
 0x175   : > { %v1191_v60 = vpop.permute.xlu1 %1190  ;;  %v1193_v21 = vpop.permute.xlu0 %1192 }
 0x176   : > { %v1195_v52 = vsel %vm1178_vm2, %v1191_v60, %v3777_v27  ;;  %v1196_v45 = vsel %vm1178_vm2, %v1193_v21, %v3734_v5 }
 0x177   : > { %1204 = vrot.lane.b32.xlu1 %v1195_v52, %s3423_s13  ;;  %1211 = vrot.lane.b32.xlu0 %v1194_v6, %s3424_s16 }
 0x179   : > { %v1412_v44 = vpop.permute.xlu1 %1411  ;;  %v1414_v3 = vpop.permute.xlu0 %1413 }
 0x17a   : > { %v1417_v4 = vsel %vm1178_vm2, %v1412_v44, %v3755_v15  ;;  %v1418_v17 = vsel %vm1178_vm2, %v1414_v3, %v3813_v57 }
 0x17b   : > { %1213 = vrot.lane.b32.xlu1 %v1195_v52, %s3424_s16  ;;  %1206 = vrot.lane.b32.xlu0 %v1196_v45, %s3423_s13 }
 0x17d   : > { %v1804_v23 = vpop.permute.xlu1 %1803 }
 0x17e   : > { %v1809_v34 = vsel %vm1178_vm2, %v1804_v23, %v3787_v31 }
 0x17f   : > { %1215 = vrot.lane.b32.xlu1 %v1196_v45, %s3424_s16  ;;  %1423 = vrot.lane.b32.xlu0 %v1417_v4, %s3423_s13 }
 0x181   : > { %v1806_v11 = vpop.permute.xlu0 %1805  ;;  %v2195_v12 = vpop.permute.xlu1 %2194 }
 0x182   : > { %v1810_v37 = vsel %vm1178_vm2, %v1806_v11, %v3883_v53  ;;  %v2200_v28 = vsel %vm1178_vm2, %v2195_v12, %v3878_v46 }
 0x183   : > { %1432 = vrot.lane.b32.xlu0 %v1417_v4, %s3424_s16  ;;  %1425 = vrot.lane.b32.xlu1 %v1418_v17, %s3423_s13 }
 0x186   : > { %v2197_v25 = vpop.permute.xlu0 %2196 }
 0x187   : > { %1815 = vrot.lane.b32.xlu0 %v1809_v34, %s3423_s13  ;;  %1434 = vrot.lane.b32.xlu1 %v1418_v17, %s3424_s16  ;;  %v2201_v33 = vsel %vm1178_vm2, %v2197_v25, %v3926_v26 }
 0x18a   : > { %v1416_v54 = vpop.permute.xlu0 %1415 }
 0x18b   : > { %1824 = vrot.lane.b32.xlu0 %v1809_v34, %s3424_s16  ;;  %1817 = vrot.lane.b32.xlu1 %v1810_v37, %s3423_s13  ;;  %v1419_v18 = vsel %vm1178_vm2, %v1416_v54, %v5502_v48 }
 0x18d   : > { %v1808_v35 = vpop.permute.xlu1 %1807 }
 0x18e   : > { %v1811_v0 = vsel %vm1178_vm2, %v1808_v35, %v5503_v58 }
 0x18f   : > { %2206 = vrot.lane.b32.xlu0 %v2200_v28, %s3423_s13  ;;  %1826 = vrot.lane.b32.xlu1 %v1810_v37, %s3424_s16 }
 0x193   : > { %2215 = vrot.lane.b32.xlu0 %v2200_v28, %s3424_s16  ;;  %2208 = vrot.lane.b32.xlu1 %v2201_v33, %s3423_s13 }
 0x197   : > { %2217 = vrot.lane.b32.xlu1 %v2201_v33, %s3424_s16  ;;  %1427 = vrot.lane.b32.xlu0 %v1419_v18, %s3423_s13 }
 0x199   : > { %v2199_v6 = vpop.permute.xlu0 %2198 }
 0x19a   : > { %v2202_v60 = vsel %vm1178_vm2, %v2199_v6, %v5504_v43 }
 0x19b   : > { %v2589_v41 = vpop.permute.xlu1 %2588  ;;  %1436 = vrot.lane.b32.xlu1 %v1419_v18, %s3424_s16  ;;  %1819 = vrot.lane.b32.xlu0 %v1811_v0, %s3423_s13 }
 0x19f   : > { %v1295_v21 = vpop.permute.xlu1 %1294  ;;  %1828 = vrot.lane.b32.xlu1 %v1811_v0, %s3424_s16  ;;  %2210 = vrot.lane.b32.xlu0 %v2202_v60, %s3423_s13 }
 0x1a0   : > { %v1300_v52 = vsel %vm1178_vm2, %v1295_v21, %v5506_v55 }
 0x1a2   : > { %v2591_v45 = vpop.permute.xlu0 %2590 }
 0x1a3   : > { %v1299_v44 = vpop.permute.xlu1 %1298  ;;  %2219 = vrot.lane.b32.xlu1 %v2202_v60, %s3424_s16  ;;  %1306 = vrot.lane.b32.xlu0 %v1300_v52, %s3423_s13 }
 0x1a4   : > { %v1302_v23 = vsel %vm1178_vm2, %v1299_v44, %v5508_v49 }
 0x1a6   : > { %v1297_v4 = vpop.permute.xlu0 %1296 }
 0x1a7   : > { %v1301_v3 = vsel %vm1178_vm2, %v1297_v4, %v5509_v7  ;;  %v1514_v17 = vpop.permute.xlu1 %1513  ;;  %1315 = vrot.lane.b32.xlu0 %v1300_v52, %s3424_s16 }
 0x1a8   : > { %1308 = vrot.lane.b32.xlu1 %v1301_v3, %s3423_s13  ;;  %v1519_v37 = vsel %vm1178_vm2, %v1514_v17, %v5510_v61 }
 0x1aa   : > { %v1516_v34 = vpop.permute.xlu0 %1515 }
 0x1ab   : > { %v1908_v11 = vpop.permute.xlu1 %1907  ;;  %1310 = vrot.lane.b32.xlu0 %v1302_v23, %s3423_s13  ;;  %v1520_v33 = vsel %vm1178_vm2, %v1516_v34, %v5511_v24  ;;  %v2594_v34 = vsel %vm1178_vm2, %v2589_v41, %v5505_v63 }
 0x1ac   : > { %1317 = vrot.lane.b32.xlu1 %v1301_v3, %s3424_s16  ;;  %v1912_v60 = vsel %vm1178_vm2, %v1908_v11, %v5512_v2 }
 0x1ae   : > { %v1906_v12 = vpop.permute.xlu0 %1905 }
 0x1af   : > { %v2297_v25 = vpop.permute.xlu1 %2296  ;;  %1525 = vrot.lane.b32.xlu0 %v1519_v37, %s3423_s13  ;;  %v1911_v35 = vsel %vm1178_vm2, %v1906_v12, %v5513_v20 }
 0x1b0   : > { %1319 = vrot.lane.b32.xlu1 %v1302_v23, %s3424_s16  ;;  %v2302_v52 = vsel %vm1178_vm2, %v2297_v25, %v5514_v51 }
 0x1b2   : > { %v2299_v28 = vpop.permute.xlu0 %2298 }
 0x1b3   : > { %1534 = vrot.lane.b32.xlu0 %v1519_v37, %s3424_s16  ;;  %v1518_v54 = vpop.permute.xlu1 %1517  ;;  %v2303_v17 = vsel %vm1178_vm2, %v2299_v28, %v5516_v13  ;;  %v2595_v37 = vsel %vm1178_vm2, %v2591_v45, %v5507_v29 }
 0x1b4   : > { %1527 = vrot.lane.b32.xlu1 %v1520_v33, %s3423_s13  ;;  %v1521_v28 = vsel %vm1178_vm2, %v1518_v54, %v5515_v38 }
 0x1b6   : > { %v1910_v18 = vpop.permute.xlu0 %1909 }
 0x1b7   : > { %1917 = vrot.lane.b32.xlu0 %v1911_v35, %s3423_s13  ;;  %v2301_v0 = vpop.permute.xlu1 %2300  ;;  %v1913_v45 = vsel %vm1178_vm2, %v1910_v18, %v5517_v50 }
 0x1b8   : > { %1536 = vrot.lane.b32.xlu1 %v1520_v33, %s3424_s16 }
 0x1ba   : > { %v2593_v6 = vpop.permute.xlu0 %2592 }
 0x1bb   : > { %1926 = vrot.lane.b32.xlu0 %v1911_v35, %s3424_s16  ;;  %v2691_v21 = vpop.permute.xlu1 %2690  ;;  %v2304_v35 = vsel %vm1178_vm2, %v2301_v0, %v5518_v19  ;;  %v2596_v18 = vsel %vm1178_vm2, %v2593_v6, %v4168_v30 }
 0x1bc   : > { %1919 = vrot.lane.b32.xlu1 %v1912_v60, %s3423_s13  ;;  %v2696_v0 = vsel %vm1178_vm2, %v2691_v21, %v4190_v8 }
 0x1be   : > { %v2693_v44 = vpop.permute.xlu0 %2692 }
 0x1bf   : > { %2308 = vrot.lane.b32.xlu0 %v2302_v52, %s3423_s13  ;;  %v2695_v4 = vpop.permute.xlu1 %2694  ;;  %v2697_v6 = vsel %vm1178_vm2, %v2693_v44, %v4206_v42 }
 0x1c0   : > { %1928 = vrot.lane.b32.xlu1 %v1912_v60, %s3424_s16  ;;  %v2698_v21 = vsel %vm1178_vm2, %v2695_v4, %v4214_v59 }
 0x1c2   : > { %v1622_v3 = vpop.permute.xlu0 %1621 }
 0x1c3   : > { %2317 = vrot.lane.b32.xlu0 %v2302_v52, %s3424_s16  ;;  %v1624_v23 = vpop.permute.xlu1 %1623 }
 0x1c4   : > { %2310 = vrot.lane.b32.xlu1 %v2303_v17, %s3423_s13 }
 0x1c6   : > { %v2014_v11 = vpop.permute.xlu0 %2013 }
 0x1c7   : > { %2600 = vrot.lane.b32.xlu0 %v2594_v34, %s3423_s13  ;;  %v4592_v12 = vpop.permute.xlu1 %2015 }
 0x1c8   : > { %2319 = vrot.lane.b32.xlu1 %v2303_v17, %s3424_s16 }
 0x1ca   : > { %v4595_v25 = vpop.permute.xlu0 %2404 }
 0x1cb   : > { %2609 = vrot.lane.b32.xlu0 %v2594_v34, %s3424_s16  ;;  %v4601_v41 = vpop.permute.xlu1 %2406  ;;  %v5519_v34 = vlaneseq }
 0x1cc   : > { %2602 = vrot.lane.b32.xlu1 %v2595_v37, %s3423_s13 }
 0x1ce   : > { %v4606_v33 = vpop.permute.xlu0 %1625 }
 0x1cf   : > { %1529 = vrot.lane.b32.xlu0 %v1521_v28, %s3423_s13  ;;  %v4612_v54 = vpop.permute.xlu1 %2017 }
 0x1d0   : > { %2611 = vrot.lane.b32.xlu1 %v2595_v37, %s3424_s16  ;;  %v4630_v37 = vand.u32 127, %v5519_v34 }
 0x1d2   : > { %v4615_v60 = vpop.permute.xlu0 %2408  ;;  %vm1124_vm3 = vcmp.eq.s32.totalorder %v4630_v37, 0  ;;  %vm1125_vm4 = vcmp.eq.s32.totalorder %v4630_v37, 15 }
 0x1d3   : > { %1921 = vrot.lane.b32.xlu0 %v1913_v45, %s3423_s13  ;;  %v4621_v52 = vpop.permute.xlu1 %2798 }
 0x1d4   : > { %1538 = vrot.lane.b32.xlu1 %v1521_v28, %s3424_s16 }
 0x1d6   : > { %v4626_v17 = vpop.permute.xlu0 %2800 }
 0x1d7   : > { %2312 = vrot.lane.b32.xlu0 %v2304_v35, %s3423_s13  ;;  %v4635_v28 = vpop.permute.xlu1 %2802 }
 0x1d8   : > { %1930 = vrot.lane.b32.xlu1 %v1913_v45, %s3424_s16 }
 0x1db   : > { %2604 = vrot.lane.b32.xlu0 %v2596_v18, %s3423_s13 }
 0x1dc   : > { %2321 = vrot.lane.b32.xlu1 %v2304_v35, %s3424_s16 }
 0x1df   : > { %2702 = vrot.lane.b32.xlu0 %v2696_v0, %s3423_s13 }
 0x1e0   : > { %2613 = vrot.lane.b32.xlu1 %v2596_v18, %s3424_s16  ;;  %v1627_v18 = vsel %vm1178_vm2, %v1622_v3, %v4229_v32  ;;  %v1628_v32 = vsel %vm1178_vm2, %v1624_v23, %v4246_v62 }
 0x1e3   : > { %2711 = vrot.lane.b32.xlu0 %v2696_v0, %s3424_s16 }
 0x1e4   : > { %2704 = vrot.lane.b32.xlu1 %v2697_v6, %s3423_s13 }
 0x1e5   : > { %v1203_v45 = vpop.permute.xlu0 %1202 }
 0x1e7   : > { %2706 = vrot.lane.b32.xlu0 %v2698_v21, %s3423_s13 }
 0x1e8   : > { %2713 = vrot.lane.b32.xlu1 %v2697_v6, %s3424_s16 }
 0x1e9   : > { %v1205_v35 = vpop.permute.xlu1 %1204  ;;  %v1212_v44 = vpop.permute.xlu0 %1211 }
 0x1ea   : > { %v1220_v0 = vsel %vm1124_vm3, %v1203_v45, %v1212_v44  ;;  %v1225_v34 = vsel %vm1125_vm4, %v1212_v44, %v1203_v45 }
 0x1eb   : > { %v1228_v4 = vadd.f32 %v1220_v0, %v3744_v10  ;;  %1633 = vrot.lane.b32.xlu0 %v1627_v18, %s3423_s13  ;;  %v2019_v0 = vsel %vm1178_vm2, %v2014_v11, %v4252_v9 }
 0x1ec   : > { %2715 = vrot.lane.b32.xlu1 %v2698_v21, %s3424_s16 }
 0x1ed   : > { %v1231_v59 = vadd.f32 %v1228_v4, %v1225_v34  ;;  %v1214_v42 = vpop.permute.xlu1 %1213  ;;  %v1207_v6 = vpop.permute.xlu0 %1206 }
 0x1ee   : > { %v1221_v8 = vsel %vm1124_vm3, %v1205_v35, %v1214_v42  ;;  %v1226_v3 = vsel %vm1125_vm4, %v1214_v42, %v1205_v35 }
 0x1ef   : > { %v1229_v45 = vadd.f32 %v1221_v8, %v3777_v27  ;;  %1642 = vrot.lane.b32.xlu0 %v1627_v18, %s3424_s16  ;;  %v4670_v27 = vmul.f32 0.11111111, %v1231_v59 }
 0x1f0   : > { %1635 = vrot.lane.b32.xlu1 %v1628_v32, %s3423_s13 }
 0x1f1   : > { %v1232_v10 = vadd.f32 %v1229_v45, %v1226_v3  ;;  %v1216_v21 = vpop.permute.xlu1 %1215  ;;  %v1424_v44 = vpop.permute.xlu0 %1423 }
 0x1f2   : > { %v1222_v34 = vsel %vm1124_vm3, %v1207_v6, %v1216_v21  ;;  %v1227_v42 = vsel %vm1125_vm4, %v1216_v21, %v1207_v6 }
 0x1f3   : > { %v1230_v23 = vadd.f32 %v1222_v34, %v3734_v5  ;;  %2025 = vrot.lane.b32.xlu0 %v2019_v0, %s3423_s13  ;;  %v2020_v5 = vsel %vm1178_vm2, %v4592_v12, %v4274_v47  ;;  %v4684_v59 = vmul.f32 0.11111111, %v1232_v10  ;;  %v4699_v10 = vmul.f32 2.0, %v4670_v27 }
 0x1f4   : > { %1644 = vrot.lane.b32.xlu1 %v1628_v32, %s3424_s16  ;;  %v4689_v32 = vmul.f32 %v4670_v27, %v4670_v27 }
 0x1f5   : > { %v4673_v8 = vadd.f32 %v1230_v23, %v1227_v42  ;;  %v1426_v35 = vpop.permute.xlu1 %1425  ;;  %v1433_v18 = vpop.permute.xlu0 %1432 }
 0x1f6   : > { %v1441_v11 = vsel %vm1124_vm3, %v1424_v44, %v1433_v18  ;;  %v1444_v4 = vsel %vm1125_vm4, %v1433_v18, %v1424_v44  ;;  %v2410_v44 = vsel %vm1178_vm2, %v4595_v25, %v4290_v1  ;;  %v4705_v42 = vadd.f32 0.0001, %v4689_v32 }
 0x1f7   : > { %v1447_v6 = vadd.f32 %v1441_v11, %v3755_v15  ;;  %2034 = vrot.lane.b32.xlu0 %v2019_v0, %s3424_s16  ;;  %v4709_v25 = vmul.f32 %v4684_v59, %v4684_v59 }
 0x1f8   : > { %2027 = vrot.lane.b32.xlu1 %v2020_v5, %s3423_s13 }
 0x1f9   : > { %v1450_v3 = vadd.f32 %v1447_v6, %v1444_v4  ;;  %v1435_v45 = vpop.permute.xlu1 %1434  ;;  %v1816_v21 = vpop.permute.xlu0 %1815 }
 0x1fa   : > { %v1442_v15 = vsel %vm1124_vm3, %v1426_v35, %v1435_v45  ;;  %v1445_v12 = vsel %vm1125_vm4, %v1435_v45, %v1426_v35  ;;  %v4727_v45 = vmul.f32 2.0, %v4684_v59 }
 0x1fb   : > { %v1453_v0 = vmul.f32 0.11111111, %v1450_v3  ;;  %v1448_v34 = vadd.f32 %v1442_v15, %v3813_v57  ;;  %2416 = vrot.lane.b32.xlu0 %v2410_v44, %s3423_s13 }
 0x1fc   : > { %2036 = vrot.lane.b32.xlu1 %v2020_v5, %s3424_s16  ;;  %v2411_v5 = vsel %vm1178_vm2, %v4601_v41, %v4298_v14  ;;  %v4737_v41 = vadd.f32 0.0001, %v4709_v25 }
 0x1fd   : > { %v4712_v23 = vmul.f32 %v1453_v0, %v4699_v10  ;;  %v1451_v35 = vadd.f32 %v1448_v34, %v1445_v12  ;;  %v1818_v18 = vpop.permute.xlu1 %1817  ;;  %v1825_v11 = vpop.permute.xlu0 %1824  ;;  %v4714_v4 = vmul.f32 %v1453_v0, %v1453_v0  ;;  %v4717_v57 = vmul.f32 %v1453_v0, %v4670_v27 }
 0x1fe   : > { %v1833_v6 = vsel %vm1124_vm3, %v1816_v21, %v1825_v11  ;;  %v1836_v3 = vsel %vm1125_vm4, %v1825_v11, %v1816_v21 }
 0x1ff   : > { %5520 = vst [vmem:[#allocation19_spill] sm:$0xff] %v4717_v57  ;;  %v1454_v15 = vmul.f32 0.11111111, %v1451_v35  ;;  %v1839_v12 = vadd.f32 %v1833_v6, %v3787_v31  ;;  %2425 = vrot.lane.b32.xlu0 %v2410_v44, %s3424_s16  ;;  %v4733_v0 = vadd.f32 %v4714_v4, %v4705_v42  ;;  %v1629_v44 = vsel %vm1178_vm2, %v4606_v33, %v4313_v16 }
 0x200   : > { %2418 = vrot.lane.b32.xlu1 %v2411_v5, %s3423_s13 }
 0x201   : > { %v4740_v34 = vmul.f32 %v1454_v15, %v4727_v45  ;;  %v1842_v21 = vadd.f32 %v1839_v12, %v1836_v3  ;;  %v1827_v11 = vpop.permute.xlu1 %1826  ;;  %v2207_v14 = vpop.permute.xlu0 %2206  ;;  %v4742_v35 = vmul.f32 %v1454_v15, %v1454_v15  ;;  %v4745_v31 = vmul.f32 %v1454_v15, %v4684_v59 }
 0x202   : > { %v1834_v6 = vsel %vm1124_vm3, %v1818_v18, %v1827_v11  ;;  %v1837_v1 = vsel %vm1125_vm4, %v1827_v11, %v1818_v18 }
 0x203   : > { %5521 = vst [vmem:[#allocation20_spill] sm:$0xff] %v4745_v31  ;;  %v1845_v47 = vmul.f32 0.11111111, %v1842_v21  ;;  %v1840_v3 = vadd.f32 %v1834_v6, %v3883_v53  ;;  %1637 = vrot.lane.b32.xlu0 %v1629_v44, %s3423_s13  ;;  %v4758_v12 = vadd.f32 %v4742_v35, %v4737_v41  ;;  %v2021_v53 = vsel %vm1178_vm2, %v4612_v54, %v4330_v40 }
 0x204   : > { %2427 = vrot.lane.b32.xlu1 %v2411_v5, %s3424_s16 }
 0x205   : > { %v4762_v15 = vmul.f32 %v1845_v47, %v4699_v10  ;;  %v1843_v33 = vadd.f32 %v1840_v3, %v1837_v1  ;;  %v2209_v16 = vpop.permute.xlu1 %2208  ;;  %v2216_v31 = vpop.permute.xlu0 %2215  ;;  %v4764_v9 = vmul.f32 %v1845_v47, %v1845_v47  ;;  %v4767_v18 = vmul.f32 %v1845_v47, %v4670_v27 }
 0x206   : > { %v2224_v21 = vsel %vm1124_vm3, %v2207_v14, %v2216_v31  ;;  %v2227_v5 = vsel %vm1125_vm4, %v2216_v31, %v2207_v14 }
 0x207   : > { %5522 = vst [vmem:[#allocation25_spill] sm:$0xff] %v4767_v18  ;;  %v1846_v11 = vmul.f32 0.11111111, %v1843_v33  ;;  %v2230_v1 = vadd.f32 %v2224_v21, %v3878_v46  ;;  %2029 = vrot.lane.b32.xlu0 %v2021_v53, %s3423_s13  ;;  %v4780_v6 = vadd.f32 %v4764_v9, %v4705_v42  ;;  %v2412_v46 = vsel %vm1178_vm2, %v4615_v60, %v4336_v39 }
 0x208   : > { %1646 = vrot.lane.b32.xlu1 %v1629_v44, %s3424_s16 }
 0x209   : > { %v4784_v47 = vmul.f32 %v1846_v11, %v4727_v45  ;;  %v2233_v54 = vadd.f32 %v2230_v1, %v2227_v5  ;;  %v2218_v3 = vpop.permute.xlu1 %2217  ;;  %v1428_v40 = vpop.permute.xlu0 %1427  ;;  %v4786_v18 = vmul.f32 %v1846_v11, %v1846_v11  ;;  %v4789_v14 = vmul.f32 %v1846_v11, %v4684_v59 }
 0x20a   : > { %v2225_v31 = vsel %vm1124_vm3, %v2209_v16, %v2218_v3  ;;  %v2228_v44 = vsel %vm1125_vm4, %v2218_v3, %v2209_v16  ;;  %v4805_v11 = vmul.f32 0.11111111, %v4673_v8  ;;  %v2804_v3 = vsel %vm1178_vm2, %v4621_v52, %v4356_v22 }
 0x20b   : > { %5523 = vst [vmem:[#allocation26_spill] sm:$0xff] %v4789_v14  ;;  %v2236_v33 = vmul.f32 0.11111111, %v2233_v54  ;;  %v2231_v21 = vadd.f32 %v2225_v31, %v3926_v26  ;;  %2420 = vrot.lane.b32.xlu0 %v2412_v46, %s3423_s13  ;;  %v4802_v5 = vadd.f32 %v4786_v18, %v4737_v41 }
 0x20c   : > { %5524 = vst [vmem:[#allocation15_spill] sm:$0xff] %v4805_v11  ;;  %2038 = vrot.lane.b32.xlu1 %v2021_v53, %s3424_s16  ;;  %v4832_v52 = vmul.f32 %v4805_v11, %v4805_v11  ;;  %v4850_v14 = vmul.f32 2.0, %v4805_v11 }
 0x20d   : > { %v4809_v60 = vmul.f32 %v2236_v33, %v4699_v10  ;;  %v2234_v1 = vadd.f32 %v2231_v21, %v2228_v44  ;;  %v1437_v39 = vpop.permute.xlu1 %1436  ;;  %v1820_v16 = vpop.permute.xlu0 %1819  ;;  %v4811_v54 = vmul.f32 %v2236_v33, %v2236_v33  ;;  %v4814_v26 = vmul.f32 %v2236_v33, %v4670_v27 }
 0x20e   : > { %v1443_v8 = vsel %vm1124_vm3, %v1428_v40, %v1437_v39  ;;  %v1446_v53 = vsel %vm1125_vm4, %v1437_v39, %v1428_v40  ;;  %5527 = vst [vmem:[#allocation16_spill] sm:$0xff] %v4850_v14 }
 0x20f   : > { %5525 = vst [vmem:[#allocation28_spill] sm:$0xff] %v4814_v26  ;;  %v2237_v31 = vmul.f32 0.11111111, %v2234_v1  ;;  %v1449_v44 = vadd.f32 %v1443_v8, %v5502_v48  ;;  %2810 = vrot.lane.b32.xlu0 %v2804_v3, %s3423_s13  ;;  %v4827_v21 = vadd.f32 %v4811_v54, %v4705_v42  ;;  %v2805_v8 = vsel %vm1178_vm2, %v4626_v17, %v4368_v36 }
 0x210   : > { %2429 = vrot.lane.b32.xlu1 %v2412_v46, %s3424_s16  ;;  %v4860_v17 = vadd.f32 0.0001, %v4832_v52 }
 0x211   : > { %v4835_v33 = vmul.f32 %v2237_v31, %v4727_v45  ;;  %v1452_v22 = vadd.f32 %v1449_v44, %v1446_v53  ;;  %v1829_v40 = vpop.permute.xlu1 %1828  ;;  %v2211_v39 = vpop.permute.xlu0 %2210  ;;  %v4837_v1 = vmul.f32 %v2237_v31, %v2237_v31  ;;  %v4840_v48 = vmul.f32 %v2237_v31, %v4684_v59 }
 0x212   : > { %v1835_v46 = vsel %vm1124_vm3, %v1820_v16, %v1829_v40  ;;  %v1838_v26 = vsel %vm1125_vm4, %v1829_v40, %v1820_v16  ;;  %5528 = vst [vmem:[#allocation18_spill] sm:$0xff] %v4860_v17 }
 0x213   : > { %5526 = vst [vmem:[#allocation17_spill] sm:$0xff] %v4840_v48  ;;  %v1455_v53 = vmul.f32 0.11111111, %v1452_v22  ;;  %v1841_v44 = vadd.f32 %v1835_v46, %v5503_v58  ;;  %2819 = vrot.lane.b32.xlu0 %v2804_v3, %s3424_s16  ;;  %v4856_v31 = vadd.f32 %v4837_v1, %v4737_v41  ;;  %v2806_v3 = vsel %vm1178_vm2, %v4635_v28, %v4370_v56 }
 0x214   : > { %2812 = vrot.lane.b32.xlu1 %v2805_v8, %s3423_s13 }
 0x215   : > { %v4863_v36 = vmul.f32 %v1455_v53, %v4850_v14  ;;  %v1844_v16 = vadd.f32 %v1841_v44, %v1838_v26  ;;  %v2220_v40 = vpop.permute.xlu1 %2219  ;;  %v1307_v48 = vpop.permute.xlu0 %1306  ;;  %v4865_v22 = vmul.f32 %v1455_v53, %v1455_v53  ;;  %v4868_v58 = vmul.f32 %v1455_v53, %v4805_v11 }
 0x216   : > { %v2226_v46 = vsel %vm1124_vm3, %v2211_v39, %v2220_v40  ;;  %v2229_v57 = vsel %vm1125_vm4, %v2220_v40, %v2211_v39 }
 0x217   : > { %5529 = vst [vmem:[#allocation21_spill] sm:$0xff] %v4863_v36  ;;  %5530 = vst [vmem:[#allocation22_spill] sm:$0xff] %v4868_v58  ;;  %v1847_v62 = vmul.f32 0.11111111, %v1844_v16  ;;  %v2232_v26 = vadd.f32 %v2226_v46, %v5504_v43  ;;  %2814 = vrot.lane.b32.xlu0 %v2806_v3, %s3423_s13  ;;  %v4881_v44 = vadd.f32 %v4865_v22, %v4860_v17 }
 0x218   : > { %2821 = vrot.lane.b32.xlu1 %v2805_v8, %s3424_s16 }
 0x219   : > { %v4885_v53 = vmul.f32 %v1847_v62, %v4850_v14  ;;  %v2235_v28 = vadd.f32 %v2232_v26, %v2229_v57  ;;  %v1316_v56 = vpop.permute.xlu0 %1315  ;;  %v4887_v58 = vmul.f32 %v1847_v62, %v1847_v62  ;;  %v4890_v39 = vmul.f32 %v1847_v62, %v4805_v11 }
 0x21a   : > { %v1309_v16 = vpop.permute.xlu1 %1308  ;;  %v1324_v43 = vsel %vm1124_vm3, %v1307_v48, %v1316_v56  ;;  %v1327_v40 = vsel %vm1125_vm4, %v1316_v56, %v1307_v48 }
 0x21b   : > { %5531 = vst [vmem:[#allocation23_spill] sm:$0xff] %v4885_v53  ;;  %5532 = vst [vmem:[#allocation24_spill] sm:$0xff] %v4890_v39  ;;  %v2238_v46 = vmul.f32 0.11111111, %v2235_v28  ;;  %v1330_v8 = vadd.f32 %v1324_v43, %v5506_v55  ;;  %v4899_v53 = vadd.f32 %v4887_v58, %v4860_v17 }
 0x21c   : > { %2823 = vrot.lane.b32.xlu1 %v2806_v3, %s3424_s16 }
 0x21d   : > { %v4903_v57 = vmul.f32 %v2238_v46, %v4850_v14  ;;  %v1333_v62 = vadd.f32 %v1330_v8, %v1327_v40  ;;  %v1311_v26 = vpop.permute.xlu0 %1310  ;;  %v4905_v39 = vmul.f32 %v2238_v46, %v2238_v46  ;;  %v4908_v36 = vmul.f32 %v2238_v46, %v4805_v11 }
 0x21e   : > { %v1318_v56 = vpop.permute.xlu1 %1317 }
 0x21f   : > { %5533 = vst [vmem:[#allocation29_spill] sm:$0xff] %v4903_v57  ;;  %5534 = vst [vmem:[#allocation27_spill] sm:$0xff] %v4908_v36  ;;  %v1336_v48 = vmul.f32 0.11111111, %v1333_v62  ;;  %v1325_v55 = vsel %vm1124_vm3, %v1309_v16, %v1318_v56  ;;  %v1328_v28 = vsel %vm1125_vm4, %v1318_v56, %v1309_v16  ;;  %v4917_v43 = vadd.f32 %v4905_v39, %v4860_v17 }
 0x220   : > { %v1331_v3 = vadd.f32 %v1325_v55, %v5509_v7 }
 0x221   : > { %v1342_v40 = vsub.f32 %v1336_v48, %v4689_v32  ;;  %v1526_v8 = vpop.permute.xlu0 %1525 }
 0x222   : > { %v1334_v57 = vadd.f32 %v1331_v3, %v1328_v28  ;;  %v1320_v46 = vpop.permute.xlu1 %1319 }
 0x223   : > { %v1326_v62 = vsel %vm1124_vm3, %v1311_v26, %v1320_v46  ;;  %v1329_v36 = vsel %vm1125_vm4, %v1320_v46, %v1311_v26 }
 0x224   : > { %v1337_v11 = vmul.f32 0.11111111, %v1334_v57  ;;  %v1332_v16 = vadd.f32 %v1326_v62, %v5508_v49 }
 0x225   : > { %v1535_v56 = vpop.permute.xlu0 %1534 }
 0x226   : > { %v1343_v7 = vsub.f32 %v1337_v11, %v4709_v25  ;;  %v1335_v55 = vadd.f32 %v1332_v16, %v1329_v36  ;;  %v1528_v17 = vpop.permute.xlu1 %1527  ;;  %v1543_v32 = vsel %vm1124_vm3, %v1526_v8, %v1535_v56  ;;  %v1546_v48 = vsel %vm1125_vm4, %v1535_v56, %v1526_v8 }
 0x227   : > { %v1549_v28 = vadd.f32 %v1543_v32, %v5510_v61  ;;  %v4940_v8 = vadd.f32 0.0009, %v1342_v40 }
 0x228   : > { %v4931_v3 = vmul.f32 0.11111111, %v1335_v55 }
 0x229   : > { %v1552_v14 = vadd.f32 %v1549_v28, %v1546_v48  ;;  %v1918_v26 = vpop.permute.xlu0 %1917 }
 0x22a   : > { %v1344_v49 = vsub.f32 %v4931_v3, %v4832_v52  ;;  %v1537_v57 = vpop.permute.xlu1 %1536  ;;  %v5076_v3 = vadd.f32 0.0001, %v4740_v34  ;;  %v5090_v34 = vadd.f32 0.0001, %v4784_v47 }
 0x22b   : > { %v1555_v46 = vmul.f32 0.11111111, %v1552_v14  ;;  %v1544_v36 = vsel %vm1124_vm3, %v1528_v17, %v1537_v57  ;;  %v1547_v25 = vsel %vm1125_vm4, %v1537_v57, %v1528_v17 }
 0x22c   : > { %v1550_v11 = vadd.f32 %v1544_v36, %v5511_v24 }
 0x22d   : > { %v1561_v61 = vsub.f32 %v1555_v46, %v4714_v4  ;;  %v1927_v62 = vpop.permute.xlu0 %1926  ;;  %v4952_v4 = vadd.f32 0.0009, %v1343_v7 }
 0x22e   : > { %v1553_v16 = vadd.f32 %v1550_v11, %v1547_v25  ;;  %v1920_v56 = vpop.permute.xlu1 %1919  ;;  %v1935_v55 = vsel %vm1124_vm3, %v1918_v26, %v1927_v62  ;;  %v1938_v14 = vsel %vm1125_vm4, %v1927_v62, %v1918_v26 }
 0x22f   : > { %v1690_v32 = vadd.f32 %v1561_v61, %v4940_v8  ;;  %v1941_v48 = vadd.f32 %v1935_v55, %v5513_v20 }
 0x230   : > { %v1556_v17 = vmul.f32 0.11111111, %v1553_v16 }
 0x231   : > { %v4950_v24 = vmul.f32 %v1690_v32, %v4733_v0  ;;  %v1944_v40 = vadd.f32 %v1941_v48, %v1938_v14  ;;  %v2309_v28 = vpop.permute.xlu0 %2308 }
 0x232   : > { %v1562_v57 = vsub.f32 %v1556_v17, %v4742_v35  ;;  %v1929_v46 = vpop.permute.xlu1 %1928 }
 0x233   : > { %v1947_v36 = vmul.f32 0.11111111, %v1944_v40  ;;  %v1936_v25 = vsel %vm1124_vm3, %v1920_v56, %v1929_v46  ;;  %v1939_v26 = vsel %vm1125_vm4, %v1929_v46, %v1920_v56  ;;  %3327 = vrcp.f32 %v4950_v24 }
 0x234   : > { %v1691_v20 = vadd.f32 %v1562_v57, %v4952_v4  ;;  %v1942_v11 = vadd.f32 %v1936_v25, %v5512_v2 }
 0x235   : > { %v1953_v0 = vsub.f32 %v1947_v36, %v4764_v9  ;;  %v2318_v61 = vpop.permute.xlu0 %2317 }
 0x236   : > { %v4963_v7 = vmul.f32 %v1691_v20, %v4758_v12  ;;  %v1945_v62 = vadd.f32 %v1942_v11, %v1939_v26  ;;  %v2311_v35 = vpop.permute.xlu1 %2310  ;;  %v2326_v16 = vsel %vm1124_vm3, %v2309_v28, %v2318_v61  ;;  %v2329_v55 = vsel %vm1125_vm4, %v2318_v61, %v2309_v28 }
 0x237   : > { %v2082_v56 = vadd.f32 %v1953_v0, %v4940_v8  ;;  %v2332_v14 = vadd.f32 %v2326_v16, %v5514_v51 }
 0x238   : > { %v1948_v32 = vmul.f32 0.11111111, %v1945_v62  ;;  %3329 = vrcp.f32 %v4963_v7 }
 0x239   : > { %v4972_v2 = vmul.f32 %v2082_v56, %v4780_v6  ;;  %v2335_v9 = vadd.f32 %v2332_v14, %v2329_v55  ;;  %v2601_v48 = vpop.permute.xlu0 %2600  ;;  %v4998_v14 = vld [vmem:[%s3648_s14] sm:$0xff] }
 0x23a   : > { %v1954_v12 = vsub.f32 %v1948_v32, %v4786_v18  ;;  %v2320_v17 = vpop.permute.xlu1 %2319 }
 0x23b   : > { %v2338_v40 = vmul.f32 0.11111111, %v2335_v9  ;;  %v2327_v57 = vsel %vm1124_vm3, %v2311_v35, %v2320_v17  ;;  %v2330_v28 = vsel %vm1125_vm4, %v2320_v17, %v2311_v35  ;;  %3331 = vrcp.f32 %v4972_v2 }
 0x23c   : > { %v2083_v46 = vadd.f32 %v1954_v12, %v4952_v4  ;;  %v2333_v51 = vadd.f32 %v2327_v57, %v5516_v13  ;;  %v3354_v12 = vld [vmem:[%s3680_s15 + $0x8] sm:$0xff] }
 0x23d   : > { %v2344_v36 = vsub.f32 %v2338_v40, %v4811_v54  ;;  %v2610_v6 = vpop.permute.xlu0 %2609 }
 0x23e   : > { %v4983_v25 = vmul.f32 %v2083_v46, %v4802_v5  ;;  %v2336_v18 = vadd.f32 %v2333_v51, %v2330_v28  ;;  %v2603_v26 = vpop.permute.xlu1 %2602  ;;  %v2618_v20 = vsel %vm1124_vm3, %v2601_v48, %v2610_v6  ;;  %v2621_v54 = vsel %vm1125_vm4, %v2610_v6, %v2601_v48  ;;  %v5005_v48 = vld [vmem:[%s3648_s14 + $0x8] sm:$0xff] }
 0x23f   : > { %v2473_v11 = vadd.f32 %v2344_v36, %v4940_v8  ;;  %v2624_v0 = vadd.f32 %v2618_v20, %v5505_v63  ;;  %v3352_v63 = vld [vmem:[%s3680_s15] sm:$0xff] }
 0x240   : > { %v2339_v13 = vmul.f32 0.11111111, %v2336_v18  ;;  %v1731_v32 = vsub.f32 %v4998_v14, %v3352_v63  ;;  %v5029_v18 = vld [vmem:[%s3648_s14 + $0x10] sm:$0xff]  ;;  %v3358_v63 = vld [vmem:[%s3717_s24 + $0x8] sm:$0xff]  ;;  %3333 = vrcp.f32 %v4983_v25  ;;  %s3239_s14 = sshll.u32 %s3634_s26, 4 }
 0x241   : > { %v4992_v61 = vmul.f32 %v2473_v11, %v4827_v21  ;;  %v2627_v5 = vadd.f32 %v2624_v0, %v2621_v54  ;;  %v1530_v62 = vpop.permute.xlu0 %1529  ;;  %s1032_s26 = scalar_lea.vmem [#allocation12], %s3239_s14 }
 0x242   : > { %v2345_v35 = vsub.f32 %v2339_v13, %v4837_v1  ;;  %v2612_v16 = vpop.permute.xlu1 %2611  ;;  %v1732_v1 = vsub.f32 %v5005_v48, %v3354_v12  ;;  %v1734_v20 = vand.u32 2147483647, %v1731_v32 }
 0x243   : > { %v2630_v55 = vmul.f32 0.11111111, %v2627_v5  ;;  %v2619_v56 = vsel %vm1124_vm3, %v2603_v26, %v2612_v16  ;;  %v2622_v40 = vsel %vm1125_vm4, %v2612_v16, %v2603_v26  ;;  %v3356_v26 = vld [vmem:[%s3680_s15 + $0x10] sm:$0xff]  ;;  %v3357_v5 = vld [vmem:[%s3717_s24] sm:$0xff]  ;;  %3335 = vrcp.f32 %v4992_v61  ;;  %s3240_s15 = sshll.u32 %s5580_s20, 1 }
 0x244   : > { %v2474_v9 = vadd.f32 %v2345_v35, %v4952_v4  ;;  %v2625_v21 = vadd.f32 %v2619_v56, %v5507_v29  ;;  %v1735_v0 = vand.u32 2147483647, %v1732_v1 }
 0x245   : > { %v5010_v17 = vmul.f32 %v2630_v55, %v4699_v10  ;;  %v1922_v57 = vpop.permute.xlu0 %1921  ;;  %v5014_v28 = vmul.f32 %v2630_v55, %v2630_v55  ;;  %v5017_v46 = vmul.f32 %v2630_v55, %v4670_v27  ;;  %v1733_v27 = vsub.f32 %v5029_v18, %v3356_v26 }
 0x246   : > { %v5020_v29 = vmul.f32 %v2474_v9, %v4856_v31  ;;  %v2628_v51 = vadd.f32 %v2625_v21, %v2622_v40  ;;  %v1539_v36 = vpop.permute.xlu1 %1538  ;;  %v1737_v21 = vsel %vm1723_vm5, %v1734_v20, 0.0  ;;  %v1738_v40 = vsel %vm1723_vm5, %v1735_v0, 0.0 }
 0x247   : > { %v1545_v6 = vsel %vm1124_vm3, %v1530_v62, %v1539_v36  ;;  %v5026_v10 = vadd.f32 %v5014_v28, %v4705_v42  ;;  %v1548_v13 = vsel %vm1125_vm4, %v1539_v36, %v1530_v62  ;;  %v2121_v42 = vsub.f32 %v4998_v14, %v3357_v5 }
 0x248   : > { %v2631_v11 = vmul.f32 0.11111111, %v2628_v51  ;;  %v1551_v31 = vadd.f32 %v1545_v6, %v5515_v38  ;;  %v2122_v38 = vsub.f32 %v5005_v48, %v3358_v63  ;;  %v1736_v9 = vand.u32 2147483647, %v1733_v27  ;;  %v3359_v6 = vld [vmem:[%s3717_s24 + $0x10] sm:$0xff]  ;;  %s1116_s24 = sadd.s32 %s3240_s15, %s5582_s19 }
 0x249   : > { %v2313_v54 = vpop.permute.xlu0 %2312  ;;  %v2124_v26 = vand.u32 2147483647, %v2121_v42  ;;  %v5064_v27 = vadd.f32 0.0009, %v1344_v49  ;;  %v1739_v0 = vadd.f32 %v1738_v40, %v1737_v21  ;;  %3337 = vrcp.f32 %v5020_v29 }
 0x24a   : > { %v5039_v35 = vmul.f32 %v2631_v11, %v4727_v45  ;;  %v1554_v16 = vadd.f32 %v1551_v31, %v1548_v13  ;;  %v1931_v55 = vpop.permute.xlu1 %1930  ;;  %v5041_v56 = vmul.f32 %v2631_v11, %v2631_v11  ;;  %v5048_v62 = vmul.f32 %v2631_v11, %v4684_v59 }
 0x24b   : > { %v1937_v32 = vsel %vm1124_vm3, %v1922_v57, %v1931_v55  ;;  %v1940_v51 = vsel %vm1125_vm4, %v1931_v55, %v1922_v57  ;;  %v2123_v59 = vsub.f32 %v5029_v18, %v3359_v6  ;;  %v2125_v11 = vand.u32 2147483647, %v2122_v38 }
 0x24c   : > { %v1557_v12 = vmul.f32 0.11111111, %v1554_v16  ;;  %v1943_v45 = vadd.f32 %v1937_v32, %v5517_v50  ;;  %v5054_v1 = vadd.f32 %v5041_v56, %v4737_v41  ;;  %v5068_v31 = vadd.f32 0.0001, %v4712_v23 }
 0x24d   : > { %v2605_v36 = vpop.permute.xlu0 %2604  ;;  %v1740_v52 = vsel %vm1723_vm5, %v1736_v9, 0.0  ;;  %v2126_v23 = vand.u32 2147483647, %v2123_v59  ;;  %v2127_v16 = vsel %vm1723_vm5, %v2124_v26, 0.0  ;;  %v5087_v9 = vadd.f32 0.0001, %v4762_v15 }
 0x24e   : > { %v1563_v50 = vsub.f32 %v1557_v12, %v4865_v22  ;;  %v1946_v20 = vadd.f32 %v1943_v45, %v1940_v51  ;;  %v2322_v41 = vpop.permute.xlu1 %2321  ;;  %v1741_v21 = vadd.f32 %v1740_v52, %v1739_v0  ;;  %v5107_v26 = vadd.f32 0.0001, %v4809_v60  ;;  %v5535_v0 = vld [vmem:[#allocation32_spill] sm:$0xff] }
 0x24f   : > { %v2328_v57 = vsel %vm1124_vm3, %v2313_v54, %v2322_v41  ;;  %v2331_v22 = vsel %vm1125_vm4, %v2322_v41, %v2313_v54  ;;  %v2130_v40 = vsel %vm1723_vm5, %v2126_v23, 0.0  ;;  %v5536_v23 = vld [vmem:[#allocation16_spill] sm:$0xff] }
 0x250   : > { %v1692_v13 = vadd.f32 %v1563_v50, %v5064_v27  ;;  %v1949_v5 = vmul.f32 0.11111111, %v1946_v20  ;;  %v2334_v42 = vadd.f32 %v2328_v57, %v5518_v19  ;;  %v2128_v19 = vsel %vm1723_vm5, %v2125_v11, 0.0  ;;  %v3360_v20 = vld [vmem:[%s3796_s28] sm:$0xff]  ;;  %v3361_v11 = vld [vmem:[%s3796_s28 + $0x8] sm:$0xff] }
 0x251   : > { %v2703_v49 = vpop.permute.xlu0 %2702  ;;  %v2129_v47 = vadd.f32 %v2128_v19, %v2127_v16  ;;  %v2512_v41 = vsub.f32 %v4998_v14, %v3360_v20  ;;  %v2513_v57 = vsub.f32 %v5005_v48, %v3361_v11 }
 0x252   : > { %v5082_v55 = vmul.f32 %v1692_v13, %v4881_v44  ;;  %v1955_v63 = vsub.f32 %v1949_v5, %v4887_v58  ;;  %v2337_v38 = vadd.f32 %v2334_v42, %v2331_v22  ;;  %v2614_v32 = vpop.permute.xlu1 %2613  ;;  %v1742_v5 = vmul.f32 0.33333334, %v1741_v21  ;;  %v3362_v42 = vld [vmem:[%s3796_s28 + $0x10] sm:$0xff]  ;;  %v5537_v21 = vld [vmem:[#allocation15_spill] sm:$0xff]  ;;  %s1117_s28 = scalar_lea.vmem %s5411_s11, %s1116_s24 }
 0x253   : > { %v2620_v54 = vsel %vm1124_vm3, %v2605_v36, %v2614_v32  ;;  %v2623_v15 = vsel %vm1125_vm4, %v2614_v32, %v2605_v36  ;;  %v5110_v36 = vadd.f32 0.0001, %v4835_v33  ;;  %v2131_v33 = vadd.f32 %v2130_v40, %v2129_v47 }
 0x254   : > { %v2084_v44 = vadd.f32 %v1955_v63, %v5064_v27  ;;  %v2340_v58 = vmul.f32 0.11111111, %v2337_v38  ;;  %v2626_v12 = vadd.f32 %v2620_v54, %v4168_v30  ;;  %v2514_v52 = vsub.f32 %v5029_v18, %v3362_v42 }
 0x255   : > { %v2712_v45 = vpop.permute.xlu0 %2711  ;;  %3339 = vrcp.f32 %v5082_v55 }
 0x256   : > { %v5103_v51 = vmul.f32 %v2084_v44, %v4899_v53  ;;  %v2346_v6 = vsub.f32 %v2340_v58, %v4905_v39  ;;  %v2629_v59 = vadd.f32 %v2626_v12, %v2623_v15  ;;  %v2705_v30 = vpop.permute.xlu1 %2704  ;;  %v2720_v50 = vsel %vm1124_vm3, %v2703_v49, %v2712_v45  ;;  %v5539_v15 = vld [vmem:[#allocation18_spill] sm:$0xff] }
 0x257   : > { %v2726_v60 = vadd.f32 %v2720_v50, %v5535_v0  ;;  %v2723_v63 = vsel %vm1125_vm4, %v2712_v45, %v2703_v49  ;;  %v2515_v58 = vand.u32 2147483647, %v2512_v41  ;;  %v2516_v49 = vand.u32 2147483647, %v2513_v57  ;;  %v5540_v50 = vld [vmem:[#allocation21_spill] sm:$0xff]  ;;  %v5541_v41 = vld [vmem:[#allocation23_spill] sm:$0xff] }
 0x258   : > { %v2475_v53 = vadd.f32 %v2346_v6, %v5064_v27  ;;  %v2632_v39 = vmul.f32 0.11111111, %v2629_v59  ;;  %v2132_v59 = vmul.f32 0.33333334, %v2131_v33  ;;  %v5148_v20 = vadd.f32 0.0001, %v5540_v50 }
 0x259   : > { %v2707_v13 = vpop.permute.xlu0 %2706  ;;  %v2729_v19 = vadd.f32 %v2726_v60, %v2723_v63  ;;  %v2517_v42 = vand.u32 2147483647, %v2514_v52  ;;  %3341 = vrcp.f32 %v5103_v51 }
 0x25a   : > { %v5124_v22 = vmul.f32 %v2475_v53, %v4917_v43  ;;  %v5127_v16 = vmul.f32 %v2632_v39, %v5536_v23  ;;  %v2714_v38 = vpop.permute.xlu1 %2713  ;;  %v5131_v32 = vmul.f32 %v2632_v39, %v2632_v39  ;;  %v5136_v44 = vmul.f32 %v2632_v39, %v5537_v21  ;;  %v5538_v43 = vld [vmem:[#allocation33_spill] sm:$0xff]  ;;  %v5543_v23 = vld [vmem:[#allocation34_spill] sm:$0xff] }
 0x25b   : > { %v2721_v54 = vsel %vm1124_vm3, %v2705_v30, %v2714_v38  ;;  %v2732_v45 = vmul.f32 0.11111111, %v2729_v19  ;;  %v2724_v40 = vsel %vm1125_vm4, %v2714_v38, %v2705_v30  ;;  %v5151_v53 = vadd.f32 0.0001, %v5541_v41  ;;  %v5542_v39 = vld [vmem:[#allocation29_spill] sm:$0xff] }
 0x25c   : > { %v2727_v12 = vadd.f32 %v2721_v54, %v5538_v43  ;;  %v5142_v47 = vadd.f32 %v5131_v32, %v5539_v15  ;;  %v5154_v11 = vadd.f32 0.0001, %v5542_v39  ;;  %v2518_v38 = vsel %vm1723_vm5, %v2515_v58, 0.0  ;;  %v5163_v54 = vpop.eup %3327 }
 0x25d   : > { %v1634_v6 = vpop.permute.xlu0 %1633  ;;  %v2738_v57 = vsub.f32 %v2732_v45, %v5014_v28  ;;  %v2519_v19 = vsel %vm1723_vm5, %v2516_v49, 0.0  ;;  %v5168_v28 = vmul.f32 0.15, %v1742_v5  ;;  %v5170_v15 = vmul.f32 0.15, %v2132_v59  ;;  %v5172_v52 = vpop.eup %3329  ;;  %v5544_v5 = vld [vmem:[#allocation35_spill] sm:$0xff] }
 0x25e   : > { %v2730_v0 = vadd.f32 %v2727_v12, %v2724_v40  ;;  %v2716_v60 = vpop.permute.xlu1 %2715  ;;  %v3332_v40 = vpop.eup %3331  ;;  %v2520_v59 = vadd.f32 %v2519_v19, %v2518_v38  ;;  %v2521_v41 = vsel %vm1723_vm5, %v2517_v42, 0.0  ;;  %v3364_v42 = vld [vmem:[%s4006_s17 + $0x8] sm:$0xff]  ;;  %3343 = vrcp.f32 %v5124_v22 }
 0x25f   : > { %v2722_v30 = vsel %vm1124_vm3, %v2707_v13, %v2716_v60  ;;  %v2867_v21 = vadd.f32 %v2738_v57, %v4940_v8  ;;  %v2725_v43 = vsel %vm1125_vm4, %v2716_v60, %v2707_v13  ;;  %v3363_v60 = vld [vmem:[%s4006_s17] sm:$0xff]  ;;  %v2091_v38 = vmul.f32 %v3332_v40, %v4972_v2 }
 0x260   : > { %v2733_v33 = vmul.f32 0.11111111, %v2730_v0  ;;  %v2728_v63 = vadd.f32 %v2722_v30, %v5543_v23  ;;  %v2906_v57 = vsub.f32 %v4998_v14, %v3363_v60  ;;  %v3334_v30 = vpop.eup %3333 }
 0x261   : > { %v1643_v12 = vpop.permute.xlu0 %1642  ;;  %v5179_v13 = vmul.f32 %v2867_v21, %v5026_v10  ;;  %v1699_v10 = vmul.f32 %v5163_v54, %v4950_v24  ;;  %v5200_v21 = vld [vmem:[%s4006_s17 + $0x10] sm:$0xff]  ;;  %v2092_v2 = vmul.f32 %v3334_v30, %v4983_v25 }
 0x262   : > { %v2739_v58 = vsub.f32 %v2733_v33, %v5041_v56  ;;  %v2731_v49 = vadd.f32 %v2728_v63, %v2725_v43  ;;  %v1636_v45 = vpop.permute.xlu1 %1635  ;;  %v1651_v8 = vsel %vm1124_vm3, %v1634_v6, %v1643_v12  ;;  %v1654_v56 = vsel %vm1125_vm4, %v1643_v12, %v1634_v6  ;;  %v5545_v12 = vld [vmem:[#allocation36_spill] sm:$0xff] }
 0x263   : > { %v1657_v50 = vadd.f32 %v1651_v8, %v5544_v5  ;;  %v1700_v33 = vmul.f32 %v5172_v52, %v4963_v7  ;;  %v2908_v24 = vsub.f32 %v5029_v18, %v5200_v21  ;;  %v1702_v8 = vsub.f32 2.0, %v1699_v10 }
 0x264   : > { %v2868_v39 = vadd.f32 %v2739_v58, %v4952_v4  ;;  %v2734_v0 = vmul.f32 0.11111111, %v2731_v49  ;;  %v2907_v4 = vsub.f32 %v5005_v48, %v3364_v42  ;;  %v2522_v48 = vadd.f32 %v2521_v41, %v2520_v59  ;;  %v3336_v49 = vpop.eup %3335  ;;  %v5547_v42 = vld [vmem:[#allocation37_spill] sm:$0xff] }
 0x265   : > { %v1660_v23 = vadd.f32 %v1657_v50, %v1654_v56  ;;  %v2026_v63 = vpop.permute.xlu0 %2025  ;;  %v1703_v5 = vsub.f32 2.0, %v1700_v33  ;;  %v5546_v50 = vld [vmem:[#allocation19_spill] sm:$0xff]  ;;  %v3338_v60 = vpop.eup %3337  ;;  %3345 = vrcp.f32 %v5179_v13 }
 0x266   : > { %v5196_v19 = vmul.f32 %v2868_v39, %v5054_v1  ;;  %v2740_v6 = vsub.f32 %v2734_v0, %v5131_v32  ;;  %v1645_v14 = vpop.permute.xlu1 %1644  ;;  %v5210_v32 = vand.u32 2147483647, %v2906_v57  ;;  %v5221_v33 = vmul.f32 0.33333334, %v2522_v48 }
 0x267   : > { %v1663_v7 = vmul.f32 0.11111111, %v1660_v23  ;;  %v1652_v43 = vsel %vm1124_vm3, %v1636_v45, %v1645_v14  ;;  %v1655_v0 = vsel %vm1125_vm4, %v1645_v14, %v1636_v45  ;;  %v2094_v23 = vsub.f32 2.0, %v2091_v38 }
 0x268   : > { %v2869_v1 = vadd.f32 %v2740_v6, %v5064_v27  ;;  %v1658_v58 = vadd.f32 %v1652_v43, %v5545_v12  ;;  %v5223_v6 = vand.u32 2147483647, %v2907_v4  ;;  %v2095_v45 = vsub.f32 2.0, %v2092_v2 }
 0x269   : > { %v1669_v39 = vsub.f32 %v1663_v7, %v5546_v50  ;;  %v2035_v56 = vpop.permute.xlu0 %2034  ;;  %v3340_v7 = vpop.eup %3339  ;;  %v2482_v14 = vmul.f32 %v3336_v49, %v4992_v61  ;;  %v2483_v43 = vmul.f32 %v3338_v60, %v5020_v29  ;;  %v5231_v48 = vadd.f32 0.0001, %v5010_v17  ;;  %v5549_v17 = vld [vmem:[#allocation38_spill] sm:$0xff] }
 0x26a   : > { %v5216_v59 = vmul.f32 %v2869_v1, %v5142_v47  ;;  %v1661_v25 = vadd.f32 %v1658_v58, %v1655_v0  ;;  %v2028_v27 = vpop.permute.xlu1 %2027  ;;  %v2043_v41 = vsel %vm1124_vm3, %v2026_v63, %v2035_v56  ;;  %v2046_v47 = vsel %vm1125_vm4, %v2035_v56, %v2026_v63 }
 0x26b   : > { %v1678_v57 = vmul.f32 2.0, %v1669_v39  ;;  %v2049_v10 = vadd.f32 %v2043_v41, %v5547_v42  ;;  %v1705_v1 = vmul.f32 %v5163_v54, %v1702_v8  ;;  %v1706_v4 = vmul.f32 %v5172_v52, %v1703_v5  ;;  %v5548_v39 = vld [vmem:[#allocation20_spill] sm:$0xff] }
 0x26c   : > { %v1664_v38 = vmul.f32 0.11111111, %v1661_v25  ;;  %v2097_v0 = vmul.f32 %v3332_v40, %v2094_v23  ;;  %v3342_v25 = vpop.eup %3341  ;;  %v1701_v41 = vmul.f32 %v3340_v7, %v5082_v55  ;;  %v2485_v8 = vsub.f32 2.0, %v2482_v14 }
 0x26d   : > { %v1681_v12 = vadd.f32 0.0009, %v1678_v57  ;;  %v2052_v58 = vadd.f32 %v2049_v10, %v2046_v47  ;;  %v2417_v50 = vpop.permute.xlu0 %2416  ;;  %v5239_v57 = vmul.f32 %v3334_v30, %v2095_v45  ;;  %v2486_v52 = vsub.f32 2.0, %v2483_v43  ;;  %v5550_v10 = vld [vmem:[#allocation25_spill] sm:$0xff] }
 0x26e   : > { %v1670_v2 = vsub.f32 %v1664_v38, %v5548_v39  ;;  %v2037_v61 = vpop.permute.xlu1 %2036  ;;  %v1704_v30 = vsub.f32 2.0, %v1701_v41  ;;  %v5551_v39 = vld [vmem:[#allocation39_spill] sm:$0xff]  ;;  %3347 = vrcp.f32 %v5196_v19 }
 0x26f   : > { %v1684_v63 = vmul.f32 %v1681_v12, %v5068_v31  ;;  %v2055_v29 = vmul.f32 0.11111111, %v2052_v58  ;;  %v2044_v54 = vsel %vm1124_vm3, %v2028_v27, %v2037_v61  ;;  %v2047_v23 = vsel %vm1125_vm4, %v2037_v61, %v2028_v27 }
 0x270   : > { %v1679_v56 = vmul.f32 2.0, %v1670_v2  ;;  %v2050_v42 = vadd.f32 %v2044_v54, %v5549_v17  ;;  %v2093_v31 = vmul.f32 %v3342_v25, %v5103_v51  ;;  %3349 = vrcp.f32 %v5216_v59 }
 0x271   : > { %v1708_v5 = vmul.f32 %v1705_v1, %v1684_v63  ;;  %v2061_v40 = vsub.f32 %v2055_v29, %v5550_v10  ;;  %v2426_v55 = vpop.permute.xlu0 %2425  ;;  %v3344_v1 = vpop.eup %3343  ;;  %v2488_v29 = vmul.f32 %v3336_v49, %v2485_v8  ;;  %v5254_v10 = vmul.f32 %v3338_v60, %v2486_v52  ;;  %v5554_v52 = vld [vmem:[#allocation40_spill] sm:$0xff] }
 0x272   : > { %v1682_v38 = vadd.f32 0.0009, %v1679_v56  ;;  %v2053_v47 = vadd.f32 %v2050_v42, %v2047_v23  ;;  %v2419_v12 = vpop.permute.xlu1 %2418  ;;  %v2434_v14 = vsel %vm1124_vm3, %v2417_v50, %v2426_v55  ;;  %v2437_v51 = vsel %vm1125_vm4, %v2426_v55, %v2417_v50  ;;  %v5552_v42 = vld [vmem:[#allocation26_spill] sm:$0xff] }
 0x273   : > { %v1711_v45 = vsub.f32 1.0, %v1708_v5  ;;  %v2070_v58 = vmul.f32 2.0, %v2061_v40  ;;  %v2440_v43 = vadd.f32 %v2434_v14, %v5551_v39  ;;  %v2096_v17 = vsub.f32 2.0, %v2093_v31 }
 0x274   : > { %v1685_v2 = vmul.f32 %v1682_v38, %v5076_v3  ;;  %v2056_v27 = vmul.f32 0.11111111, %v2053_v47  ;;  %v2484_v23 = vmul.f32 %v3344_v1, %v5124_v22  ;;  %v5261_v55 = vmul.f32 %v3340_v7, %v1704_v30  ;;  %v5553_v47 = vld [vmem:[#allocation28_spill] sm:$0xff] }
 0x275   : > { %v1714_v61 = vmul.f32 0.5, %v1711_v45  ;;  %v2073_v63 = vadd.f32 0.0009, %v2070_v58  ;;  %v2443_v54 = vadd.f32 %v2440_v43, %v2437_v51  ;;  %v1638_v56 = vpop.permute.xlu0 %1637  ;;  %v5267_v43 = vmul.f32 %v3342_v25, %v2096_v17 }
 0x276   : > { %v1709_v41 = vmul.f32 %v1706_v4, %v1685_v2  ;;  %v2062_v5 = vsub.f32 %v2056_v27, %v5552_v42  ;;  %v2428_v40 = vpop.permute.xlu1 %2427  ;;  %v2487_v2 = vsub.f32 2.0, %v2484_v23 }
 0x277   : > { %v2076_v3 = vmul.f32 %v2073_v63, %v5087_v9  ;;  %v2446_v38 = vmul.f32 0.11111111, %v2443_v54  ;;  %v2435_v50 = vsel %vm1124_vm3, %v2419_v12, %v2428_v40  ;;  %v1717_v4 = vmax.f32 %v1714_v61, 0.0 }
 0x278   : > { %v1712_v49 = vsub.f32 1.0, %v1709_v41  ;;  %v2071_v8 = vmul.f32 2.0, %v2062_v5  ;;  %v2441_v14 = vadd.f32 %v2435_v50, %v5554_v52  ;;  %v2438_v9 = vsel %vm1125_vm4, %v2428_v40, %v2419_v12  ;;  %v5555_v40 = vld [vmem:[#allocation41_spill] sm:$0xff] }
 0x279   : > { %v2100_v31 = vmul.f32 %v2097_v0, %v2076_v3  ;;  %v2452_v60 = vsub.f32 %v2446_v38, %v5553_v47  ;;  %v2030_v45 = vpop.permute.xlu0 %2029  ;;  %v1720_v63 = vmin.f32 %v1717_v4, 1.0  ;;  %v5556_v50 = vld [vmem:[#allocation17_spill] sm:$0xff] }
 0x27a   : > { %v1715_v22 = vmul.f32 0.5, %v1712_v49  ;;  %v2074_v58 = vadd.f32 0.0009, %v2071_v8  ;;  %v1647_v39 = vpop.permute.xlu1 %1646  ;;  %v2444_v7 = vadd.f32 %v2441_v14, %v2438_v9 }
 0x27b   : > { %v2103_v27 = vsub.f32 1.0, %v2100_v31  ;;  %v2461_v51 = vmul.f32 2.0, %v2452_v60  ;;  %v1653_v61 = vsel %vm1124_vm3, %v1638_v56, %v1647_v39  ;;  %v1656_v17 = vsel %vm1125_vm4, %v1647_v39, %v1638_v56 }
 0x27c   : > { %v1718_v0 = vmax.f32 %v1715_v22, 0.0  ;;  %v2077_v30 = vmul.f32 %v2074_v58, %v5090_v34  ;;  %v2447_v42 = vmul.f32 0.11111111, %v2444_v7  ;;  %v1659_v23 = vadd.f32 %v1653_v61, %v5555_v40  ;;  %v5557_v22 = vld [vmem:[#allocation42_spill] sm:$0xff] }
 0x27d   : > { %v2106_v54 = vmul.f32 0.5, %v2103_v27  ;;  %v2464_v41 = vadd.f32 0.0009, %v2461_v51  ;;  %v2421_v12 = vpop.permute.xlu0 %2420  ;;  %v5282_v60 = vmul.f32 %v3344_v1, %v2487_v2  ;;  %v1724_v56 = vsel %vm1723_vm5, %v1720_v63, 0.0  ;;  %v5558_v63 = vld [vmem:[#allocation22_spill] sm:$0xff] }
 0x27e   : > { %v1721_v5 = vmin.f32 %v1718_v0, 1.0  ;;  %v2101_v25 = vmul.f32 %v5239_v57, %v2077_v30  ;;  %v2039_v3 = vpop.permute.xlu1 %2038  ;;  %v2453_v49 = vsub.f32 %v2447_v42, %v5556_v50  ;;  %v1662_v47 = vadd.f32 %v1659_v23, %v1656_v17  ;;  %v5284_v57 = vpop.eup %3345  ;;  %v5559_v17 = vld [vmem:[#allocation43_spill] sm:$0xff] }
 0x27f   : > { %v2109_v38 = vmax.f32 %v2106_v54, 0.0  ;;  %v2467_v34 = vmul.f32 %v2464_v41, %v5107_v26  ;;  %v2045_v8 = vsel %vm1124_vm3, %v2030_v45, %v2039_v3  ;;  %v2048_v27 = vsel %vm1125_vm4, %v2039_v3, %v2030_v45  ;;  %v5299_v42 = vpop.eup %3347 }
 0x280   : > { %v1725_v4 = vsel %vm1723_vm5, %v1721_v5, 0.0  ;;  %v2104_v31 = vsub.f32 1.0, %v2101_v25  ;;  %v2462_v14 = vmul.f32 2.0, %v2453_v49  ;;  %v2051_v58 = vadd.f32 %v2045_v8, %v5557_v22 }
 0x281   : > { %v2491_v52 = vmul.f32 %v2488_v29, %v2467_v34  ;;  %v2811_v26 = vpop.permute.xlu0 %2810  ;;  %v1665_v39 = vmul.f32 0.11111111, %v1662_v47  ;;  %v5290_v7 = vadd.f32 %v1725_v4, %v1724_v56  ;;  %v2112_v0 = vmin.f32 %v2109_v38, 1.0  ;;  %v5560_v4 = vld [vmem:[#allocation24_spill] sm:$0xff] }
 0x282   : > { %v2107_v9 = vmul.f32 0.5, %v2104_v31  ;;  %v2430_v51 = vpop.permute.xlu1 %2429  ;;  %v2465_v2 = vadd.f32 0.0009, %v2462_v14  ;;  %v2054_v30 = vadd.f32 %v2051_v58, %v2048_v27  ;;  %v5294_v61 = vmul.f32 %v5284_v57, %v5179_v13  ;;  %v5561_v14 = vld [vmem:[#allocation44_spill] sm:$0xff]  ;;  %v5312_v58 = vpop.eup %3349 }
 0x283   : > { %v2494_v1 = vsub.f32 1.0, %v2491_v52  ;;  %v1671_v54 = vsub.f32 %v1665_v39, %v5558_v63  ;;  %v2436_v41 = vsel %vm1124_vm3, %v2421_v12, %v2430_v51  ;;  %v2439_v13 = vsel %vm1125_vm4, %v2430_v51, %v2421_v12 }
 0x284   : > { %v2110_v29 = vmax.f32 %v2107_v9, 0.0  ;;  %v2468_v5 = vmul.f32 %v2465_v2, %v5110_v36  ;;  %v2057_v25 = vmul.f32 0.11111111, %v2054_v30  ;;  %v2442_v40 = vadd.f32 %v2436_v41, %v5559_v17 }
 0x285   : > { %v2497_v45 = vmul.f32 0.5, %v2494_v1  ;;  %v2820_v23 = vpop.permute.xlu0 %2819  ;;  %v1680_v38 = vmul.f32 2.0, %v1671_v54  ;;  %v2115_v49 = vsel %vm1723_vm5, %v2112_v0, 0.0  ;;  %v2879_v30 = vsub.f32 2.0, %v5294_v61  ;;  %v5562_v54 = vld [vmem:[#allocation27_spill] sm:$0xff] }
 0x286   : > { %v2113_v3 = vmin.f32 %v2110_v29, 1.0  ;;  %v2813_v34 = vpop.permute.xlu1 %2812  ;;  %v2828_v50 = vsel %vm1124_vm3, %v2811_v26, %v2820_v23  ;;  %v2492_v8 = vmul.f32 %v5254_v10, %v2468_v5  ;;  %v2063_v31 = vsub.f32 %v2057_v25, %v5560_v4 }
 0x287   : > { %v2445_v36 = vadd.f32 %v2442_v40, %v2439_v13  ;;  %v2500_v56 = vmax.f32 %v2497_v45, 0.0  ;;  %v1683_v52 = vadd.f32 0.0009, %v1680_v38  ;;  %v2834_v22 = vadd.f32 %v2828_v50, %v5561_v14  ;;  %v5563_v40 = vld [vmem:[#allocation45_spill] sm:$0xff] }
 0x288   : > { %v2116_v47 = vsel %vm1723_vm5, %v2113_v3, 0.0  ;;  %v2495_v12 = vsub.f32 1.0, %v2492_v8  ;;  %v2072_v9 = vmul.f32 2.0, %v2063_v31  ;;  %v2831_v27 = vsel %vm1125_vm4, %v2820_v23, %v2811_v26 }
 0x289   : > { %v2448_v39 = vmul.f32 0.11111111, %v2445_v36  ;;  %v2877_v10 = vmul.f32 %v5299_v42, %v5196_v19  ;;  %v1686_v51 = vmul.f32 %v1683_v52, %v5148_v20  ;;  %v2837_v0 = vadd.f32 %v2834_v22, %v2831_v27  ;;  %v2815_v31 = vpop.permute.xlu0 %2814 }
 0x28a   : > { %v2822_v1 = vpop.permute.xlu1 %2821  ;;  %v5319_v2 = vadd.f32 %v2116_v47, %v2115_v49  ;;  %v2498_v29 = vmul.f32 0.5, %v2495_v12  ;;  %v2075_v63 = vadd.f32 0.0009, %v2072_v9  ;;  %v2503_v45 = vmin.f32 %v2500_v56, 1.0  ;;  %v5564_v9 = vld [vmem:[#allocation46_spill] sm:$0xff] }
 0x28b   : > { %v2454_v41 = vsub.f32 %v2448_v39, %v5562_v54  ;;  %v1710_v5 = vmul.f32 %v5261_v55, %v1686_v51  ;;  %v2840_v25 = vmul.f32 0.11111111, %v2837_v0  ;;  %v2829_v26 = vsel %vm1124_vm3, %v2813_v34, %v2822_v1 }
 0x28c   : > { %v2501_v19 = vmax.f32 %v2498_v29, 0.0  ;;  %v2078_v20 = vmul.f32 %v2075_v63, %v5151_v53  ;;  %v2835_v23 = vadd.f32 %v2829_v26, %v5563_v40  ;;  %v2880_v3 = vsub.f32 2.0, %v2877_v10 }
 0x28d   : > { %v2463_v17 = vmul.f32 2.0, %v2454_v41  ;;  %v1713_v38 = vsub.f32 1.0, %v1710_v5  ;;  %v2846_v61 = vsub.f32 %v2840_v25, %v5017_v46  ;;  %v2832_v13 = vsel %vm1125_vm4, %v2822_v1, %v2813_v34 }
 0x28e   : > { %v2824_v50 = vpop.permute.xlu1 %2823  ;;  %v2504_v49 = vmin.f32 %v2501_v19, 1.0  ;;  %v2102_v55 = vmul.f32 %v5267_v43, %v2078_v20  ;;  %v2838_v4 = vadd.f32 %v2835_v23, %v2832_v13  ;;  %v2506_v36 = vsel %vm1723_vm5, %v2503_v45, 0.0 }
 0x28f   : > { %v2466_v8 = vadd.f32 0.0009, %v2463_v17  ;;  %v1716_v53 = vmul.f32 0.5, %v1713_v38  ;;  %v2855_v47 = vmul.f32 2.0, %v2846_v61  ;;  %v2830_v56 = vsel %vm1124_vm3, %v2815_v31, %v2824_v50 }
 0x290   : > { %v2507_v52 = vsel %vm1723_vm5, %v2504_v49, 0.0  ;;  %v2105_v46 = vsub.f32 1.0, %v2102_v55  ;;  %v2841_v34 = vmul.f32 0.11111111, %v2838_v4  ;;  %v2836_v43 = vadd.f32 %v2830_v56, %v5564_v9 }
 0x291   : > { %v2469_v14 = vmul.f32 %v2466_v8, %v5154_v11  ;;  %v1719_v22 = vmax.f32 %v1716_v53, 0.0  ;;  %v2858_v12 = vadd.f32 0.0009, %v2855_v47  ;;  %v2508_v39 = vadd.f32 %v2507_v52, %v2506_v36  ;;  %v2527_v47 = vld [vmem:[%s1032_s26] sm:$0xff] }
 0x292   : > { %v2108_v27 = vmul.f32 0.5, %v2105_v46  ;;  %v2847_v51 = vsub.f32 %v2841_v34, %v5048_v62  ;;  %v2833_v0 = vsel %vm1125_vm4, %v2824_v50, %v2815_v31  ;;  %v2882_v29 = vmul.f32 %v5284_v57, %v2879_v30 }
 0x293   : > { %v2493_v10 = vmul.f32 %v5282_v60, %v2469_v14  ;;  %v1722_v1 = vmin.f32 %v1719_v22, 1.0  ;;  %v2861_v63 = vmul.f32 %v2858_v12, %v5231_v48  ;;  %v2839_v11 = vadd.f32 %v2836_v43, %v2833_v0 }
 0x294   : > { %v2853_v54 = vadd.f32 0.0001, %v5039_v35  ;;  %v2111_v41 = vmax.f32 %v2108_v27, 0.0  ;;  %v2856_v5 = vmul.f32 2.0, %v2847_v51  ;;  %v2878_v60 = vmul.f32 %v5312_v58, %v5216_v59 }
 0x295   : > { %v2496_v45 = vsub.f32 1.0, %v2493_v10  ;;  %v2885_v25 = vmul.f32 %v2882_v29, %v2861_v63  ;;  %v2842_v62 = vmul.f32 0.11111111, %v2839_v11  ;;  %v1727_v37 = vsel %vm1723_vm5, %v1722_v1, 0.0 }
 0x296   : > { %v2114_v26 = vmin.f32 %v2111_v41, 1.0  ;;  %v2859_v20 = vadd.f32 0.0009, %v2856_v5  ;;  %v1728_v57 = vadd.f32 %v1727_v37, %v5290_v7  ;;  %v2883_v30 = vmul.f32 %v5299_v42, %v2880_v3 }
 0x297   : > { %v2499_v19 = vmul.f32 0.5, %v2496_v45  ;;  %v2888_v48 = vsub.f32 1.0, %v2885_v25  ;;  %v2848_v35 = vsub.f32 %v2842_v62, %v5136_v44  ;;  %v2911_v17 = vand.u32 2147483647, %v2908_v24 }
 0x298   : > { %v2862_v40 = vmul.f32 %v2859_v20, %v2853_v54  ;;  %v1730_v23 = vmul.f32 0.33333334, %v1728_v57  ;;  %v2118_v38 = vsel %vm1723_vm5, %v2114_v26, 0.0  ;;  %v2881_v61 = vsub.f32 2.0, %v2878_v60  ;;  %v3241_v60 = vld [vmem:[%s1032_s26 + $0x8] sm:$0xff] }
 0x299   : > { %v2502_v59 = vmax.f32 %v2499_v19, 0.0  ;;  %v2891_v13 = vmul.f32 0.5, %v2888_v48  ;;  %v2857_v50 = vmul.f32 2.0, %v2848_v35  ;;  %v2119_v7 = vadd.f32 %v2118_v38, %v5319_v2 }
 0x29a   : > { %v2854_v49 = vadd.f32 0.0001, %v5127_v16  ;;  %v2886_v3 = vmul.f32 %v2883_v30, %v2862_v40  ;;  %v2912_v44 = vsel %vm1723_vm5, %v5210_v32, 0.0  ;;  %v1743_v18 = vmul.f32 0.85, %v1730_v23 }
 0x29b   : > { %v2505_v42 = vmin.f32 %v2502_v59, 1.0  ;;  %v2860_v55 = vadd.f32 0.0009, %v2857_v50  ;;  %v2120_v21 = vmul.f32 0.33333334, %v2119_v7  ;;  %v2894_v24 = vmax.f32 %v2891_v13, 0.0 }
 0x29c   : > { %v2889_v8 = vsub.f32 1.0, %v2886_v3  ;;  %v2913_v31 = vsel %vm1723_vm5, %v5223_v6, 0.0  ;;  %v2884_v2 = vmul.f32 %v5312_v58, %v2881_v61  ;;  %v2525_v32 = vmul.f32 0.15, %v5221_v33 }
 0x29d   : > { %v2509_v4 = vsel %vm1723_vm5, %v2505_v42, 0.0  ;;  %v2863_v36 = vmul.f32 %v2860_v55, %v2854_v49  ;;  %v2133_v53 = vmul.f32 0.85, %v2120_v21  ;;  %v1745_v46 = vadd.f32 %v5168_v28, %v1743_v18 }
 0x29e   : > { %v2510_v16 = vadd.f32 %v2509_v4, %v2508_v39  ;;  %v2892_v56 = vmul.f32 0.5, %v2889_v8  ;;  %v2897_v22 = vmin.f32 %v2894_v24, 1.0  ;;  %v2528_v9 = vmul.f32 1e-05, %v2527_v47 }
 0x29f   : > { %v2887_v52 = vmul.f32 %v2884_v2, %v2863_v36  ;;  %v2135_v14 = vadd.f32 %v5170_v15, %v2133_v53  ;;  %v2914_v6 = vadd.f32 %v2913_v31, %v2912_v44  ;;  %v2915_v39 = vsel %vm1723_vm5, %v2911_v17, 0.0 }
 0x2a0   : > { %v2511_v34 = vmul.f32 0.33333334, %v2510_v16  ;;  %v2895_v12 = vmax.f32 %v2892_v56, 0.0  ;;  %v2900_v33 = vsel %vm1723_vm5, %v2897_v22, 0.0  ;;  %v2923_v26 = vmul.f32 1e-05, %v3241_v60 }
 0x2a1   : > { %v2890_v43 = vsub.f32 1.0, %v2887_v52  ;;  %v2136_v27 = vmin.f32 %v1745_v46, %v2135_v14  ;;  %v2916_v28 = vadd.f32 %v2915_v39, %v2914_v6 }
 0x2a2   : > { %v2524_v58 = vmul.f32 0.85, %v2511_v34  ;;  %v2898_v10 = vmin.f32 %v2895_v12, 1.0 }
 0x2a3   : > { %v2893_v51 = vmul.f32 0.5, %v2890_v43  ;;  %v2917_v41 = vmul.f32 0.33333334, %v2916_v28 }
 0x2a4   : > { %v2526_v0 = vadd.f32 %v2525_v32, %v2524_v58  ;;  %v2901_v1 = vsel %vm1723_vm5, %v2898_v10, 0.0 }
 0x2a5   : > { %v2896_v29 = vmax.f32 %v2893_v51, 0.0  ;;  %v2902_v63 = vadd.f32 %v2901_v1, %v2900_v33  ;;  %v2919_v62 = vmul.f32 0.15, %v2917_v41 }
 0x2a6   : > { %v2529_v15 = vadd.f32 %v2528_v9, %v2526_v0 }
 0x2a7   : > { %v2899_v11 = vmin.f32 %v2896_v29, 1.0 }
 0x2a8   : > { %v2530_v54 = vmin.f32 %v2136_v27, %v2529_v15 }
 0x2a9   : > { %v2903_v45 = vsel %vm1723_vm5, %v2899_v11, 0.0 }
 0x2aa   : > { %v2904_v5 = vadd.f32 %v2903_v45, %v2902_v63 }
 0x2ac   : > { %v2905_v25 = vmul.f32 0.33333334, %v2904_v5 }
 0x2ae   : > { %v2918_v37 = vmul.f32 0.85, %v2905_v25 }
 0x2b0   : > { %v2920_v19 = vadd.f32 %v2919_v62, %v2918_v37 }
 0x2b2   : > { %v2924_v20 = vadd.f32 %v2923_v26, %v2920_v19 }
 0x2b4   : > { %v2925_v57 = vmin.f32 %v2530_v54, %v2924_v20 }
 0x2b6   : > { %v2926_v48 = vsel %vm1723_vm5, %v2925_v57, 0.0 }
 0x2b7   : > { %2927 = vadd.xlane.f32.xlu0 %v2926_v48 }
 0x340   : > { %v2928_v30 = vpop.xlane.xlu0 %2927 }
 0x341   : > { %v2929_v35 = vrot.slane %v2928_v30, 4 }
 0x343   : > { %v2930_v17 = vadd.f32 %v2929_v35, %v2928_v30 }
 0x345   : > { %v2931_v59 = vrot.slane %v2930_v17, 2 }
 0x347   : > { %v2932_v40 = vadd.f32 %v2931_v59, %v2930_v17 }
 0x349   : > { %v2933_v23 = vrot.slane %v2932_v40, 1 }
 0x34b   : > { %v2934_v38 = vadd.f32 %v2933_v23, %v2932_v40 }
 0x34d   : > { %3266 = vpush %v2934_v38 }
 0x37e   : > { %s3267_s29 = spop %3266 }
 0x37f   : > { %v2936_v61 = vstv %s3267_s29 }
 0x380   : > { %2938 = vst.msk [vmem:[%s1117_s28] sm:$0x1] %vm2937_vm6, %v2936_v61 }
 0x381 PF: > { %s21_s23 = sadd.s32 1, %s3420_s23   ;;  %s5565_s30 = sld [smem:[#allocation13_spill]] }
 0x382   : > { %p18_p12 = scmp.ge.s32.totalorder %s21_s23, 6   ;;  %s5566_s13 = sld [smem:[#allocation14_spill]] }
 0x383   : > { %s5567_s17 = smov %s3400_s18  ;;  %s5568_s18 = smov %s3540_s12 }
 0x384   : > { %s5569_s19 = smov %s3412_s21  ;;  %s5570_s20 = smov %s3416_s22 }
 0x385   :  { %20 = sbr.rel (!%p18_p12) target bundleno = 4 (0x4), region = 578 }
 0x387   : > { %s5571_s21 = smov %s5565_s30 }
 0x388   : > { %s5572_s22 = smov %s5566_s13 }

</bundles_post_ra>
